<compile_context>
chip_gen: v7x
topology: tpu7x:2x2x1
jax: 0.10.0
libtpu: 0.0.40
codegen_flags: <defaults>
</compile_context>

<pallas_src>
import functools
import math

import jax
import jax.numpy as jnp
from jax import lax
from jax.experimental import pallas as pl
from jax.experimental.pallas import tpu as pltpu

_LANE = 128
_MAX_TILE_ROWS = 2048            # HBM-roofline gains flatten past ~1k rows
_MAX_PACKED_WIDTH = 512          # bound on k*d when folding rows for lane density
_HEADROOM_BYTES = 8 * 1024 * 1024


def _cdiv(a, b):
    return -(-a // b)


def _sublane(dtype) -> int:
    return {4: 8, 2: 16, 1: 32}.get(jnp.dtype(dtype).itemsize, 8)


def _vmem_capacity_bytes() -> int:
    # Generation-aware: 128 MiB on v5e/v6e, 64 MiB per core on v7x.
    try:
        cap = int(getattr(pltpu.get_tpu_info(), "vmem_capacity_bytes", 0))
        if cap > 0:
            return cap
    except Exception:
        pass
    return 64 * 1024 * 1024      # conservative default (v7x per-core)


def _choose_pack_factor(d: int, n_rows: int) -> int:
    """Largest k with (k*d) % 128 == 0, k*d <= _MAX_PACKED_WIDTH and k | n_rows."""
    if d % _LANE == 0:
        return 1
    k0 = _LANE // math.gcd(d, _LANE)      # smallest k making k*d lane-dense
    best, k = 1, k0
    while k * d <= _MAX_PACKED_WIDTH:
        if n_rows % k == 0:               # packing must not require any padding
            best = k
        k += k0
    return best


def _group_norm_kernel(x_ref, seg_ref, exp_ref, expw_ref, b_ref, o_ref, *,
                       inv_gs, eps, precision):
    # x_ref: (T, D) native dtype; seg: (D, Gp) 0/1 f32; exp: (Gp, D) 0/1 f32;
    # expw: (Gp, D) f32 (0/1 expansion with per-channel weight folded in);
    # b: (1, D) f32.  Compute in f32, store native dtype.
    x = x_ref[...].astype(jnp.float32)
    seg = seg_ref[...]

    # Per-group mean via MXU segment-sum, broadcast back to full width.
    mean_g = jnp.dot(x, seg, precision=precision,
                     preferred_element_type=jnp.float32) * inv_gs
    mean = jnp.dot(mean_g, exp_ref[...], precision=precision,
                   preferred_element_type=jnp.float32)

    # Centered (numerically stable) biased variance via MXU segment-sum.
    c = x - mean
    var_g = jnp.dot(c * c, seg, precision=precision,
                    preferred_element_type=jnp.float32) * inv_gs

    # scale[r, ch] = rsqrt(var+eps) of ch's group * weight[ch] (weight folded host-side).
    scale = jnp.dot(lax.rsqrt(var_g + eps), expw_ref[...], precision=precision,
                    preferred_element_type=jnp.float32)

    o_ref[...] = (c * scale + b_ref[...]).astype(o_ref.dtype)


def group_norm(x, weight=None, bias=None, *, num_groups, eps=1e-5):
    """x: (bs, seq_len, d); weight/bias: (d,) or broadcastable. Returns (bs, seq_len, d)."""
    bs, seq_len, d = x.shape
    assert d % num_groups == 0, "d must be divisible by num_groups"
    gs = d // num_groups
    n_rows = bs * seq_len

    w = (jnp.ones((d,), jnp.float32) if weight is None
         else weight.reshape(-1).astype(jnp.float32))
    b = (jnp.zeros((d,), jnp.float32) if bias is None
         else bias.reshape(-1).astype(jnp.float32))

    # ---- lane-density packing: fold k rows into one row of width k*d (mult of 128) ----
    k = _choose_pack_factor(d, n_rows)
    D = k * d
    Gp = k * num_groups                    # groups per packed row (contiguous, size gs)
    n_packed = n_rows // k                 # exact by construction (no padding)
    xp = x.reshape(n_packed, D)            # contiguous reshape: no HBM copy

    wp = jnp.tile(w, (k,)).reshape(1, D)
    bp = jnp.tile(b, (k,)).reshape(1, D)

    # Static 0/1 segment-sum matrix (D, Gp), expansion (Gp, D), and expansion
    # with the affine weight folded in (scale path) — computed once host-side.
    col_group = jnp.arange(D, dtype=jnp.int32) // gs
    seg = (col_group[:, None] == jnp.arange(Gp, dtype=jnp.int32)[None, :]).astype(jnp.float32)
    exp_m = seg.T
    expw = exp_m * wp

    # ---- VMEM-budgeted tile sizing (generation-aware) ----
    sub = _sublane(x.dtype)
    itemsize = jnp.dtype(x.dtype).itemsize
    vmem_cap = _vmem_capacity_bytes()
    vmem_limit = vmem_cap * 3 // 4         # ~96 MiB on 128 MiB parts, ~48 MiB on v7x

    # Resident constant operands (seg, exp, expw, bias), double-buffered by Pallas.
    const_bytes = 2 * 4 * (D * Gp + 2 * Gp * D + D)
    # Double-buffered in+out x tile (native dtype) + ~4 full-width f32 temps.
    per_row = 2 * 2 * D * itemsize + 4 * D * 4

    tile_budget = vmem_limit - const_bytes - _HEADROOM_BYTES
    if tile_budget < sub * per_row:
        # Constants dominate: raise scoped VMEM toward physical capacity.
        vmem_limit = min(vmem_cap - 2 * 1024 * 1024,
                         const_bytes + sub * per_row + _HEADROOM_BYTES)
        tile_budget = max(vmem_limit - const_bytes - _HEADROOM_BYTES, sub * per_row)

    t = max(sub, min(tile_budget // per_row, _MAX_TILE_ROWS))
    t = (t // sub) * sub

    # Ensure enough grid steps: >=4 for medium/large problems (>=2 per v7x TC so
    # each core still double-buffers), >=2 when possible.
    if n_packed >= 4 * sub:
        min_steps = 4
    elif n_packed >= 2 * sub:
        min_steps = 2
    else:
        min_steps = 1
    t_cap = _cdiv(_cdiv(n_packed, min_steps), sub) * sub
    t = min(t, max(t_cap, sub))
    if t >= n_packed:
        t = n_packed                       # tiny problem: one full block (block == array dim)

    grid = (_cdiv(n_packed, t),)           # ragged tail handled by Pallas edge masking
    precision = (lax.Precision.DEFAULT if itemsize <= 2 else lax.Precision.HIGHEST)
    kernel = functools.partial(_group_norm_kernel, inv_gs=1.0 / float(gs),
                               eps=float(eps), precision=precision)

    out_p = pl.pallas_call(
        kernel,
        out_shape=jax.ShapeDtypeStruct((n_packed, D), x.dtype),
        grid_spec=pltpu.PrefetchScalarGridSpec(
            num_scalar_prefetch=0,
            grid=grid,
            in_specs=[
                pl.BlockSpec((t, D), lambda i: (i, 0)),    # x tile
                pl.BlockSpec((D, Gp), lambda i: (0, 0)),   # segment-sum (resident)
                pl.BlockSpec((Gp, D), lambda i: (0, 0)),   # mean expansion (resident)
                pl.BlockSpec((Gp, D), lambda i: (0, 0)),   # scale expansion * weight
                pl.BlockSpec((1, D), lambda i: (0, 0)),    # bias (resident)
            ],
            out_specs=pl.BlockSpec((t, D), lambda i: (i, 0)),
        ),
        compiler_params=pltpu.CompilerParams(
            dimension_semantics=("parallel",),
            vmem_limit_bytes=int(vmem_limit),
        ),
    )(xp, seg, exp_m, expw, bp)

    # Free reshapes only — no pad, no slice.
    return out_p.reshape(bs, seq_len, d)


def group_norm_ref(x, weight, bias, *, num_groups, eps=1e-5):
    bs, seq_len, d = x.shape
    xr = x.reshape(bs, seq_len, num_groups, d // num_groups)
    mean = jnp.mean(xr, axis=-1, keepdims=True)
    var = jnp.mean((xr - mean) ** 2, axis=-1, keepdims=True)
    y = (xr - mean) / jnp.sqrt(var + eps)
    y = y.reshape(bs, seq_len, d)
    return y * weight.reshape(1, 1, d) + bias.reshape(1, 1, d)


if __name__ == "__main__":
    key = jax.random.PRNGKey(0)
    bs, seq_len, d = 2, 8, 32
    num_groups = 4

    kx, kw, kb = jax.random.split(key, 3)
    x = jax.random.normal(kx, (bs, seq_len, d), dtype=jnp.float32)
    # Module init is ones/zeros; perturb slightly so the affine path is exercised.
    weight = jnp.ones((d,), jnp.float32) + 0.01 * jax.random.normal(kw, (d,), jnp.float32)
    bias = jnp.zeros((d,), jnp.float32) + 0.01 * jax.random.normal(kb, (d,), jnp.float32)

    out = group_norm(x, weight, bias, num_groups=num_groups, eps=1e-5)
    out = jax.block_until_ready(out)

    ref = group_norm_ref(x, weight, bias, num_groups=num_groups, eps=1e-5)
    assert out.shape == (bs, seq_len, d)
    assert jnp.allclose(out, ref, atol=2e-5, rtol=2e-5), "mismatch vs reference"

    print("KERNEL_OK")
</pallas_src>

<mosaic_0001>
module attributes {stable_mosaic.version = 11 : i64} {
  func.func @_group_norm_kernel(%arg0: i32, %arg1: memref<1x512xf32, #tpu.memory_space<vmem>>, %arg2: memref<512x64xf32, #tpu.memory_space<vmem>>, %arg3: memref<64x512xf32, #tpu.memory_space<vmem>>, %arg4: memref<64x512xf32, #tpu.memory_space<vmem>>, %arg5: memref<1x512xf32, #tpu.memory_space<vmem>>, %arg6: memref<1x512xf32, #tpu.memory_space<vmem>>) attributes {dimension_semantics = [#tpu.dimension_semantics<parallel>], iteration_bounds = array<i64: 1>, scalar_prefetch = 0 : i64, scratch_operands = 0 : i64, tpu.core_type = #tpu.core_type<tc>, window_params = [{transform_indices = @transform_0, window_bounds = array<i64: 1, 512>}, {pipeline_mode = #tpu.pipeline_mode<synchronous>, transform_indices = @transform_1, window_bounds = array<i64: 512, 64>}, {pipeline_mode = #tpu.pipeline_mode<synchronous>, transform_indices = @transform_2, window_bounds = array<i64: 64, 512>}, {pipeline_mode = #tpu.pipeline_mode<synchronous>, transform_indices = @transform_3, window_bounds = array<i64: 64, 512>}, {pipeline_mode = #tpu.pipeline_mode<synchronous>, transform_indices = @transform_4, window_bounds = array<i64: 1, 512>}, {transform_indices = @transform_5, window_bounds = array<i64: 1, 512>}]} {
    %c0 = arith.constant 0 : index
    %c0_0 = arith.constant 0 : index
    %0 = vector.load %arg1[%c0, %c0_0] : memref<1x512xf32, #tpu.memory_space<vmem>>, vector<1x512xf32>
    %c0_1 = arith.constant 0 : index
    %c0_2 = arith.constant 0 : index
    %1 = vector.load %arg2[%c0_1, %c0_2] : memref<512x64xf32, #tpu.memory_space<vmem>>, vector<512x64xf32>
    %cst = arith.constant dense<0.000000e+00> : vector<1x64xf32>
    %2 = tpu.matmul %0, %1, %cst {dimension_numbers = #tpu.dot_dimension_numbers<[1], [0], [0], [1], [0, 0, 1, 1], [], []>, precision = #tpu.contract_precision<fp32>} : vector<1x512xf32>, vector<512x64xf32>, vector<1x64xf32> -> vector<1x64xf32>
    %cst_3 = arith.constant 1.250000e-01 : f32
    %3 = vector.broadcast %cst_3 : f32 to vector<1x64xf32>
    %4 = arith.mulf %2, %3 : vector<1x64xf32>
    %c0_4 = arith.constant 0 : index
    %c0_5 = arith.constant 0 : index
    %5 = vector.load %arg3[%c0_4, %c0_5] : memref<64x512xf32, #tpu.memory_space<vmem>>, vector<64x512xf32>
    %cst_6 = arith.constant dense<0.000000e+00> : vector<1x512xf32>
    %6 = tpu.matmul %4, %5, %cst_6 {dimension_numbers = #tpu.dot_dimension_numbers<[1], [0], [0], [1], [0, 0, 1, 1], [], []>, precision = #tpu.contract_precision<fp32>} : vector<1x64xf32>, vector<64x512xf32>, vector<1x512xf32> -> vector<1x512xf32>
    %7 = arith.subf %0, %6 : vector<1x512xf32>
    %8 = arith.mulf %7, %7 : vector<1x512xf32>
    %cst_7 = arith.constant dense<0.000000e+00> : vector<1x64xf32>
    %9 = tpu.matmul %8, %1, %cst_7 {dimension_numbers = #tpu.dot_dimension_numbers<[1], [0], [0], [1], [0, 0, 1, 1], [], []>, precision = #tpu.contract_precision<fp32>} : vector<1x512xf32>, vector<512x64xf32>, vector<1x64xf32> -> vector<1x64xf32>
    %cst_8 = arith.constant 1.250000e-01 : f32
    %10 = vector.broadcast %cst_8 : f32 to vector<1x64xf32>
    %11 = arith.mulf %9, %10 : vector<1x64xf32>
    %cst_9 = arith.constant 9.99999974E-6 : f32
    %12 = vector.broadcast %cst_9 : f32 to vector<1x64xf32>
    %13 = arith.addf %11, %12 : vector<1x64xf32>
    %14 = math.rsqrt %13 : vector<1x64xf32>
    %c0_10 = arith.constant 0 : index
    %c0_11 = arith.constant 0 : index
    %15 = vector.load %arg4[%c0_10, %c0_11] : memref<64x512xf32, #tpu.memory_space<vmem>>, vector<64x512xf32>
    %cst_12 = arith.constant dense<0.000000e+00> : vector<1x512xf32>
    %16 = tpu.matmul %14, %15, %cst_12 {dimension_numbers = #tpu.dot_dimension_numbers<[1], [0], [0], [1], [0, 0, 1, 1], [], []>, precision = #tpu.contract_precision<fp32>} : vector<1x64xf32>, vector<64x512xf32>, vector<1x512xf32> -> vector<1x512xf32>
    %17 = arith.mulf %7, %16 : vector<1x512xf32>
    %c0_13 = arith.constant 0 : index
    %c0_14 = arith.constant 0 : index
    %18 = vector.load %arg5[%c0_13, %c0_14] : memref<1x512xf32, #tpu.memory_space<vmem>>, vector<1x512xf32>
    %19 = arith.addf %17, %18 : vector<1x512xf32>
    %c0_15 = arith.constant 0 : index
    %c0_16 = arith.constant 0 : index
    %20 = vector.load %arg6[%c0_15, %c0_16] : memref<1x512xf32, #tpu.memory_space<vmem>>, vector<1x512xf32>
    tpu.vector_store %arg6[%c0_15, %c0_16], %19 {strides = array<i32>} : memref<1x512xf32, #tpu.memory_space<vmem>>, vector<1x512xf32>,
    return
  }
  func.func @transform_0(%arg0: i32) -> (i32, i32) {
    %c0_i32 = arith.constant 0 : i32
    %c0_i32_0 = arith.constant 0 : i32
    return %arg0, %c0_i32 : i32, i32
  }
  func.func @transform_1(%arg0: i32) -> (i32, i32) {
    %c0_i32 = arith.constant 0 : i32
    %c0_i32_0 = arith.constant 0 : i32
    %c0_i32_1 = arith.constant 0 : i32
    return %c0_i32, %c0_i32_0 : i32, i32
  }
  func.func @transform_2(%arg0: i32) -> (i32, i32) {
    %c0_i32 = arith.constant 0 : i32
    %c0_i32_0 = arith.constant 0 : i32
    %c0_i32_1 = arith.constant 0 : i32
    return %c0_i32, %c0_i32_0 : i32, i32
  }
  func.func @transform_3(%arg0: i32) -> (i32, i32) {
    %c0_i32 = arith.constant 0 : i32
    %c0_i32_0 = arith.constant 0 : i32
    %c0_i32_1 = arith.constant 0 : i32
    return %c0_i32, %c0_i32_0 : i32, i32
  }
  func.func @transform_4(%arg0: i32) -> (i32, i32) {
    %c0_i32 = arith.constant 0 : i32
    %c0_i32_0 = arith.constant 0 : i32
    %c0_i32_1 = arith.constant 0 : i32
    return %c0_i32, %c0_i32_0 : i32, i32
  }
  func.func @transform_5(%arg0: i32) -> (i32, i32) {
    %c0_i32 = arith.constant 0 : i32
    %c0_i32_0 = arith.constant 0 : i32
    return %arg0, %c0_i32 : i32, i32
  }
}

</mosaic_0001>

<bundles_post_ra>
// kernel: tpu_custom_call.1
= control target key start
LH: loop header
LB: loop body
LE: loop exit
PB: predicated region body
PF: predicated region fallthrough
CT: control target
= control target key end

     0   :  { %s11499_s0 = inlined_call_operand.vmem [shape: f32[1,512], index: 0, kind: input, shape index: {}]   ;;  %s11500_s1 = inlined_call_operand.vmem [shape: f32[512,64], index: 1, kind: input, shape index: {}]   ;;  %s11501_s2 = inlined_call_operand.vmem [shape: f32[64,512], index: 2, kind: input, shape index: {}]   ;;  %s11502_s3 = inlined_call_operand.vmem [shape: f32[64,512], index: 3, kind: input, shape index: {}]   ;;  %s11503_s4 = inlined_call_operand.vmem [shape: f32[1,512], index: 4, kind: input, shape index: {}]   ;;  %s11504_s5 = inlined_call_operand.hbm [shape: f32[1,512], index: 5, kind: output, shape index: {}]  }
   0x1   :  { %v38_v0 = vld [vmem:[%s11500_s1 + $0x80] sm:$0xff]  ;;  %v39_v1 = vld [vmem:[%s11500_s1 + $0x88] sm:$0xff]  ;;  %v40_v7 = vld [vmem:[%s11500_s1 + $0x90] sm:$0xff] }
   0x2   :  { %v22_v2 = vld [vmem:[%s11500_s1] sm:$0xff]  ;;  %v156_v3 = vand.u32 4294901760, %v38_v0  ;;  %v159_v4 = vand.u32 4294901760, %v39_v1  ;;  %v23_v5 = vld [vmem:[%s11500_s1 + $0x8] sm:$0xff]  ;;  %v41_v8 = vld [vmem:[%s11500_s1 + $0x98] sm:$0xff]  ;;  %v162_v10 = vand.u32 4294901760, %v40_v7 }
   0x3   :  { %v108_v6 = vand.u32 4294901760, %v22_v2  ;;  %v111_v9 = vand.u32 4294901760, %v23_v5  ;;  %v165_v11 = vand.u32 4294901760, %v41_v8  ;;  %v24_v12 = vld [vmem:[%s11500_s1 + $0x10] sm:$0xff]  ;;  %v25_v13 = vld [vmem:[%s11500_s1 + $0x18] sm:$0xff]  ;;  %v8443_v14 = vld [vmem:[%s11500_s1 + $0xa0] sm:$0xff] }
   0x4   :  { %v8445_v16 = vpack.c.bf16 %v159_v4, %v156_v3  ;;  %v114_v17 = vand.u32 4294901760, %v24_v12  ;;  %v117_v18 = vand.u32 4294901760, %v25_v13  ;;  %v8450_v19 = vld [vmem:[%s11500_s1 + $0xa8] sm:$0xff]  ;;  %v168_v20 = vand.u32 4294901760, %v8443_v14  ;;  %v8456_v21 = vld [vmem:[%s11500_s1 + $0x20] sm:$0xff]  ;;  %v8473_v27 = vld [vmem:[%s11500_s1 + $0xb0] sm:$0xff] }
   0x5   :  { %v8461_v22 = vld [vmem:[%s11500_s1 + $0x28] sm:$0xff]  ;;  %v8463_v23 = vpack.c.bf16 %v111_v9, %v108_v6  ;;  %v8465_v24 = vpack.c.bf16 %v165_v11, %v162_v10  ;;  %v171_v25 = vand.u32 4294901760, %v8450_v19  ;;  %v8468_v26 = vsub.f32 %v38_v0, %v156_v3  ;;  %v8478_v28 = vld [vmem:[%s11500_s1 + $0xb8] sm:$0xff]  ;;  %v8502_v37 = vld [vmem:[%s11500_s1 + $0x30] sm:$0xff] }
   0x6   :  { %11874 = vst [vmem:[#allocation5_spill] sm:$0xff] %v8445_v16  ;;  %7162 = vmatprep.subr.bf16.mxu0 %v8445_v16  ;;  %v8481_v29 = vpack.c.bf16 %v117_v18, %v114_v17  ;;  %v8483_v30 = vsub.f32 %v39_v1, %v159_v4  ;;  %v120_v31 = vand.u32 4294901760, %v8456_v21  ;;  %v123_v32 = vand.u32 4294901760, %v8461_v22  ;;  %v8524_v46 = vld [vmem:[%s11500_s1 + $0x38] sm:$0xff]  ;;  %v8554_v59 = vld [vmem:[%s11500_s1 + $0xc0] sm:$0xff]  ;;  %v8564_v0 = vld [vmem:[%s11500_s1 + $0xc8] sm:$0xff] }
   0x7   :  { %11875 = vst [vmem:[#allocation6_spill] sm:$0xff] %v8463_v23  ;;  %11876 = vst [vmem:[#allocation7_spill] sm:$0xff] %v8465_v24  ;;  %7164 = vmatpush3.bf16.msra.mxu0 %v8463_v23  ;;  %v8492_v33 = vpack.c.bf16 %v171_v25, %v168_v20  ;;  %v11518_v34 = vand.u32 4294901760, %v8468_v26  ;;  %v8495_v35 = vsub.f32 %v22_v2, %v108_v6  ;;  %v174_v40 = vand.u32 4294901760, %v8473_v27  ;;  %v8586_v6 = vld [vmem:[%s11500_s1 + $0x48] sm:$0xff] }
   0x8   :  { %11877 = vst [vmem:[#allocation8_spill] sm:$0xff] %v8481_v29  ;;  %v8497_v36 = vsub.f32 %v23_v5, %v111_v9  ;;  %7166 = vmatprep.subr.bf16.mxu0 %v8465_v24  ;;  %v11515_v38 = vand.u32 4294901760, %v8483_v30  ;;  %v8510_v39 = vpack.c.bf16 %v123_v32, %v120_v31  ;;  %v177_v41 = vand.u32 4294901760, %v8478_v28  ;;  %v8581_v5 = vld [vmem:[%s11500_s1 + $0x40] sm:$0xff] }
   0x9   :  { %11878 = vst [vmem:[#allocation9_spill] sm:$0xff] %v8492_v33  ;;  %v335_v42 = vsub.f32 %v8468_v26, %v11518_v34  ;;  %v11514_v43 = vand.u32 4294901760, %v8495_v35  ;;  %v8519_v45 = vsub.f32 %v40_v7, %v162_v10  ;;  %v8535_v49 = vsub.f32 %v41_v8, %v165_v11 }
   0xa   :  { %11879 = vst [vmem:[#allocation10_spill] sm:$0xff] %v8510_v39  ;;  %v11513_v44 = vand.u32 4294901760, %v8497_v36  ;;  %v342_v47 = vsub.f32 %v8483_v30, %v11515_v38  ;;  %v8533_v48 = vpack.c.bf16 %v177_v41, %v174_v40  ;;  %v126_v50 = vand.u32 4294901760, %v8502_v37 }
   0xb   :  { %7168 = vmatpush3.bf16.msra.mxu0 %v8481_v29  ;;  %v336_v51 = vand.u32 4294901760, %v335_v42  ;;  %v223_v52 = vsub.f32 %v8495_v35, %v11514_v43  ;;  %v11512_v54 = vand.u32 4294901760, %v8519_v45  ;;  %v11509_v56 = vand.u32 4294901760, %v8535_v49 }
   0xc   :  { %11880 = vst [vmem:[#allocation11_spill] sm:$0xff] %v8533_v48  ;;  %v230_v53 = vsub.f32 %v8497_v36, %v11513_v44  ;;  %7170 = vmatprep.subr.bf16.mxu0 %v8492_v33  ;;  %v343_v55 = vand.u32 4294901760, %v342_v47  ;;  %v129_v57 = vand.u32 4294901760, %v8524_v46  ;;  %v8549_v58 = vsub.f32 %v24_v12, %v114_v17 }
   0xd   :  { %v224_v60 = vand.u32 4294901760, %v223_v52  ;;  %v349_v62 = vsub.f32 %v8519_v45, %v11512_v54  ;;  %v8559_v63 = vsub.f32 %v25_v13, %v117_v18  ;;  %v356_v2 = vsub.f32 %v8535_v49, %v11509_v56 }
   0xe   :  { %v231_v61 = vand.u32 4294901760, %v230_v53  ;;  %v8566_v1 = vpack.c.bf16 %v343_v55, %v336_v51  ;;  %v8575_v3 = vpack.c.bf16 %v129_v57, %v126_v50  ;;  %v11508_v4 = vand.u32 4294901760, %v8549_v58 }
   0xf   :  { %7172 = vmatpush3.bf16.msra.mxu0 %v8510_v39  ;;  %v350_v8 = vand.u32 4294901760, %v349_v62  ;;  %v11506_v9 = vand.u32 4294901760, %v8559_v63  ;;  %v180_v10 = vand.u32 4294901760, %v8554_v59  ;;  %v357_v11 = vand.u32 4294901760, %v356_v2 }
  0x10   :  { %11881 = vst [vmem:[#allocation12_spill] sm:$0xff] %v8566_v1  ;;  %11882 = vst [vmem:[#allocation13_spill] sm:$0xff] %v8575_v3  ;;  %v8589_v7 = vpack.c.bf16 %v231_v61, %v224_v60  ;;  %7194 = vmatprep.subr.bf16.mxu1 %v8566_v1  ;;  %7174 = vmatprep.subr.bf16.mxu0 %v8533_v48  ;;  %v237_v12 = vsub.f32 %v8549_v58, %v11508_v4  ;;  %v183_v13 = vand.u32 4294901760, %v8564_v0 }
  0x11   :  { %v8602_v17 = vsub.f32 %v8443_v14, %v168_v20  ;;  %v244_v18 = vsub.f32 %v8559_v63, %v11506_v9  ;;  %v8611_v42 = vsub.f32 %v8450_v19, %v171_v25  ;;  %v132_v47 = vand.u32 4294901760, %v8581_v5  ;;  %v8618_v14 = vld [vmem:[%s11500_s1 + $0xd0] sm:$0xff]  ;;  %v8623_v20 = vld [vmem:[%s11500_s1 + $0xd8] sm:$0xff] }
  0x12   :  { %11883 = vst [vmem:[#allocation14_spill] sm:$0xff] %v8589_v7  ;;  %7196 = vmatpush3.bf16.msra.mxu1 %v8589_v7  ;;  %v135_v51 = vand.u32 4294901760, %v8586_v6  ;;  %v8625_v52 = vpack.c.bf16 %v357_v11, %v350_v8  ;;  %v238_v53 = vand.u32 4294901760, %v237_v12  ;;  %v8631_v19 = vpack.c.bf16 %v183_v13, %v180_v10 }
  0x13   :  { %v11505_v25 = vand.u32 4294901760, %v8602_v17  ;;  %7176 = vmatpush3.bf16.msra.mxu0 %v8575_v3  ;;  %v245_v55 = vand.u32 4294901760, %v244_v18  ;;  %v11507_v60 = vand.u32 4294901760, %v8611_v42  ;;  %v8645_v62 = vsub.f32 %v8456_v21, %v120_v31  ;;  %v8662_v21 = vld [vmem:[%s11500_s1 + $0x50] sm:$0xff] }
  0x14   :  { %11884 = vst [vmem:[#allocation15_spill] sm:$0xff] %v8625_v52  ;;  %11885 = vst [vmem:[#allocation16_spill] sm:$0xff] %v8631_v19  ;;  %v8640_v61 = vpack.c.bf16 %v135_v51, %v132_v47  ;;  %7198 = vmatprep.subr.bf16.mxu1 %v8625_v52  ;;  %7178 = vmatprep.subr.bf16.mxu0 %v8631_v19  ;;  %v8655_v8 = vsub.f32 %v8461_v22, %v123_v32  ;;  %v11526_v11 = vand.u32 4294901760, %v8618_v14  ;;  %v8678_v32 = vld [vmem:[%s11500_s1 + $0x58] sm:$0xff] }
  0x15   :  { %v363_v2 = vsub.f32 %v8602_v17, %v11505_v25  ;;  %v11525_v12 = vand.u32 4294901760, %v8623_v20  ;;  %v8664_v31 = vpack.c.bf16 %v245_v55, %v238_v53  ;;  %v370_v18 = vsub.f32 %v8611_v42, %v11507_v60 }
  0x16   :  { %11886 = vst [vmem:[#allocation17_spill] sm:$0xff] %v8640_v61  ;;  %v11510_v25 = vand.u32 4294901760, %v8645_v62  ;;  %v8673_v22 = vsub.f32 %v8473_v27, %v174_v40  ;;  %v11511_v53 = vand.u32 4294901760, %v8655_v8  ;;  %v8690_v60 = vsub.f32 %v8478_v28, %v177_v41 }
  0x17   :  { %11887 = vst [vmem:[#allocation18_spill] sm:$0xff] %v8664_v31  ;;  %v364_v9 = vand.u32 4294901760, %v363_v2  ;;  %v8685_v55 = vpack.c.bf16 %v11525_v12, %v11526_v11 }
  0x19   :  { %11888 = vst [vmem:[#allocation19_spill] sm:$0xff] %v8685_v55 }
  0x1a   :  { %10 = vsyncpa [#allocation3], 0  ;;  %7200 = vmatpush3.bf16.msra.mxu1 %v8664_v31  ;;  %v371_v27 = vand.u32 4294901760, %v370_v18  ;;  %7180 = vmatpush3.bf16.msra.mxu0 %v8640_v61  ;;  %v251_v40 = vsub.f32 %v8645_v62, %v11510_v25  ;;  %v11517_v2 = vand.u32 4294901760, %v8673_v22  ;;  %v11521_v4 = vand.u32 4294901760, %v8662_v21  ;;  %v8713_v25 = vld [vmem:[%s11500_s1 + $0xe0] sm:$0xff] }
  0x1b   :  { %v258_v56 = vsub.f32 %v8655_v8, %v11511_v53  ;;  %7182 = vmatprep.subr.bf16.mxu0 %v8685_v55  ;;  %v11516_v28 = vand.u32 4294901760, %v8690_v60  ;;  %v11520_v41 = vand.u32 4294901760, %v8678_v32  ;;  %v8708_v18 = vsub.f32 %v8502_v37, %v126_v50  ;;  %v8718_v53 = vld [vmem:[%s11500_s1 + $0xe8] sm:$0xff]  ;;  %s8385_s18 = smov [#allocation2]  }
  0x1c   :  { %v8720_v54 = vpack.c.bf16 %v371_v27, %v364_v9  ;;  %v252_v44 = vand.u32 4294901760, %v251_v40  ;;  %v377_v43 = vsub.f32 %v8673_v22, %v11517_v2  ;;  %v8728_v37 = vsub.f32 %v8524_v46, %v129_v57  ;;  %v8743_v40 = vld [vmem:[%s11500_s1 + $0x60] sm:$0xff]  ;;  %v8752_v2 = vld [vmem:[%s11500_s1 + $0x68] sm:$0xff]  ;;  %s6313_s19 = sshll.u32 %s8385_s18, 4  ;;  %s6314_s19 = int_to_ptr.vmem [resolvable:$true] %s6313_s19 }
  0x1d   :  { %v259_v50 = vand.u32 4294901760, %v258_v56  ;;  %v384_v38 = vsub.f32 %v8690_v60, %v11516_v28  ;;  %v8737_v9 = vpack.c.bf16 %v11520_v41, %v11521_v4  ;;  %v11523_v27 = vand.u32 4294901760, %v8708_v18  ;;  %s8359_s20 = scalar_lea.vmem %s6314_s19, 64  ;;  %p8364_p1 = scmp.lt.s32.totalorder %s6314_s19, %s6314_s19 }
  0x1e   :  { %11889 = vst [vmem:[#allocation20_spill] sm:$0xff] %v8720_v54  ;;  %7202 = vmatprep.subr.bf16.mxu1 %v8720_v54  ;;  %v378_v46 = vand.u32 4294901760, %v377_v43  ;;  %v11522_v56 = vand.u32 4294901760, %v8728_v37  ;;  %v192_v57 = vand.u32 4294901760, %v8713_v25  ;;  %v11524_v28 = vand.u32 4294901760, %v8718_v53  ;;  %p8360_p0 = scmp.ne.s32.totalorder %s6314_s19, %s8359_s20  ;;  %p8365_p2 = scmp.lt.s32.totalorder %s8359_s20, %s8359_s20 }
  0x1f   :  { %11890 = vst [vmem:[#allocation21_spill] sm:$0xff] %v8737_v9  ;;  %v8754_v34 = vpack.c.bf16 %v259_v50, %v252_v44  ;;  %v385_v15 = vand.u32 4294901760, %v384_v38  ;;  %7184 = vmatpush3.bf16.msra.mxu0 %v8737_v9  ;;  %v265_v43 = vsub.f32 %v8708_v18, %v11523_v27  ;;  %v8763_v41 = vsub.f32 %v8554_v59, %v180_v10  ;;  %v8781_v59 = vld [vmem:[%s11500_s1 + $0xf0] sm:$0xff]  ;;  %v8786_v10 = vld [vmem:[%s11500_s1 + $0xf8] sm:$0xff] }
  0x20   :  { %v272_v4 = vsub.f32 %v8728_v37, %v11522_v56  ;;  %v8770_v44 = vpack.c.bf16 %v11524_v28, %v192_v57  ;;  %v8775_v38 = vsub.f32 %v8564_v0, %v183_v13  ;;  %v11529_v50 = vand.u32 4294901760, %v8743_v40  ;;  %p8366_p3 = por %p8365_p2, %p8364_p1 }
  0x21   :  { %11891 = vst [vmem:[#allocation22_spill] sm:$0xff] %v8754_v34  ;;  %7204 = vmatpush3.bf16.msra.mxu1 %v8754_v34  ;;  %v8789_v56 = vpack.c.bf16 %v385_v15, %v378_v46  ;;  %v266_v27 = vand.u32 4294901760, %v265_v43  ;;  %v11527_v0 = vand.u32 4294901760, %v8763_v41  ;;  %v11528_v13 = vand.u32 4294901760, %v8752_v2 }
  0x22   :  { %11892 = vst [vmem:[#allocation23_spill] sm:$0xff] %v8770_v44  ;;  %v273_v28 = vand.u32 4294901760, %v272_v4  ;;  %7186 = vmatprep.subr.bf16.mxu0 %v8770_v44  ;;  %v11530_v12 = vand.u32 4294901760, %v8775_v38  ;;  %v8798_v11 = vsub.f32 %v8581_v5, %v132_v47  ;;  %v8803_v15 = vsub.f32 %v8586_v6, %v135_v51  ;;  %v8820_v6 = vld [vmem:[%s11500_s1 + $0x70] sm:$0xff]  ;;  %p8367_p4 = pnand %p8366_p3, %p8360_p0 }
  0x23   :  { %11893 = vst [vmem:[#allocation24_spill] sm:$0xff] %v8789_v56  ;;  %7206 = vmatprep.subr.bf16.mxu1 %v8789_v56  ;;  %v391_v4 = vsub.f32 %v8763_v41, %v11527_v0  ;;  %v8813_v46 = vpack.c.bf16 %v11528_v13, %v11529_v50  ;;  %v11534_v5 = vand.u32 4294901760, %v8781_v59  ;;  %v8832_v50 = vld [vmem:[%s11500_s1 + $0x78] sm:$0xff]  ;;  %v11899_v13 = vand.u32 4294901760, %v8623_v20 }
  0x24   :  { %v8822_v51 = vpack.c.bf16 %v273_v28, %v266_v27  ;;  %v398_v43 = vsub.f32 %v8775_v38, %v11530_v12  ;;  %v11896_v28 = vand.u32 4294901760, %v8786_v10  ;;  %v11898_v12 = vand.u32 4294901760, %v8618_v14 }
  0x25   :  { %11894 = vst [vmem:[#allocation25_spill] sm:$0xff] %v8813_v46  ;;  %v392_v47 = vand.u32 4294901760, %v391_v4  ;;  %7188 = vmatpush3.bf16.msra.mxu0 %v8813_v46  ;;  %v8849_v56 = vsub.f32 %v8623_v20, %v11899_v13  ;;  %v11900_v34 = vand.u32 4294901760, %v8798_v11  ;;  %v11902_v13 = vand.u32 4294901760, %v8662_v21 }
  0x26   :  { %11895 = vst [vmem:[#allocation26_spill] sm:$0xff] %v8822_v51  ;;  %v8839_v27 = vpack.c.bf16 %v11896_v28, %v11534_v5  ;;  %v8844_v0 = vsub.f32 %v8618_v14, %v11898_v12  ;;  %7208 = vmatpush3.bf16.msra.mxu1 %v8822_v51  ;;  %v399_v4 = vand.u32 4294901760, %v398_v43  ;;  %v11901_v28 = vand.u32 4294901760, %v8803_v15 }
  0x27   :  { %v279_v54 = vsub.f32 %v8798_v11, %v11900_v34  ;;  %v8866_v43 = vsub.f32 %v8662_v21, %v11902_v13  ;;  %v11905_v12 = vand.u32 4294901760, %v8849_v56  ;;  %v11906_v21 = vand.u32 4294901760, %v8820_v6 }
  0x28   :  { %11897 = vst [vmem:[#allocation27_spill] sm:$0xff] %v8839_v27  ;;  %v286_v5 = vsub.f32 %v8803_v15, %v11901_v28  ;;  %7190 = vmatprep.subr.bf16.mxu0 %v8839_v27  ;;  %v11539_v14 = vand.u32 4294901760, %v8844_v0  ;;  %v8868_v34 = vpack.c.bf16 %v399_v4, %v392_v47  ;;  %v11904_v28 = vand.u32 4294901760, %v8678_v32 }
  0x29   :  { %v280_v51 = vand.u32 4294901760, %v279_v54  ;;  %v412_v7 = vsub.f32 %v8849_v56, %v11905_v12  ;;  %v11907_v47 = vand.u32 4294901760, %v8832_v50  ;;  %v11541_v54 = vand.u32 4294901760, %v8866_v43 }
  0x2a   :  { %11903 = vst [vmem:[#allocation28_spill] sm:$0xff] %v8868_v34  ;;  %v287_v52 = vand.u32 4294901760, %v286_v5  ;;  %v8873_v31 = vsub.f32 %v8678_v32, %v11904_v28  ;;  %v405_v20 = vsub.f32 %v8844_v0, %v11539_v14  ;;  %7210 = vmatprep.subr.bf16.mxu1 %v8868_v34  ;;  %v11910_v13 = vlaneseq }
  0x2b   :  { %v8885_v4 = vpack.c.bf16 %v11907_v47, %v11906_v21  ;;  %v8896_v14 = vsub.f32 %v8713_v25, %v192_v57  ;;  %v413_v1 = vand.u32 4294901760, %v412_v7  ;;  %v293_v21 = vsub.f32 %v8866_v43, %v11541_v54 }
  0x2c   :  { %v8889_v32 = vpack.c.bf16 %v287_v52, %v280_v51  ;;  %v11543_v5 = vand.u32 4294901760, %v8873_v31  ;;  %v8893_v28 = vshrl.u32 %v11910_v13, 7  ;;  %v406_v12 = vand.u32 4294901760, %v405_v20  ;;  %v8905_v52 = vld [vmem:[%s11499_s0] sm:$0xf] }
  0x2d   :  { %11908 = vst [vmem:[#allocation29_spill] sm:$0xff] %v8885_v4  ;;  %7192 = vmatpush3.bf16.msra.mxu0 %v8885_v4  ;;  %11912 = vst [vmem:[#allocation32_spill] sm:$0xff] %v8905_v52  ;;  %v11913_v51 = vand.u32 4294901760, %v8718_v53  ;;  %v11548_v57 = vand.u32 4294901760, %v8896_v14  ;;  %v8920_v20 = vpack.c.bf16 %v8483_v30, %v8468_v26  ;;  %v294_v13 = vand.u32 4294901760, %v293_v21 }
  0x2e   :  { %11909 = vst [vmem:[#allocation30_spill] sm:$0xff] %v8889_v32  ;;  %11911 = vst [vmem:[#allocation31_spill] sm:$0xff] %v8893_v28  ;;  %7212 = vmatpush3.bf16.msra.mxu1 %v8889_v32  ;;  %v300_v7 = vsub.f32 %v8873_v31, %v11543_v5  ;;  %v11547_v25 = vsub.s32 1, %v8893_v28  ;;  %v8922_v54 = vpack.c.bf16 %v413_v1, %v406_v12  ;;  %v11916_v4 = vand.u32 4294901760, %v8743_v40 }
  0x2f   :  { %v8910_v47 = vsub.f32 %v8718_v53, %v11913_v51  ;;  %11914 = vst [vmem:[#allocation33_spill] sm:$0xff] %v8920_v20  ;;  %v11556_v51 = vsub.s32 0, %v8893_v28  ;;  %v419_v34 = vsub.f32 %v8896_v14, %v11548_v57  ;;  %7226 = vmatprep.subr.bf16.mxu0 %v8920_v20  ;;  %v11920_v28 = vand.u32 4294901760, %v8781_v59 }
  0x30   :  { %11915 = vst [vmem:[#allocation34_spill] sm:$0xff] %v8922_v54  ;;  %v301_v32 = vand.u32 4294901760, %v300_v7  ;;  %v94_v5 = vrot.slane %v8905_v52, %v11547_v25  ;;  %v8936_v1 = vsub.f32 %v8743_v40, %v11916_v4  ;;  %7214 = vmatprep.subr.bf16.mxu1 %v8922_v54  ;;  %v11917_v7 = vand.u32 4294901760, %v8752_v2 }
  0x31   :  { %v11553_v53 = vand.u32 4294901760, %v8910_v47  ;;  %v90_v21 = vrot.slane %v8905_v52, %v11556_v51  ;;  %v420_v40 = vand.u32 4294901760, %v419_v34  ;;  %v8961_v51 = vsub.f32 %v8781_v59, %v11920_v28 }
  0x32   :  { %v8948_v25 = vsub.f32 %v8752_v2, %v11917_v7  ;;  %v8950_v57 = vpack.c.bf16 %v301_v32, %v294_v13  ;;  %v8952_v20 = vand.u32 4294901760, %v94_v5  ;;  %v11557_v4 = vand.u32 4294901760, %v8936_v1 }
  0x33   :  { %v426_v12 = vsub.f32 %v8910_v47, %v11553_v53  ;;  %v8955_v27 = vand.u32 4294901760, %v90_v21  ;;  %v11921_v32 = vand.u32 4294901760, %v8786_v10  ;;  %vm1864_vm0 = vcmask 523264  }
  0x34   :  { %11918 = vst [vmem:[#allocation35_spill] sm:$0xff] %v8950_v57  ;;  %11919 = vst [vmem:[#allocation36_spill] sm:$0xff] %v8952_v20  ;;  %v11559_v53 = vand.u32 4294901760, %v8948_v25  ;;  %7216 = vmatpush3.bf16.msra.mxu1 %v8950_v57  ;;  %v8965_v2 = vsub.f32 %v94_v5, %v8952_v20  ;;  %v307_v34 = vsub.f32 %v8936_v1, %v11557_v4  ;;  %v11563_v5 = vand.u32 4294901760, %v8961_v51 }
  0x35   :  { %v427_v54 = vand.u32 4294901760, %v426_v12  ;;  %v8973_v13 = vsub.f32 %v8786_v10, %v11921_v32  ;;  %v8978_v7 = vsub.f32 %v90_v21, %v8955_v27  ;;  %444 = vmatprep.mubr.f32.mxu1 %v8952_v20  ;;  %v11923_v10 = vand.u32 4294901760, %v8820_v6 }
  0x36   :  { %v314_v59 = vsub.f32 %v8948_v25, %v11559_v53  ;;  %v205_v28 = vand.u32 4294901760, %v8965_v2  ;;  %v308_v4 = vand.u32 4294901760, %v307_v34  ;;  %v433_v32 = vsub.f32 %v8961_v51, %v11563_v5 }
  0x37   :  { %v8975_v12 = vpack.c.bf16 %v427_v54, %v420_v40  ;;  %v8990_v54 = vsub.f32 %v8820_v6, %v11923_v10  ;;  %v11572_v21 = vand.u32 4294901760, %v8978_v7  ;;  %v11924_v53 = vand.u32 4294901760, %v8832_v50 }
  0x38   :  { %v315_v40 = vand.u32 4294901760, %v314_v59  ;;  %v206_v57 = vsub.f32 %v8965_v2, %v205_v28  ;;  %v11925_v52 = vand.u32 4294901760, %v8973_v13  ;;  %v434_v5 = vand.u32 4294901760, %v433_v32 }
  0x39   :  { %11922 = vst [vmem:[#allocation37_spill] sm:$0xff] %v8975_v12  ;;  %7218 = vmatprep.subr.bf16.mxu1 %v8975_v12  ;;  %v9000_v34 = vsub.f32 %v8832_v50, %v11924_v53  ;;  %v11570_v10 = vand.u32 4294901760, %v8990_v54  ;;  %v212_v59 = vsub.f32 %v8978_v7, %v11572_v21  ;;  %v9015_v50 = vpack.c.bf16 %v8497_v36, %v8495_v35 }
  0x3a   :  { %v440_v6 = vsub.f32 %v8973_v13, %v11925_v52  ;;  %v9010_v12 = vpack.c.bf16 %v315_v40, %v308_v4  ;;  %v207_v46 = vand.u32 4294901760, %v206_v57  ;;  %v9023_v4 = vpack.c.bf16 %v8535_v49, %v8519_v45 }
  0x3b   :  { %v11571_v20 = vand.u32 4294901760, %v9000_v34  ;;  %11927 = vst [vmem:[#allocation39_spill] sm:$0xff] %v9015_v50  ;;  %v321_v52 = vsub.f32 %v8990_v54, %v11570_v10  ;;  %v213_v44 = vand.u32 4294901760, %v212_v59  ;;  %v9034_v59 = vpack.c.bf16 %v8559_v63, %v8549_v58 }
  0x3c   :  { %11926 = vst [vmem:[#allocation38_spill] sm:$0xff] %v9010_v12  ;;  %v441_v53 = vand.u32 4294901760, %v440_v6  ;;  %7220 = vmatpush3.bf16.msra.mxu1 %v9010_v12  ;;  %11928 = vst [vmem:[#allocation40_spill] sm:$0xff] %v9023_v4  ;;  %208 = vmatprep.mubr.f32.mxu0 %v207_v46  ;;  %v9038_v10 = vpack.c.bf16 %v8611_v42, %v8602_v17 }
  0x3d   :  { %v328_v57 = vsub.f32 %v9000_v34, %v11571_v20  ;;  %v322_v32 = vand.u32 4294901760, %v321_v52  ;;  %214 = vmatmul.mubr.f32.vlgmr.msra.gmra.mrb[0].mxu0 %v213_v44  ;;  %11930 = vst [vmem:[#allocation42_spill] sm:$0xff] %v9034_v59  ;;  %v9045_v44 = vpack.c.bf16 %v8655_v8, %v8645_v62  ;;  %v11938_v20 = vand.u32 4294901760, %v8497_v36 }
  0x3e   :  { %v9028_v40 = vpack.c.bf16 %v441_v53, %v434_v5  ;;  %7228 = vmatpush3.bf16.msra.mxu0 %v9015_v50  ;;  %11931 = vst [vmem:[#allocation43_spill] sm:$0xff] %v9038_v10  ;;  %581 = vmatprep.mubr.f32.mxu0 %v8965_v2  ;;  %v11934_v5 = vand.u32 4294901760, %v8468_v26  ;;  %v11935_v53 = vand.u32 4294901760, %v8483_v30  ;;  %v11943_v2 = vand.u32 4294901760, %v8549_v58 }
  0x3f   :  { %v329_v6 = vand.u32 4294901760, %v328_v57  ;;  %7230 = vmatprep.subr.bf16.mxu0 %v9023_v4  ;;  %11933 = vst [vmem:[#allocation45_spill] sm:$0xff] %v9045_v44  ;;  %v11937_v57 = vand.u32 4294901760, %v8495_v35  ;;  %v11944_v26 = vand.u32 4294901760, %v8559_v63  ;;  %v11946_v30 = vand.u32 4294901760, %v8602_v17 }
  0x40   :  { %11929 = vst [vmem:[#allocation41_spill] sm:$0xff] %v9028_v40  ;;  %7222 = vmatprep.subr.bf16.mxu1 %v9028_v40  ;;  %v9052_v52 = vpack.c.bf16 %v11935_v53, %v11934_v5  ;;  %v11947_v35 = vand.u32 4294901760, %v8611_v42  ;;  %v11949_v36 = vand.u32 4294901760, %v8645_v62  ;;  %v11952_v58 = vand.u32 4294901760, %v8673_v22 }
  0x41   :  { %v9041_v46 = vpack.c.bf16 %v329_v6, %v322_v32  ;;  %v9058_v21 = vpack.c.bf16 %v11938_v20, %v11937_v57  ;;  %v11940_v32 = vand.u32 4294901760, %v8519_v45  ;;  %v11941_v6 = vand.u32 4294901760, %v8535_v49 }
  0x42   :  { %11936 = vst [vmem:[#allocation46_spill] sm:$0xff] %v9052_v52  ;;  %v9070_v50 = vpack.c.bf16 %v11944_v26, %v11943_v2  ;;  %v9076_v5 = vpack.c.bf16 %v11947_v35, %v11946_v30  ;;  %v11950_v45 = vand.u32 4294901760, %v8655_v8  ;;  %v11953_v63 = vand.u32 4294901760, %v8690_v60  ;;  %7232 = vmatpush3.bf16.msra.mxu0 %v9034_v59 }
  0x43   :  { %11932 = vst [vmem:[#allocation44_spill] sm:$0xff] %v9041_v46  ;;  %11939 = vst [vmem:[#allocation47_spill] sm:$0xff] %v9058_v21  ;;  %v9064_v4 = vpack.c.bf16 %v11941_v6, %v11940_v32  ;;  %7224 = vmatpush3.bf16.msra.mxu1 %v9041_v46  ;;  %v11955_v17 = vand.u32 4294901760, %v8708_v18  ;;  %v11956_v42 = vand.u32 4294901760, %v8728_v37  ;;  %v11958_v57 = vand.u32 4294901760, %v8763_v41  ;;  %7234 = vmatprep.subr.bf16.mxu0 %v9038_v10 }
  0x44   :  { %11945 = vst [vmem:[#allocation49_spill] sm:$0xff] %v9070_v50  ;;  %11948 = vst [vmem:[#allocation50_spill] sm:$0xff] %v9076_v5  ;;  %v9083_v49 = vpack.c.bf16 %v11950_v45, %v11949_v36  ;;  %v9089_v20 = vpack.c.bf16 %v11953_v63, %v11952_v58  ;;  %v11959_v62 = vand.u32 4294901760, %v8775_v38  ;;  %7258 = vmatprep.subr.bf16.mxu1 %v8445_v16  ;;  %v11961_v8 = vand.u32 4294901760, %v8798_v11 }
  0x45   :  { %11942 = vst [vmem:[#allocation48_spill] sm:$0xff] %v9064_v4  ;;  %v9095_v53 = vpack.c.bf16 %v11956_v42, %v11955_v17  ;;  %v11962_v6 = vand.u32 4294901760, %v8803_v15  ;;  %v11964_v26 = vand.u32 4294901760, %v8844_v0  ;;  %v11965_v30 = vand.u32 4294901760, %v8849_v56 }
  0x46   :  { %11951 = vst [vmem:[#allocation51_spill] sm:$0xff] %v9083_v49  ;;  %11954 = vst [vmem:[#allocation52_spill] sm:$0xff] %v9089_v20  ;;  %v9101_v32 = vpack.c.bf16 %v11959_v62, %v11958_v57  ;;  %v11967_v36 = vand.u32 4294901760, %v8866_v43  ;;  %v11968_v45 = vand.u32 4294901760, %v8873_v31  ;;  %v9126_v63 = vpack.c.bf16 %v8690_v60, %v8673_v22  ;;  %446 = vmatmul.mubr.f32.vlgmr.msra.gmra.mrb[0].mxu1 %v8955_v27 }
  0x47   :  { %11957 = vst [vmem:[#allocation53_spill] sm:$0xff] %v9095_v53  ;;  %v9109_v2 = vpack.c.bf16 %v11962_v6, %v11961_v8  ;;  %v9115_v35 = vpack.c.bf16 %v11965_v30, %v11964_v26  ;;  %v11971_v17 = vand.u32 4294901760, %v8896_v14  ;;  %v11972_v42 = vand.u32 4294901760, %v8910_v47  ;;  %7260 = vmatpush3.bf16.msra.mxu1 %v8463_v23  ;;  %688 = vmatprep.mubr.f32.mxu1 %v205_v28  ;;  %v11988_v26 = vld [vmem:[#allocation27_spill] sm:$0xff] }
  0x48   :  { %11960 = vst [vmem:[#allocation54_spill] sm:$0xff] %v9101_v32  ;;  %v9121_v58 = vpack.c.bf16 %v11968_v45, %v11967_v36  ;;  %11970 = vst [vmem:[#allocation58_spill] sm:$0xff] %v9126_v63  ;;  %v11974_v62 = vand.u32 4294901760, %v8936_v1  ;;  %v11975_v8 = vand.u32 4294901760, %v8948_v25  ;;  %7236 = vmatpush3.bf16.msra.mxu0 %v9045_v44  ;;  %7262 = vmatprep.subr.bf16.mxu1 %v8465_v24  ;;  %v11989_v45 = vld [vmem:[#allocation36_spill] sm:$0xff] }
  0x49   :  { %11963 = vst [vmem:[#allocation55_spill] sm:$0xff] %v9109_v2  ;;  %11966 = vst [vmem:[#allocation56_spill] sm:$0xff] %v9115_v35  ;;  %v9132_v57 = vpack.c.bf16 %v11972_v42, %v11971_v17  ;;  %v9146_v60 = vpack.c.bf16 %v8728_v37, %v8708_v18  ;;  %7238 = vmatprep.subr.bf16.mxu0 %v9126_v63  ;;  %v9151_v22 = vpack.c.bf16 %v8775_v38, %v8763_v41  ;;  %v11986_v38 = vld [vmem:[#allocation23_spill] sm:$0xff] }
  0x4a   :  { %11969 = vst [vmem:[#allocation57_spill] sm:$0xff] %v9121_v58  ;;  %v9138_v6 = vpack.c.bf16 %v11975_v8, %v11974_v62  ;;  %v9158_v28 = vpack.c.bf16 %v8803_v15, %v8798_v11  ;;  %v9163_v18 = vpack.c.bf16 %v8849_v56, %v8844_v0  ;;  %v9170_v41 = vpack.c.bf16 %v8873_v31, %v8866_v43  ;;  %v70_v0 = vld [vmem:[%s11500_s1 + $0x180] sm:$0xff]  ;;  %v71_v15 = vld [vmem:[%s11500_s1 + $0x188] sm:$0xff]  ;;  %v9336_v63 = vld [vmem:[%s11500_s1 + $0x138] sm:$0xff] }
  0x4b   :  { %11973 = vst [vmem:[#allocation59_spill] sm:$0xff] %v9132_v57  ;;  %11977 = vst [vmem:[#allocation61_spill] sm:$0xff] %v9146_v60  ;;  %7264 = vmatpush3.bf16.msra.mxu1 %v8481_v29  ;;  %v9175_v11 = vpack.c.bf16 %v8910_v47, %v8896_v14  ;;  %v9182_v37 = vpack.c.bf16 %v8948_v25, %v8936_v1  ;;  %v9187_v31 = vpack.c.bf16 %v8973_v13, %v8961_v51  ;;  %v54_v14 = vld [vmem:[%s11500_s1 + $0x100] sm:$0xff]  ;;  %v55_v43 = vld [vmem:[%s11500_s1 + $0x108] sm:$0xff] }
  0x4c   :  { %11976 = vst [vmem:[#allocation60_spill] sm:$0xff] %v9138_v6  ;;  %11978 = vst [vmem:[#allocation62_spill] sm:$0xff] %v9151_v22  ;;  %7240 = vmatpush3.bf16.msra.mxu0 %v9146_v60  ;;  %7266 = vmatprep.subr.bf16.mxu1 %v8492_v33  ;;  %v9194_v56 = vpack.c.bf16 %v9000_v34, %v8990_v54  ;;  %v11987_v47 = vld [vmem:[#allocation25_spill] sm:$0xff]  ;;  %v72_v25 = vld [vmem:[%s11500_s1 + $0x190] sm:$0xff]  ;;  %v1018_v30 = vand.u32 4294901760, %v70_v0  ;;  %v1021_v36 = vand.u32 4294901760, %v71_v15 }
  0x4d   :  { %11979 = vst [vmem:[#allocation63_spill] sm:$0xff] %v9158_v28  ;;  %7242 = vmatprep.subr.bf16.mxu0 %v9151_v22  ;;  %11980 = vst [vmem:[#allocation64_spill] sm:$0xff] %v9163_v18  ;;  %v73_v1 = vld [vmem:[%s11500_s1 + $0x198] sm:$0xff]  ;;  %v970_v17 = vand.u32 4294901760, %v54_v14  ;;  %v973_v42 = vand.u32 4294901760, %v55_v43  ;;  %v1024_v62 = vand.u32 4294901760, %v72_v25 }
  0x4e   :  { %11981 = vst [vmem:[#allocation65_spill] sm:$0xff] %v9170_v41  ;;  %11982 = vst [vmem:[#allocation66_spill] sm:$0xff] %v9175_v11  ;;  %v1027_v8 = vand.u32 4294901760, %v73_v1 }
  0x4f   :  { %7268 = vmatpush3.bf16.msra.mxu1 %v8510_v39  ;;  %11983 = vst [vmem:[#allocation67_spill] sm:$0xff] %v9182_v37  ;;  %11984 = vst [vmem:[#allocation68_spill] sm:$0xff] %v9187_v31 }
  0x50   :  { %7244 = vmatpush3.bf16.msra.mxu0 %v9158_v28  ;;  %7270 = vmatprep.subr.bf16.mxu1 %v8533_v48  ;;  %11985 = vst [vmem:[#allocation69_spill] sm:$0xff] %v9194_v56 }
  0x51   :  { %7246 = vmatprep.subr.bf16.mxu0 %v9163_v18  ;;  %v9296_v18 = vpack.c.bf16 %v973_v42, %v970_v17 }
  0x53   :  { %7272 = vmatpush3.bf16.msra.mxu1 %v8575_v3  ;;  %12002 = vst [vmem:[#allocation74_spill] sm:$0xff] %v9296_v18 }
  0x54   :  { %7248 = vmatpush3.bf16.msra.mxu0 %v9170_v41  ;;  %7274 = vmatprep.subr.bf16.mxu1 %v8631_v19 }
  0x55   :  { %7250 = vmatprep.subr.bf16.mxu0 %v9175_v11  ;;  %v9242_v11 = vld [vmem:[%s11500_s1 + $0x110] sm:$0xff] }
  0x57   :  { %7276 = vmatpush3.bf16.msra.mxu1 %v8640_v61 }
  0x58   :  { %7252 = vmatpush3.bf16.msra.mxu0 %v9182_v37  ;;  %7278 = vmatprep.subr.bf16.mxu1 %v8685_v55  ;;  %v11991_v37 = vand.u32 4294901760, %v8978_v7 }
  0x59   :  { %7254 = vmatprep.subr.bf16.mxu0 %v9187_v31  ;;  %v9233_v31 = vsub.f32 %v54_v14, %v970_v17  ;;  %v11995_v14 = vand.u32 4294901760, %v8973_v13  ;;  %v9284_v13 = vld [vmem:[%s11500_s1 + $0x120] sm:$0xff] }
  0x5a   :  { %v982_v41 = vand.u32 4294901760, %v9284_v13 }
  0x5b   :  { %7280 = vmatpush3.bf16.msra.mxu1 %v8737_v9 }
  0x5c   :  { %7256 = vmatpush3.bf16.msra.mxu0 %v9194_v56  ;;  %7282 = vmatprep.subr.bf16.mxu1 %v11986_v38  ;;  %v9228_v56 = vsub.f32 %v70_v0, %v1018_v30  ;;  %v9246_v0 = vsub.f32 %v73_v1, %v1027_v8  ;;  %v11998_v1 = vand.u32 4294901760, %v9000_v34  ;;  %v59_v34 = vld [vmem:[%s11500_s1 + $0x128] sm:$0xff] }
  0x5d   :  { %7290 = vmatprep.subr.bf16.mxu0 %v9052_v52  ;;  %v11990_v52 = vld [vmem:[#allocation29_spill] sm:$0xff] }
  0x5e   :  { %11993 = vst [vmem:[#allocation70_spill] sm:$0xff] %v9246_v0 }
  0x5f   :  { %584 = vmatmul.mubr.f32.vlgmr.msra.gmra.mrb[2].mxu0 %v8978_v7  ;;  %7284 = vmatpush3.bf16.msra.mxu1 %v11987_v47  ;;  %v9258_v7 = vld [vmem:[%s11500_s1 + $0x1a0] sm:$0xff] }
  0x60   :  { %7292 = vmatpush3.bf16.msra.mxu0 %v9058_v21  ;;  %7286 = vmatprep.subr.bf16.mxu1 %v11988_v26  ;;  %v9230_v21 = vsub.f32 %v71_v15, %v1021_v36  ;;  %v9252_v15 = vld [vmem:[%s11500_s1 + $0x118] sm:$0xff] }
  0x61   :  { %7294 = vmatprep.subr.bf16.mxu0 %v9064_v4  ;;  %858 = vmatprep.mubr.f32.mxu0 %v11989_v45  ;;  %v9235_v4 = vsub.f32 %v55_v43, %v973_v42 }
  0x62   :  { %v12006_v17 = vand.u32 4294901760, %v9230_v21 }
  0x63   :  { %7288 = vmatpush3.bf16.msra.mxu1 %v11990_v52 }
  0x64   :  { %7296 = vmatpush3.bf16.msra.mxu0 %v9070_v50  ;;  %7322 = vmatprep.subr.bf16.mxu1 %v8445_v16  ;;  %v9244_v50 = vsub.f32 %v72_v25, %v1024_v62  ;;  %v11997_v25 = vand.u32 4294901760, %v8990_v54  ;;  %v12003_v54 = vld [vmem:[#allocation32_spill] sm:$0xff]  ;;  %v1204_v42 = vsub.f32 %v9230_v21, %v12006_v17  ;;  %v12008_v17 = vand.u32 4294901760, %v9235_v4 }
  0x65   :  { %7298 = vmatprep.subr.bf16.mxu0 %v9076_v5  ;;  %v75_v5 = vld [vmem:[%s11500_s1 + $0x1a8] sm:$0xff] }
  0x66   :  { %692 = vmatmul.mubr.f32.vlgmr.msra.gmra.mrb[2].mxu1 %v11991_v37  ;;  %11992 = vst [vmem:[#allocation36_spill] sm:$0xff] %v9244_v50  ;;  %v11994_v37 = vand.u32 4294901760, %v8961_v51  ;;  %v976_v51 = vand.u32 4294901760, %v9242_v11  ;;  %v1033_v28 = vand.u32 4294901760, %v75_v5  ;;  %v1092_v60 = vsub.f32 %v9235_v4, %v12008_v17 }
  0x67   :  { %7324 = vmatpush3.bf16.msra.mxu1 %v8463_v23  ;;  %962 = vmatprep.mubr.f32.mxu1 %v11989_v45  ;;  %v9272_v45 = vpack.c.bf16 %v11998_v1, %v11997_v25  ;;  %v979_v25 = vand.u32 4294901760, %v9252_v15  ;;  %v1030_v1 = vand.u32 4294901760, %v9258_v7 }
  0x68   :  { %7300 = vmatpush3.bf16.msra.mxu0 %v9083_v49  ;;  %7326 = vmatprep.subr.bf16.mxu1 %v8465_v24  ;;  %v9266_v43 = vpack.c.bf16 %v11995_v14, %v11994_v37  ;;  %v12000_v37 = vld [vmem:[#allocation31_spill] sm:$0xff]  ;;  %v9306_v49 = vpack.c.bf16 %v1027_v8, %v1024_v62  ;;  %v12007_v8 = vand.u32 4294901760, %v9233_v31  ;;  %v9339_v44 = vsub.f32 %v9242_v11, %v976_v51 }
  0x69   :  { %11999 = vst [vmem:[#allocation72_spill] sm:$0xff] %v9272_v45  ;;  %7302 = vmatprep.subr.bf16.mxu0 %v9089_v20  ;;  %v11590_v14 = vsub.s32 3, %v12000_v37  ;;  %v9294_v20 = vpack.c.bf16 %v1021_v36, %v1018_v30  ;;  %v12005_v30 = vand.u32 4294901760, %v9228_v56  ;;  %v9324_v62 = vld [vmem:[%s11500_s1 + $0x130] sm:$0xff]  ;;  %v9350_v17 = vsub.f32 %v9252_v15, %v979_v25 }
  0x6a   :  { %11996 = vst [vmem:[#allocation71_spill] sm:$0xff] %v9266_v43  ;;  %12004 = vst [vmem:[#allocation32_spill] sm:$0xff] %v9306_v49  ;;  %v9353_v40 = vsub.f32 %v9258_v7, %v1030_v1  ;;  %v985_v11 = vand.u32 4294901760, %v59_v34  ;;  %v1205_v24 = vand.u32 4294901760, %v1204_v42  ;;  %v9360_v15 = vsub.f32 %v75_v5, %v1033_v28 }
  0x6b   :  { %7328 = vmatpush3.bf16.msra.mxu1 %v8481_v29  ;;  %12001 = vst [vmem:[#allocation73_spill] sm:$0xff] %v9294_v20  ;;  %v102_v22 = vrot.slane %v12003_v54, %v11590_v14  ;;  %v1197_v36 = vsub.f32 %v9228_v56, %v12005_v30  ;;  %v76_v14 = vld [vmem:[%s11500_s1 + $0x1b0] sm:$0xff]  ;;  %v1085_v30 = vsub.f32 %v9233_v31, %v12007_v8  ;;  %v12011_v8 = vand.u32 4294901760, %v9246_v0 }
  0x6c   :  { %7304 = vmatpush3.bf16.msra.mxu0 %v9095_v53  ;;  %7330 = vmatprep.subr.bf16.mxu1 %v8492_v33  ;;  %v77_v53 = vld [vmem:[%s11500_s1 + $0x1b8] sm:$0xff]  ;;  %v1036_v12 = vand.u32 4294901760, %v76_v14  ;;  %v988_v29 = vand.u32 4294901760, %v9324_v62  ;;  %v1093_v23 = vand.u32 4294901760, %v1092_v60  ;;  %v9370_v42 = vpack.c.bf16 %v979_v25, %v976_v51  ;;  %v78_v60 = vld [vmem:[%s11500_s1 + $0x1c0] sm:$0xff] }
  0x6d   :  { %7306 = vmatprep.subr.bf16.mxu0 %v9101_v32  ;;  %v9341_v10 = vand.u32 4294901760, %v102_v22  ;;  %v12010_v32 = vand.u32 4294901760, %v9244_v50  ;;  %v1218_v46 = vsub.f32 %v9246_v0, %v12011_v8  ;;  %v1039_v33 = vand.u32 4294901760, %v77_v53 }
  0x6e   :  { %v991_v8 = vand.u32 4294901760, %v9336_v63  ;;  %v1086_v7 = vand.u32 4294901760, %v1085_v30  ;;  %12012 = vst [vmem:[#allocation76_spill] sm:$0xff] %v9370_v42  ;;  %v9372_v5 = vpack.c.bf16 %v1033_v28, %v1030_v1  ;;  %v9378_v30 = vsub.f32 %v9284_v13, %v982_v41 }
  0x6f   :  { %12009 = vst [vmem:[#allocation75_spill] sm:$0xff] %v9341_v10  ;;  %v1211_v59 = vsub.f32 %v9244_v50, %v12010_v32  ;;  %7332 = vmatpush3.bf16.msra.mxu1 %v8510_v39  ;;  %v1198_v32 = vand.u32 4294901760, %v1197_v36  ;;  %v11618_v39 = vand.u32 4294901760, %v9339_v44  ;;  %v9365_v16 = vsub.f32 %v102_v22, %v9341_v10 }
  0x70   :  { %7308 = vmatpush3.bf16.msra.mxu0 %v9109_v2  ;;  %7334 = vmatprep.subr.bf16.mxu1 %v8533_v48  ;;  %v1219_v50 = vand.u32 4294901760, %v1218_v46  ;;  %v11620_v2 = vand.u32 4294901760, %v9350_v17  ;;  %v11619_v36 = vand.u32 4294901760, %v9353_v40  ;;  %12013 = vst [vmem:[#allocation77_spill] sm:$0xff] %v9372_v5  ;;  %v9380_v22 = vsub.f32 %v59_v34, %v985_v11 }
  0x71   :  { %7310 = vmatprep.subr.bf16.mxu0 %v9115_v35  ;;  %v1212_v0 = vand.u32 4294901760, %v1211_v59  ;;  %v9384_v59 = vpack.c.bf16 %v1205_v24, %v1198_v32  ;;  %v9386_v46 = vpack.c.bf16 %v985_v11, %v982_v41  ;;  %v9388_v51 = vpack.c.bf16 %v1039_v33, %v1036_v12  ;;  %v79_v24 = vld [vmem:[%s11500_s1 + $0x1c8] sm:$0xff] }
  0x72   :  { %12014 = vst [vmem:[#allocation78_spill] sm:$0xff] %v9380_v22  ;;  %v9392_v25 = vpack.c.bf16 %v1093_v23, %v1086_v7  ;;  %v9394_v13 = vpack.c.bf16 %v991_v8, %v988_v29  ;;  %v1099_v34 = vsub.f32 %v9339_v44, %v11618_v39  ;;  %v1106_v11 = vsub.f32 %v9350_v17, %v11620_v2  ;;  %v9414_v7 = vld [vmem:[%s11500_s1 + $0x140] sm:$0xff]  ;;  %v9419_v39 = vld [vmem:[%s11500_s1 + $0x148] sm:$0xff]  ;;  %v9430_v2 = vld [vmem:[%s11500_s1 + $0x1d8] sm:$0xff] }
  0x73   :  { %7336 = vmatpush3.bf16.msra.mxu1 %v8575_v3  ;;  %12015 = vst [vmem:[#allocation79_spill] sm:$0xff] %v9384_v59  ;;  %12016 = vst [vmem:[#allocation80_spill] sm:$0xff] %v9386_v46  ;;  %v9403_v1 = vpack.c.bf16 %v1219_v50, %v1212_v0  ;;  %v1042_v23 = vand.u32 4294901760, %v78_v60  ;;  %v1225_v32 = vsub.f32 %v9353_v40, %v11619_v36  ;;  %v80_v36 = vld [vmem:[%s11500_s1 + $0x1d0] sm:$0xff]  ;;  %v1045_v50 = vand.u32 4294901760, %v79_v24 }
  0x74   :  { %7312 = vmatpush3.bf16.msra.mxu0 %v9121_v58  ;;  %7338 = vmatprep.subr.bf16.mxu1 %v8631_v19  ;;  %12017 = vst [vmem:[#allocation81_spill] sm:$0xff] %v9388_v51  ;;  %12018 = vst [vmem:[#allocation82_spill] sm:$0xff] %v9392_v25  ;;  %v9432_v41 = vsub.f32 %v76_v14, %v1036_v12  ;;  %v9434_v28 = vsub.f32 %v77_v53, %v1039_v33  ;;  %v12021_v0 = vand.u32 4294901760, %v9360_v15 }
  0x75   :  { %7314 = vmatprep.subr.bf16.mxu0 %v9132_v57  ;;  %12019 = vst [vmem:[#allocation83_spill] sm:$0xff] %v9394_v13  ;;  %12020 = vst [vmem:[#allocation84_spill] sm:$0xff] %v9403_v1  ;;  %v9442_v58 = vsub.f32 %v9324_v62, %v988_v29  ;;  %v9445_v35 = vsub.f32 %v9336_v63, %v991_v8  ;;  %v1100_v12 = vand.u32 4294901760, %v1099_v34  ;;  %v994_v33 = vand.u32 4294901760, %v9414_v7 }
  0x76   :  { %v1232_v57 = vsub.f32 %v9360_v15, %v12021_v0  ;;  %v997_v53 = vand.u32 4294901760, %v9419_v39  ;;  %v12024_v14 = vand.u32 4294901760, %v9365_v16  ;;  %v1048_v0 = vand.u32 4294901760, %v80_v36 }
  0x77   :  { %7340 = vmatpush3.bf16.msra.mxu1 %v8640_v61  ;;  %12022 = vst [vmem:[#allocation85_spill] sm:$0xff] %v9442_v58  ;;  %12023 = vst [vmem:[#allocation86_spill] sm:$0xff] %v9445_v35  ;;  %v1226_v61 = vand.u32 4294901760, %v1225_v32  ;;  %v1051_v29 = vand.u32 4294901760, %v9430_v2  ;;  %v12025_v63 = vand.u32 4294901760, %v9378_v30  ;;  %v12026_v8 = vand.u32 4294901760, %v9380_v22 }
  0x78   :  { %7316 = vmatpush3.bf16.msra.mxu0 %v9138_v6  ;;  %7342 = vmatprep.subr.bf16.mxu1 %v8685_v55  ;;  %v1068_v6 = vsub.f32 %v9365_v16, %v12024_v14  ;;  %v1107_v55 = vand.u32 4294901760, %v1106_v11  ;;  %v9466_v11 = vld [vmem:[%s11500_s1 + $0x150] sm:$0xff]  ;;  %v9471_v32 = vld [vmem:[%s11500_s1 + $0x158] sm:$0xff]  ;;  %v1233_v14 = vand.u32 4294901760, %v1232_v57  ;;  %v9477_v19 = vsub.f32 %v78_v60, %v1042_v23 }
  0x79   :  { %7318 = vmatprep.subr.bf16.mxu0 %v9266_v43  ;;  %v1113_v62 = vsub.f32 %v9378_v30, %v12025_v63  ;;  %v1120_v34 = vsub.f32 %v9380_v22, %v12026_v8  ;;  %v9480_v43 = vpack.c.bf16 %v1045_v50, %v1042_v23  ;;  %v9484_v3 = vsub.f32 %v79_v24, %v1045_v50  ;;  %v9503_v50 = vld [vmem:[%s11500_s1 + $0x1e0] sm:$0xff] }
  0x7a   :  { %v1069_v48 = vand.u32 4294901760, %v1068_v6  ;;  %v9486_v22 = vpack.c.bf16 %v1107_v55, %v1100_v12  ;;  %v1000_v57 = vand.u32 4294901760, %v9466_v11  ;;  %v1003_v63 = vand.u32 4294901760, %v9471_v32 }
  0x7b   :  { %7344 = vmatpush3.bf16.msra.mxu1 %v8737_v9  ;;  %12027 = vst [vmem:[#allocation87_spill] sm:$0xff] %v9480_v43  ;;  %v9482_v9 = vpack.c.bf16 %v997_v53, %v994_v33  ;;  %v1114_v60 = vand.u32 4294901760, %v1113_v62  ;;  %v1121_v23 = vand.u32 4294901760, %v1120_v34  ;;  %v12031_v8 = vand.u32 4294901760, %v9432_v41 }
  0x7c   :  { %7320 = vmatpush3.bf16.msra.mxu0 %v9272_v45  ;;  %7346 = vmatprep.subr.bf16.mxu1 %v11986_v38  ;;  %12029 = vst [vmem:[#allocation89_spill] sm:$0xff] %v9486_v22  ;;  %v9488_v45 = vpack.c.bf16 %v1051_v29, %v1048_v0  ;;  %v12032_v6 = vand.u32 4294901760, %v9434_v28  ;;  %v9507_v12 = vpack.c.bf16 %v1233_v14, %v1226_v61  ;;  %v12034_v62 = vand.u32 4294901760, %v9442_v58  ;;  %v9526_v14 = vld [vmem:[%s11500_s1 + $0x160] sm:$0xff] }
  0x7d   :  { %7354 = vmatprep.subr.bf16.mxu0 %v9294_v20  ;;  %12028 = vst [vmem:[#allocation88_spill] sm:$0xff] %v9482_v9  ;;  %v1239_v24 = vsub.f32 %v9432_v41, %v12031_v8  ;;  %v12035_v8 = vand.u32 4294901760, %v9445_v35  ;;  %v9540_v61 = vsub.f32 %v9430_v2, %v1051_v29  ;;  %v9581_v38 = vsub.f32 %v9471_v32, %v1003_v63 }
  0x7e   :  { %12030 = vst [vmem:[#allocation90_spill] sm:$0xff] %v9488_v45  ;;  %v1246_v55 = vsub.f32 %v9434_v28, %v12032_v6  ;;  %12033 = vst [vmem:[#allocation91_spill] sm:$0xff] %v9507_v12  ;;  %v1127_v34 = vsub.f32 %v9442_v58, %v12034_v62  ;;  %v9518_v6 = vld [vmem:[%s11500_s1 + $0x1e8] sm:$0xff]  ;;  %v9529_v62 = vsub.f32 %v9414_v7, %v994_v33  ;;  %v11650_v58 = vsub.s32 2, %v12000_v37 }
  0x7f   :  { %860 = vmatmul.mubr.f32.vlgmr.msra.gmra.mrb[4].mxu0 %v8955_v27  ;;  %7348 = vmatpush3.bf16.msra.mxu1 %v11987_v47  ;;  %v1134_v47 = vsub.f32 %v9445_v35, %v12035_v8  ;;  %v9532_v8 = vsub.f32 %v9419_v39, %v997_v53  ;;  %v9536_v35 = vpack.c.bf16 %v1003_v63, %v1000_v57  ;;  %v1240_v7 = vand.u32 4294901760, %v1239_v24  ;;  %v9605_v63 = vld [vmem:[%s11500_s1 + $0x178] sm:$0xff] }
  0x80   :  { %7356 = vmatpush3.bf16.msra.mxu0 %v9296_v18  ;;  %7350 = vmatprep.subr.bf16.mxu1 %v11988_v26  ;;  %v9534_v26 = vsub.f32 %v80_v36, %v1048_v0  ;;  %12038 = vst [vmem:[#allocation94_spill] sm:$0xff] %v9540_v61  ;;  %v1247_v33 = vand.u32 4294901760, %v1246_v55  ;;  %v12040_v53 = vand.u32 4294901760, %v9477_v19  ;;  %v9555_v0 = vld [vmem:[%s11500_s1 + $0x168] sm:$0xff]  ;;  %v9578_v39 = vsub.f32 %v9466_v11, %v1000_v57 }
  0x81   :  { %7358 = vmatprep.subr.bf16.mxu0 %v9306_v49  ;;  %1070 = vmatprep.mubr.f32.mxu0 %v1069_v48  ;;  %12037 = vst [vmem:[#allocation93_spill] sm:$0xff] %v9536_v35  ;;  %v9544_v49 = vpack.c.bf16 %v1121_v23, %v1114_v60  ;;  %v1128_v48 = vand.u32 4294901760, %v1127_v34  ;;  %v1135_v36 = vand.u32 4294901760, %v1134_v47  ;;  %v9561_v60 = vld [vmem:[%s11500_s1 + $0x1f0] sm:$0xff]  ;;  %v9566_v47 = vld [vmem:[%s11500_s1 + $0x1f8] sm:$0xff]  ;;  %v12041_v23 = vand.u32 4294901760, %v9484_v3 }
  0x82   :  { %12036 = vst [vmem:[#allocation92_spill] sm:$0xff] %v9534_v26  ;;  %v1253_v2 = vsub.f32 %v9477_v19, %v12040_v53  ;;  %v11654_v34 = vand.u32 4294901760, %v9532_v8  ;;  %v9587_v55 = vpack.c.bf16 %v1247_v33, %v1240_v7  ;;  %v1009_v53 = vand.u32 4294901760, %v9555_v0 }
  0x83   :  { %7352 = vmatpush3.bf16.msra.mxu1 %v11990_v52  ;;  %12039 = vst [vmem:[#allocation95_spill] sm:$0xff] %v9544_v49  ;;  %v1260_v24 = vsub.f32 %v9484_v3, %v12041_v23  ;;  %v98_v23 = vrot.slane %v12003_v54, %v11650_v58  ;;  %v9595_v11 = vpack.c.bf16 %v1135_v36, %v1128_v48  ;;  %v9600_v54 = vld [vmem:[%s11500_s1 + $0x170] sm:$0xff]  ;;  %v12044_v57 = vand.u32 4294901760, %v9503_v50 }
  0x84   :  { %7360 = vmatpush3.bf16.msra.mxu0 %v9370_v42  ;;  %7386 = vmatprep.subr.bf16.mxu1 %v9384_v59  ;;  %12042 = vst [vmem:[#allocation96_spill] sm:$0xff] %v9587_v55  ;;  %v1254_v32 = vand.u32 4294901760, %v1253_v2  ;;  %v12045_v33 = vand.u32 4294901760, %v9518_v6  ;;  %v12046_v2 = vand.u32 4294901760, %v9529_v62  ;;  %v1148_v29 = vsub.f32 %v9532_v8, %v11654_v34 }
  0x85   :  { %7362 = vmatprep.subr.bf16.mxu0 %v9372_v5  ;;  %12043 = vst [vmem:[#allocation97_spill] sm:$0xff] %v9595_v11  ;;  %v9610_v7 = vsub.f32 %v9503_v50, %v12044_v57  ;;  %v1261_v36 = vand.u32 4294901760, %v1260_v24  ;;  %v9632_v59 = vand.u32 4294901760, %v98_v23  ;;  %v1015_v34 = vand.u32 4294901760, %v9605_v63 }
  0x86   :  { %964 = vmatmul.mubr.f32.vlgmr.msra.gmra.mrb[4].mxu1 %v8955_v27  ;;  %v9615_v48 = vsub.f32 %v9518_v6, %v12045_v33  ;;  %v1141_v58 = vsub.f32 %v9529_v62, %v12046_v2  ;;  %v12047_v27 = vand.u32 4294901760, %v9534_v26  ;;  %v1012_v2 = vand.u32 4294901760, %v9600_v54 }
  0x87   :  { %7388 = vmatpush3.bf16.msra.mxu1 %v9392_v25  ;;  %1306 = vmatprep.mubr.f32.mxu1 %v9341_v10  ;;  %v12049_v37 = vand.u32 4294901760, %v9526_v14  ;;  %v9643_v52 = vsub.f32 %v9555_v0, %v1009_v53  ;;  %v12050_v25 = vand.u32 4294901760, %v9561_v60  ;;  %v12051_v10 = vand.u32 4294901760, %v9566_v47 }
  0x88   :  { %7364 = vmatpush3.bf16.msra.mxu0 %v9386_v46  ;;  %7390 = vmatprep.subr.bf16.mxu1 %v9403_v1  ;;  %v1267_v57 = vsub.f32 %v9534_v26, %v12047_v27  ;;  %v12048_v1 = vand.u32 4294901760, %v9540_v61  ;;  %v9660_v0 = vpack.c.bf16 %v1261_v36, %v1254_v32  ;;  %v12053_v24 = vand.u32 4294901760, %v9578_v39 }
  0x89   :  { %7366 = vmatprep.subr.bf16.mxu0 %v9388_v51  ;;  %v9640_v27 = vsub.f32 %v9526_v14, %v12049_v37  ;;  %v9657_v37 = vsub.f32 %v9566_v47, %v12051_v10  ;;  %v9669_v26 = vsub.f32 %v98_v23, %v9632_v59  ;;  %v9678_v32 = vsub.f32 %v9605_v63, %v1015_v34 }
  0x8a   :  { %v1274_v33 = vsub.f32 %v9540_v61, %v12048_v1  ;;  %12052 = vst [vmem:[#allocation98_spill] sm:$0xff] %v9660_v0  ;;  %v1268_v51 = vand.u32 4294901760, %v1267_v57  ;;  %v1155_v46 = vsub.f32 %v9578_v39, %v12053_v24  ;;  %v12055_v36 = vand.u32 4294901760, %v9610_v7 }
  0x8b   :  { %7392 = vmatpush3.bf16.msra.mxu1 %v9486_v22  ;;  %v9652_v22 = vsub.f32 %v9561_v60, %v12050_v25  ;;  %v12054_v25 = vand.u32 4294901760, %v9581_v38  ;;  %v12056_v57 = vand.u32 4294901760, %v9615_v48  ;;  %v12057_v63 = vand.u32 4294901760, %v9503_v50 }
  0x8c   :  { %7368 = vmatpush3.bf16.msra.mxu0 %v9394_v13  ;;  %7394 = vmatprep.subr.bf16.mxu1 %v9507_v12  ;;  %v1142_v13 = vand.u32 4294901760, %v1141_v58  ;;  %v1149_v12 = vand.u32 4294901760, %v1148_v29  ;;  %v1275_v1 = vand.u32 4294901760, %v1274_v33  ;;  %v9675_v29 = vsub.f32 %v9600_v54, %v1012_v2 }
  0x8d   :  { %7370 = vmatprep.subr.bf16.mxu0 %v9480_v43  ;;  %v1162_v61 = vsub.f32 %v9581_v38, %v12054_v25  ;;  %v1281_v23 = vsub.f32 %v9610_v7, %v12055_v36  ;;  %v1288_v33 = vsub.f32 %v9615_v48, %v12056_v57  ;;  %v12058_v25 = vand.u32 4294901760, %v9518_v6 }
  0x8e   :  { %v12060_v10 = vand.u32 4294901760, %v9526_v14  ;;  %v9701_v36 = vpack.c.bf16 %v1149_v12, %v1142_v13  ;;  %v1156_v57 = vand.u32 4294901760, %v1155_v46  ;;  %v11674_v54 = vand.u32 4294901760, %v9669_v26 }
  0x8f   :  { %7396 = vmatpush3.bf16.msra.mxu1 %v9544_v49  ;;  %v9695_v58 = vpack.c.bf16 %v12058_v25, %v12057_v63  ;;  %v9703_v49 = vpack.c.bf16 %v1275_v1, %v1268_v51  ;;  %v1163_v24 = vand.u32 4294901760, %v1162_v61  ;;  %v12064_v50 = vand.u32 4294901760, %v9640_v27 }
  0x90   :  { %7372 = vmatpush3.bf16.msra.mxu0 %v9482_v9  ;;  %7398 = vmatprep.subr.bf16.mxu1 %v9587_v55  ;;  %v9699_v55 = vpack.c.bf16 %v1009_v53, %v12060_v10  ;;  %12062 = vst [vmem:[#allocation101_spill] sm:$0xff] %v9701_v36  ;;  %v12065_v63 = vand.u32 4294901760, %v9643_v52  ;;  %v11673_v53 = vand.u32 4294901760, %v9675_v29  ;;  %v1282_v46 = vand.u32 4294901760, %v1281_v23 }
  0x91   :  { %7374 = vmatprep.subr.bf16.mxu0 %v9488_v45  ;;  %12059 = vst [vmem:[#allocation99_spill] sm:$0xff] %v9695_v58  ;;  %12063 = vst [vmem:[#allocation102_spill] sm:$0xff] %v9703_v49  ;;  %v1169_v6 = vsub.f32 %v9640_v27, %v12064_v50  ;;  %v1289_v51 = vand.u32 4294901760, %v1288_v33  ;;  %v12066_v12 = vand.u32 4294901760, %v9652_v22  ;;  %v12067_v1 = vand.u32 4294901760, %v9657_v37 }
  0x92   :  { %12061 = vst [vmem:[#allocation100_spill] sm:$0xff] %v9699_v55  ;;  %v1176_v14 = vsub.f32 %v9643_v52, %v12065_v63  ;;  %v12068_v25 = vand.u32 4294901760, %v9561_v60  ;;  %v12069_v50 = vand.u32 4294901760, %v9566_v47  ;;  %v9730_v13 = vpack.c.bf16 %v1163_v24, %v1156_v57 }
  0x93   :  { %7400 = vmatpush3.bf16.msra.mxu1 %v9595_v11  ;;  %v1295_v61 = vsub.f32 %v9652_v22, %v12066_v12  ;;  %v1302_v10 = vsub.f32 %v9657_v37, %v12067_v1  ;;  %v1074_v23 = vsub.f32 %v9669_v26, %v11674_v54  ;;  %v1170_v33 = vand.u32 4294901760, %v1169_v6 }
  0x94   :  { %7376 = vmatpush3.bf16.msra.mxu0 %v9536_v35  ;;  %7402 = vmatprep.subr.bf16.mxu1 %v9660_v0  ;;  %v9728_v63 = vpack.c.bf16 %v12069_v50, %v12068_v25  ;;  %12071 = vst [vmem:[#allocation104_spill] sm:$0xff] %v9730_v13  ;;  %v1177_v12 = vand.u32 4294901760, %v1176_v14  ;;  %v1183_v1 = vsub.f32 %v9675_v29, %v11673_v53  ;;  %v12072_v60 = vand.u32 4294901760, %v9678_v32 }
  0x95   :  { %7378 = vmatprep.subr.bf16.mxu0 %v9695_v58  ;;  %v9744_v24 = vpack.c.bf16 %v1015_v34, %v1012_v2  ;;  %v9746_v57 = vpack.c.bf16 %v1289_v51, %v1282_v46  ;;  %v1296_v25 = vand.u32 4294901760, %v1295_v61  ;;  %v1303_v50 = vand.u32 4294901760, %v1302_v10  ;;  %v12079_v46 = vld [vmem:[#allocation36_spill] sm:$0xff]  ;;  %v12080_v51 = vld [vmem:[#allocation70_spill] sm:$0xff] }
  0x96   :  { %12070 = vst [vmem:[#allocation103_spill] sm:$0xff] %v9728_v63  ;;  %v1190_v47 = vsub.f32 %v9678_v32, %v12072_v60  ;;  %v9751_v6 = vpack.c.bf16 %v9230_v21, %v9228_v56  ;;  %v1075_v14 = vand.u32 4294901760, %v1074_v23  ;;  %v9754_v60 = vpack.c.bf16 %v1177_v12, %v1170_v33 }
  0x97   :  { %7404 = vmatpush3.bf16.msra.mxu1 %v9701_v36  ;;  %12073 = vst [vmem:[#allocation105_spill] sm:$0xff] %v9744_v24  ;;  %12074 = vst [vmem:[#allocation106_spill] sm:$0xff] %v9746_v57  ;;  %v1184_v53 = vand.u32 4294901760, %v1183_v1  ;;  %v9760_v34 = vpack.c.bf16 %v9235_v4, %v9233_v31  ;;  %v9762_v2 = vpack.c.bf16 %v1303_v50, %v1296_v25  ;;  %v12088_v1 = vand.u32 4294901760, %v9365_v16  ;;  %v12090_v25 = vld [vmem:[#allocation85_spill] sm:$0xff]  ;;  %v12091_v50 = vld [vmem:[#allocation86_spill] sm:$0xff] }
  0x98   :  { %7380 = vmatpush3.bf16.msra.mxu0 %v9699_v55  ;;  %7406 = vmatprep.subr.bf16.mxu1 %v9703_v49  ;;  %12075 = vst [vmem:[#allocation107_spill] sm:$0xff] %v9751_v6  ;;  %12076 = vst [vmem:[#allocation108_spill] sm:$0xff] %v9754_v60  ;;  %v1191_v54 = vand.u32 4294901760, %v1190_v47  ;;  %v9767_v61 = vpack.c.bf16 %v12080_v51, %v12079_v46  ;;  %v9776_v23 = vpack.c.bf16 %v9350_v17, %v9339_v44  ;;  %v12089_v47 = vld [vmem:[#allocation32_spill] sm:$0xff] }
  0x99   :  { %7382 = vmatprep.subr.bf16.mxu0 %v9728_v63  ;;  %12077 = vst [vmem:[#allocation109_spill] sm:$0xff] %v9760_v34  ;;  %12078 = vst [vmem:[#allocation110_spill] sm:$0xff] %v9762_v2  ;;  %v9781_v33 = vpack.c.bf16 %v9360_v15, %v9353_v40  ;;  %v9794_v12 = vpack.c.bf16 %v9434_v28, %v9432_v41 }
  0x9a   :  { %12081 = vst [vmem:[#allocation36_spill] sm:$0xff] %v9767_v61  ;;  %v9770_v10 = vpack.c.bf16 %v1191_v54, %v1184_v53  ;;  %12083 = vst [vmem:[#allocation111_spill] sm:$0xff] %v9776_v23  ;;  %v12085_v54 = vld [vmem:[#allocation78_spill] sm:$0xff] }
  0x9b   :  { %7408 = vmatpush3.bf16.msra.mxu1 %v9730_v13  ;;  %12084 = vst [vmem:[#allocation112_spill] sm:$0xff] %v9781_v33  ;;  %v9789_v53 = vpack.c.bf16 %v12085_v54, %v9378_v30  ;;  %12087 = vst [vmem:[#allocation113_spill] sm:$0xff] %v9794_v12 }
  0x9c   :  { %7384 = vmatpush3.bf16.msra.mxu0 %v9744_v24  ;;  %7410 = vmatprep.subr.bf16.mxu1 %v9746_v57  ;;  %12082 = vst [vmem:[#allocation70_spill] sm:$0xff] %v9770_v10 }
  0x9d   :  { %7418 = vmatprep.subr.bf16.mxu0 %v9751_v6  ;;  %12086 = vst [vmem:[#allocation78_spill] sm:$0xff] %v9789_v53  ;;  %v9845_v6 = vpack.c.bf16 %v9657_v37, %v9652_v22 }
  0x9f   :  { %1076 = vmatmul.mubr.f32.vlgmr.msra.gmra.mrb[6].mxu0 %v1075_v14  ;;  %7412 = vmatpush3.bf16.msra.mxu1 %v9754_v60  ;;  %v9804_v14 = vpack.c.bf16 %v12091_v50, %v12090_v25  ;;  %12104 = vst [vmem:[#allocation117_spill] sm:$0xff] %v9845_v6 }
  0xa0   :  { %7420 = vmatpush3.bf16.msra.mxu0 %v9760_v34  ;;  %7414 = vmatprep.subr.bf16.mxu1 %v9762_v2  ;;  %v9833_v34 = vpack.c.bf16 %v9615_v48, %v9610_v7  ;;  %v12110_v2 = vand.u32 4294901760, %v9235_v4  ;;  %v12115_v4 = vand.u32 4294901760, %v9339_v44  ;;  %v12122_v44 = vand.u32 4294901760, %v9378_v30 }
  0xa1   :  { %7422 = vmatprep.subr.bf16.mxu0 %v9767_v61  ;;  %1443 = vmatprep.mubr.f32.mxu0 %v9365_v16  ;;  %12092 = vst [vmem:[#allocation85_spill] sm:$0xff] %v9804_v14  ;;  %v9816_v16 = vpack.c.bf16 %v9532_v8, %v9529_v62  ;;  %v12099_v61 = vld [vmem:[#allocation81_spill] sm:$0xff]  ;;  %v12129_v30 = vand.u32 4294901760, %v12090_v25  ;;  %v12135_v25 = vand.u32 4294901760, %v9529_v62  ;;  %v12141_v62 = vand.u32 4294901760, %v9578_v39 }
  0xa2   :  { %12101 = vst [vmem:[#allocation115_spill] sm:$0xff] %v9833_v34 }
  0xa3   :  { %7416 = vmatpush3.bf16.msra.mxu1 %v9770_v10  ;;  %12094 = vst [vmem:[#allocation114_spill] sm:$0xff] %v9816_v16 }
  0xa4   :  { %7424 = vmatpush3.bf16.msra.mxu0 %v9776_v23  ;;  %7450 = vmatprep.subr.bf16.mxu1 %v9294_v20 }
  0xa5   :  { %7426 = vmatprep.subr.bf16.mxu0 %v9781_v33  ;;  %v9809_v33 = vpack.c.bf16 %v9484_v3, %v9477_v19 }
  0xa6   :  { %1308 = vmatmul.mubr.f32.vlgmr.msra.gmra.mrb[6].mxu1 %v9632_v59 }
  0xa7   :  { %7452 = vmatpush3.bf16.msra.mxu1 %v9296_v18  ;;  %1550 = vmatprep.mubr.f32.mxu1 %v12088_v1  ;;  %12093 = vst [vmem:[#allocation86_spill] sm:$0xff] %v9809_v33  ;;  %v12095_v1 = vld [vmem:[#allocation92_spill] sm:$0xff] }
  0xa8   :  { %7428 = vmatpush3.bf16.msra.mxu0 %v9789_v53  ;;  %7454 = vmatprep.subr.bf16.mxu1 %v12089_v47  ;;  %v12096_v53 = vld [vmem:[#allocation94_spill] sm:$0xff] }
  0xa9   :  { %7430 = vmatprep.subr.bf16.mxu0 %v9794_v12  ;;  %v9821_v23 = vpack.c.bf16 %v12096_v53, %v12095_v1  ;;  %v12098_v12 = vld [vmem:[#allocation80_spill] sm:$0xff] }
  0xab   :  { %7456 = vmatpush3.bf16.msra.mxu1 %v9370_v42  ;;  %12097 = vst [vmem:[#allocation92_spill] sm:$0xff] %v9821_v23 }
  0xac   :  { %7432 = vmatpush3.bf16.msra.mxu0 %v9804_v14  ;;  %7458 = vmatprep.subr.bf16.mxu1 %v9372_v5  ;;  %v9828_v14 = vpack.c.bf16 %v9581_v38, %v9578_v39  ;;  %v12147_v39 = vand.u32 4294901760, %v9640_v27 }
  0xad   :  { %7434 = vmatprep.subr.bf16.mxu0 %v9809_v33  ;;  %v12102_v33 = vld [vmem:[#allocation83_spill] sm:$0xff] }
  0xae   :  { %12100 = vst [vmem:[#allocation94_spill] sm:$0xff] %v9828_v14 }
  0xaf   :  { %7460 = vmatpush3.bf16.msra.mxu1 %v12098_v12 }
  0xb0   :  { %7436 = vmatpush3.bf16.msra.mxu0 %v9816_v16  ;;  %7462 = vmatprep.subr.bf16.mxu1 %v12099_v61  ;;  %v9840_v16 = vpack.c.bf16 %v9643_v52, %v9640_v27  ;;  %v12153_v27 = vand.u32 4294901760, %v9675_v29 }
  0xb1   :  { %7438 = vmatprep.subr.bf16.mxu0 %v9821_v23  ;;  %v12106_v23 = vand.u32 4294901760, %v9228_v56  ;;  %v12112_v56 = vand.u32 4294901760, %v12079_v46  ;;  %v12118_v46 = vand.u32 4294901760, %v9353_v40  ;;  %v12125_v40 = vand.u32 4294901760, %v9432_v41 }
  0xb2   :  { %12103 = vst [vmem:[#allocation116_spill] sm:$0xff] %v9840_v16 }
  0xb3   :  { %7464 = vmatpush3.bf16.msra.mxu1 %v12102_v33 }
  0xb4   :  { %7440 = vmatpush3.bf16.msra.mxu0 %v9828_v14  ;;  %7466 = vmatprep.subr.bf16.mxu1 %v9480_v43  ;;  %v9852_v14 = vpack.c.bf16 %v9678_v32, %v9675_v29 }
  0xb5   :  { %7442 = vmatprep.subr.bf16.mxu0 %v9833_v34  ;;  %v12107_v34 = vand.u32 4294901760, %v9230_v21  ;;  %v12113_v21 = vand.u32 4294901760, %v12080_v51  ;;  %v12119_v51 = vand.u32 4294901760, %v9360_v15  ;;  %v12126_v15 = vand.u32 4294901760, %v9434_v28 }
  0xb6   :  { %12105 = vst [vmem:[#allocation118_spill] sm:$0xff] %v9852_v14  ;;  %v12132_v28 = vand.u32 4294901760, %v9477_v19  ;;  %v12138_v19 = vand.u32 4294901760, %v12095_v1  ;;  %v12144_v1 = vand.u32 4294901760, %v9610_v7  ;;  %v12150_v7 = vand.u32 4294901760, %v9652_v22 }
  0xb7   :  { %7468 = vmatpush3.bf16.msra.mxu1 %v9482_v9  ;;  %v9859_v10 = vpack.c.bf16 %v12107_v34, %v12106_v23  ;;  %v9875_v34 = vpack.c.bf16 %v12113_v21, %v12112_v56  ;;  %v9892_v23 = vpack.c.bf16 %v12119_v51, %v12118_v46  ;;  %v9909_v21 = vpack.c.bf16 %v12126_v15, %v12125_v40 }
  0xb8   :  { %7444 = vmatpush3.bf16.msra.mxu0 %v9840_v16  ;;  %7470 = vmatprep.subr.bf16.mxu1 %v9488_v45  ;;  %v12109_v16 = vand.u32 4294901760, %v9233_v31  ;;  %v12116_v31 = vand.u32 4294901760, %v9350_v17  ;;  %v12123_v17 = vand.u32 4294901760, %v12085_v54  ;;  %v12130_v54 = vand.u32 4294901760, %v12091_v50 }
  0xb9   :  { %7446 = vmatprep.subr.bf16.mxu0 %v9845_v6  ;;  %12108 = vst [vmem:[#allocation119_spill] sm:$0xff] %v9859_v10  ;;  %12114 = vst [vmem:[#allocation121_spill] sm:$0xff] %v9875_v34  ;;  %v12136_v50 = vand.u32 4294901760, %v9532_v8  ;;  %v12142_v8 = vand.u32 4294901760, %v9581_v38  ;;  %v12148_v38 = vand.u32 4294901760, %v9643_v52  ;;  %v12154_v52 = vand.u32 4294901760, %v9678_v32 }
  0xba   :  { %v9868_v60 = vpack.c.bf16 %v12110_v2, %v12109_v16  ;;  %v9885_v2 = vpack.c.bf16 %v12116_v31, %v12115_v4  ;;  %12120 = vst [vmem:[#allocation123_spill] sm:$0xff] %v9892_v23  ;;  %v12121_v16 = vld [vmem:[#allocation75_spill] sm:$0xff]  ;;  %v9902_v56 = vpack.c.bf16 %v12123_v17, %v12122_v44  ;;  %12127 = vst [vmem:[#allocation124_spill] sm:$0xff] %v9909_v21  ;;  %v12128_v4 = vand.u32 4294901760, %v9669_v26  ;;  %v1853_v6 = vld [vmem:[%s11501_s2 + $0xa8] sm:$0xff] }
  0xbb   :  { %7472 = vmatpush3.bf16.msra.mxu1 %v9536_v35  ;;  %v9921_v41 = vpack.c.bf16 %v12130_v54, %v12129_v30  ;;  %v9937_v46 = vpack.c.bf16 %v12136_v50, %v12135_v25  ;;  %v9969_v17 = vpack.c.bf16 %v12148_v38, %v12147_v39  ;;  %v9985_v15 = vpack.c.bf16 %v12154_v52, %v12153_v27  ;;  %v1832_v39 = vld [vmem:[%s11501_s2] sm:$0xff] }
  0xbc   :  { %7448 = vmatpush3.bf16.msra.mxu0 %v9852_v14  ;;  %7474 = vmatprep.subr.bf16.mxu1 %v9695_v58  ;;  %12111 = vst [vmem:[#allocation120_spill] sm:$0xff] %v9868_v60  ;;  %12117 = vst [vmem:[#allocation122_spill] sm:$0xff] %v9885_v2  ;;  %v1836_v38 = vld [vmem:[%s11501_s2 + $0x20] sm:$0xff]  ;;  %v1870_v27 = vand.u32 4294901760, %v1832_v39  ;;  %v1849_v14 = vld [vmem:[%s11501_s2 + $0x88] sm:$0xff] }
  0xbd   :  { %7482 = vmatprep.subr.bf16.mxu0 %v9859_v10  ;;  %12124 = vst [vmem:[#allocation75_spill] sm:$0xff] %v9902_v56  ;;  %12131 = vst [vmem:[#allocation125_spill] sm:$0xff] %v9921_v41  ;;  %v1874_v52 = vand.u32 4294901760, %v1836_v38 }
  0xbe   :  { %12137 = vst [vmem:[#allocation127_spill] sm:$0xff] %v9937_v46  ;;  %12149 = vst [vmem:[#allocation131_spill] sm:$0xff] %v9969_v17  ;;  %v10108_v0 = vsub.f32 %v1832_v39, %v1870_v27 }
  0xbf   :  { %1446 = vmatmul.mubr.f32.vlgmr.msra.gmra.mrb[8].mxu0 %v9669_v26  ;;  %7476 = vmatpush3.bf16.msra.mxu1 %v9699_v55  ;;  %v12133_v26 = vand.u32 4294901760, %v9484_v3  ;;  %v12139_v3 = vand.u32 4294901760, %v12096_v53  ;;  %v12145_v53 = vand.u32 4294901760, %v9615_v48  ;;  %v12151_v48 = vand.u32 4294901760, %v9657_v37  ;;  %12155 = vst [vmem:[#allocation133_spill] sm:$0xff] %v9985_v15 }
  0xc0   :  { %7484 = vmatpush3.bf16.msra.mxu0 %v9868_v60  ;;  %7478 = vmatprep.subr.bf16.mxu1 %v9728_v63 }
  0xc1   :  { %7486 = vmatprep.subr.bf16.mxu0 %v9875_v34  ;;  %1720 = vmatprep.mubr.f32.mxu0 %v12121_v16  ;;  %v9928_v31 = vpack.c.bf16 %v12133_v26, %v12132_v28  ;;  %v9944_v51 = vpack.c.bf16 %v12139_v3, %v12138_v19  ;;  %v9960_v44 = vpack.c.bf16 %v12145_v53, %v12144_v1  ;;  %v9999_v19 = vld [vmem:[%s11501_s2 + $0x8] sm:$0xff]  ;;  %v10009_v3 = vld [vmem:[%s11501_s2 + $0x18] sm:$0xff] }
  0xc2   :  { %v9976_v40 = vpack.c.bf16 %v12151_v48, %v12150_v7  ;;  %v1839_v1 = vld [vmem:[%s11501_s2 + $0x38] sm:$0xff]  ;;  %v2515_v53 = vand.u32 4294901760, %v10009_v3 }
  0xc3   :  { %7480 = vmatpush3.bf16.msra.mxu1 %v9744_v24  ;;  %12134 = vst [vmem:[#allocation126_spill] sm:$0xff] %v9928_v31  ;;  %12140 = vst [vmem:[#allocation128_spill] sm:$0xff] %v9944_v51  ;;  %v2519_v48 = vand.u32 4294901760, %v1839_v1 }
  0xc4   :  { %7488 = vmatpush3.bf16.msra.mxu0 %v9885_v2  ;;  %7514 = vmatprep.subr.bf16.mxu1 %v9294_v20  ;;  %12146 = vst [vmem:[#allocation130_spill] sm:$0xff] %v9960_v44  ;;  %12152 = vst [vmem:[#allocation132_spill] sm:$0xff] %v9976_v40  ;;  %v1846_v2 = vld [vmem:[%s11501_s2 + $0x70] sm:$0xff]  ;;  %v10103_v36 = vsub.f32 %v10009_v3, %v2515_v53 }
  0xc5   :  { %7490 = vmatprep.subr.bf16.mxu0 %v9892_v23  ;;  %v1842_v23 = vld [vmem:[%s11501_s2 + $0x50] sm:$0xff] }
  0xc6   :  { %1554 = vmatmul.mubr.f32.vlgmr.msra.gmra.mrb[8].mxu1 %v12128_v4 }
  0xc7   :  { %7516 = vmatpush3.bf16.msra.mxu1 %v9296_v18  ;;  %1824 = vmatprep.mubr.f32.mxu1 %v12121_v16  ;;  %v9953_v16 = vpack.c.bf16 %v12142_v8, %v12141_v62  ;;  %v1868_v62 = vand.u32 4294901760, %v9999_v19 }
  0xc8   :  { %7492 = vmatpush3.bf16.msra.mxu0 %v9902_v56  ;;  %7518 = vmatprep.subr.bf16.mxu1 %v12089_v47 }
  0xc9   :  { %7494 = vmatprep.subr.bf16.mxu0 %v9909_v21  ;;  %12143 = vst [vmem:[#allocation129_spill] sm:$0xff] %v9953_v16  ;;  %v10097_v49 = vsub.f32 %v9999_v19, %v1868_v62 }
  0xcb   :  { %7520 = vmatpush3.bf16.msra.mxu1 %v9370_v42 }
  0xcc   :  { %7496 = vmatpush3.bf16.msra.mxu0 %v9921_v41  ;;  %7522 = vmatprep.subr.bf16.mxu1 %v9372_v5  ;;  %v10110_v5 = vsub.f32 %v1836_v38, %v1874_v52 }
  0xcd   :  { %7498 = vmatprep.subr.bf16.mxu0 %v9928_v31 }
  0xcf   :  { %7524 = vmatpush3.bf16.msra.mxu1 %v12098_v12  ;;  %v10105_v12 = vsub.f32 %v1839_v1, %v2519_v48 }
  0xd0   :  { %7500 = vmatpush3.bf16.msra.mxu0 %v9937_v46  ;;  %7526 = vmatprep.subr.bf16.mxu1 %v12099_v61  ;;  %v1844_v46 = vld [vmem:[%s11501_s2 + $0x60] sm:$0xff] }
  0xd1   :  { %7502 = vmatprep.subr.bf16.mxu0 %v9944_v51  ;;  %v1840_v51 = vld [vmem:[%s11501_s2 + $0x40] sm:$0xff]  ;;  %v1882_v56 = vand.u32 4294901760, %v1844_v46 }
  0xd2   :  { %v1878_v21 = vand.u32 4294901760, %v1840_v51 }
  0xd3   :  { %7528 = vmatpush3.bf16.msra.mxu1 %v12102_v33 }
  0xd4   :  { %7504 = vmatpush3.bf16.msra.mxu0 %v9953_v16  ;;  %7530 = vmatprep.subr.bf16.mxu1 %v9480_v43  ;;  %v10071_v10 = vpack.c.bf16 %v1882_v56, %v1878_v21  ;;  %v10127_v1 = vsub.f32 %v1840_v51, %v1878_v21  ;;  %v1863_v51 = vld [vmem:[%s11501_s2 + $0xf8] sm:$0xff] }
  0xd5   :  { %7506 = vmatprep.subr.bf16.mxu0 %v9960_v44  ;;  %v1847_v44 = vld [vmem:[%s11501_s2 + $0x78] sm:$0xff] }
  0xd6   :  { %v2527_v41 = vand.u32 4294901760, %v1847_v44  ;;  %12162 = vst [vmem:[#allocation140_spill] sm:$0xff] %v10071_v10 }
  0xd7   :  { %7532 = vmatpush3.bf16.msra.mxu1 %v9482_v9  ;;  %v1852_v9 = vld [vmem:[%s11501_s2 + $0xa0] sm:$0xff] }
  0xd8   :  { %7508 = vmatpush3.bf16.msra.mxu0 %v9969_v17  ;;  %7534 = vmatprep.subr.bf16.mxu1 %v9488_v45  ;;  %v1848_v45 = vld [vmem:[%s11501_s2 + $0x80] sm:$0xff]  ;;  %v1890_v33 = vand.u32 4294901760, %v1852_v9  ;;  %v10122_v3 = vsub.f32 %v1847_v44, %v2527_v41 }
  0xd9   :  { %7510 = vmatprep.subr.bf16.mxu0 %v9976_v40  ;;  %v1843_v40 = vld [vmem:[%s11501_s2 + $0x58] sm:$0xff]  ;;  %v1886_v13 = vand.u32 4294901760, %v1848_v45  ;;  %v1856_v44 = vld [vmem:[%s11501_s2 + $0xc0] sm:$0xff] }
  0xda   :  { %v2523_v16 = vand.u32 4294901760, %v1843_v40 }
  0xdb   :  { %7536 = vmatpush3.bf16.msra.mxu1 %v9536_v35  ;;  %v1855_v35 = vld [vmem:[%s11501_s2 + $0xb8] sm:$0xff] }
  0xdc   :  { %7512 = vmatpush3.bf16.msra.mxu0 %v9985_v15  ;;  %7538 = vmatprep.subr.bf16.mxu1 %v9695_v58  ;;  %v1845_v15 = vld [vmem:[%s11501_s2 + $0x68] sm:$0xff]  ;;  %v10069_v60 = vpack.c.bf16 %v2527_v41, %v2523_v16  ;;  %v1888_v58 = vand.u32 4294901760, %v1853_v6  ;;  %v2535_v43 = vand.u32 4294901760, %v1855_v35 }
  0xdd   :  { %v1857_v41 = vld [vmem:[%s11501_s2 + $0xc8] sm:$0xff] }
  0xde   :  { %12161 = vst [vmem:[#allocation139_spill] sm:$0xff] %v10069_v60 }
  0xdf   :  { %1722 = vmatmul.mubr.f32.vlgmr.msra.gmra.mrb[10].mxu0 %v9632_v59  ;;  %7540 = vmatpush3.bf16.msra.mxu1 %v9699_v55  ;;  %v1884_v55 = vand.u32 4294901760, %v1849_v14 }
  0xe0   :  { %7542 = vmatprep.subr.bf16.mxu1 %v9728_v63 }
  0xe1   :  { %v10144_v21 = vpack.c.bf16 %v1888_v58, %v1884_v55 }
  0xe3   :  { %7544 = vmatpush3.bf16.msra.mxu1 %v9744_v24  ;;  %v1851_v24 = vld [vmem:[%s11501_s2 + $0x98] sm:$0xff]  ;;  %12164 = vst [vmem:[#allocation142_spill] sm:$0xff] %v10144_v21 }
  0xe4   :  { %v2531_v57 = vand.u32 4294901760, %v1851_v24 }
  0xe6   :  { %1826 = vmatmul.mubr.f32.vlgmr.msra.gmra.mrb[10].mxu1 %v9632_v59  ;;  %v10004_v59 = vld [vmem:[%s11501_s2 + $0x28] sm:$0xff] }
  0xe7   :  { %v1872_v8 = vand.u32 4294901760, %v10004_v59 }
  0xe9   :  { %v10100_v61 = vsub.f32 %v10004_v59, %v1872_v8  ;;  %v10120_v59 = vsub.f32 %v1843_v40, %v2523_v16  ;;  %v1861_v16 = vld [vmem:[%s11501_s2 + $0xe8] sm:$0xff]  ;;  %v10161_v40 = vsub.f32 %v1851_v24, %v2531_v57 }
 0x110   :  { %v6353_v22 = vpop.f32.mrb[0].mxu0 }
 0x111   :  { %v6354_v37 = vpop.f32.mrb[1].mxu0 }
 0x112   :  { %v6355_v29 = vadd.f32 %v6354_v37, %v6353_v22  ;;  %v1834_v22 = vld [vmem:[%s11501_s2 + $0x10] sm:$0xff] }
 0x113   :  { %v1838_v37 = vld [vmem:[%s11501_s2 + $0x30] sm:$0xff] }
 0x119   :  { %v6388_v32 = vpop.f32.mrb[0].mxu1 }
 0x11a   :  { %v6389_v4 = vpop.f32.mrb[1].mxu1 }
 0x11b   :  { %v6390_v30 = vadd.f32 %v6389_v4, %v6388_v32  ;;  %v10029_v32 = vpack.c.bf16 %v1872_v8, %v1868_v62  ;;  %v2517_v4 = vand.u32 4294901760, %v1834_v22  ;;  %v1850_v8 = vld [vmem:[%s11501_s2 + $0x90] sm:$0xff] }
 0x11d   :  { %v448_v54 = vadd.f32 %v6390_v30, %v6355_v29  ;;  %12156 = vst [vmem:[#allocation134_spill] sm:$0xff] %v10029_v32  ;;  %v2521_v30 = vand.u32 4294901760, %v1838_v37  ;;  %7546 = vmatprep.subr.bf16.mxu0 %v10029_v32  ;;  %v10112_v11 = vsub.f32 %v1834_v22, %v2517_v4  ;;  %v1896_v22 = vand.u32 4294901760, %v1861_v16 }
 0x11f   :  { %v10045_v17 = vpack.c.bf16 %v2521_v30, %v2517_v4  ;;  %v10114_v42 = vsub.f32 %v1838_v37, %v2521_v30  ;;  %v1862_v4 = vld [vmem:[%s11501_s2 + $0xf0] sm:$0xff] }
 0x121   :  { %12159 = vst [vmem:[#allocation137_spill] sm:$0xff] %v10045_v17 }
 0x132   :  { %v6423_v28 = vpop.f32.mrb[2].mxu0 }
 0x133   :  { %v6424_v26 = vpop.f32.mrb[3].mxu0 }
 0x134   :  { %v6425_v25 = vadd.f32 %v6424_v26, %v6423_v28  ;;  %v10031_v28 = vpack.c.bf16 %v2519_v48, %v2515_v53  ;;  %v10033_v26 = vpack.c.bf16 %v1874_v52, %v1870_v27  ;;  %v10129_v53 = vsub.f32 %v1844_v46, %v1882_v56  ;;  %v1859_v46 = vld [vmem:[%s11501_s2 + $0xd8] sm:$0xff] }
 0x135   :  { %v10146_v56 = vsub.f32 %v1849_v14, %v1884_v55  ;;  %v10163_v55 = vsub.f32 %v1855_v35, %v2535_v43  ;;  %v10171_v14 = vsub.f32 %v1852_v9, %v1890_v33  ;;  %v2533_v48 = vand.u32 4294901760, %v1850_v8  ;;  %v1860_v35 = vld [vmem:[%s11501_s2 + $0xe0] sm:$0xff] }
 0x136   :  { %v586_v50 = vadd.f32 %v6425_v25, %v448_v54  ;;  %12157 = vst [vmem:[#allocation135_spill] sm:$0xff] %v10031_v28  ;;  %12158 = vst [vmem:[#allocation136_spill] sm:$0xff] %v10033_v26  ;;  %v1841_v25 = vld [vmem:[%s11501_s2 + $0x48] sm:$0xff]  ;;  %7642 = vmatprep.subr.bf16.mxu1 %v10031_v28  ;;  %7548 = vmatpush1.bf16.msra.mxu0 %v10033_v26  ;;  %v1892_v52 = vand.u32 4294901760, %v1857_v41  ;;  %v2539_v24 = vand.u32 4294901760, %v1859_v46 }
 0x137   :  { %7644 = vmatpush1.bf16.msra.mxu1 %v10045_v17  ;;  %v10182_v9 = vsub.f32 %v1850_v8, %v2533_v48 }
 0x138   :  { %7646 = vmatprep.subr.bf16.mxu1 %v10069_v60  ;;  %v10186_v37 = vsub.f32 %v1857_v41, %v1892_v52  ;;  %v10191_v30 = vpack.c.bf16 %v1896_v22, %v1892_v52  ;;  %v2545_v41 = vand.u32 4294901760, %v1862_v4 }
 0x139   :  { %v6458_v7 = vpop.f32.mrb[2].mxu1 }
 0x13a   :  { %v6459_v29 = vpop.f32.mrb[3].mxu1  ;;  %12168 = vst [vmem:[#allocation146_spill] sm:$0xff] %v10191_v30 }
 0x13b   :  { %v6460_v54 = vadd.f32 %v6459_v29, %v6458_v7  ;;  %v1876_v7 = vand.u32 4294901760, %v1841_v25  ;;  %v1880_v29 = vand.u32 4294901760, %v1845_v15 }
 0x13d   :  { %v10056_v31 = vadd.f32 %v6460_v54, %v586_v50  ;;  %v10067_v34 = vpack.c.bf16 %v1880_v29, %v1876_v7  ;;  %v2525_v50 = vand.u32 4294901760, %v1842_v23  ;;  %v2529_v54 = vand.u32 4294901760, %v1846_v2 }
 0x13e   :  { %v10116_v19 = vsub.f32 %v1841_v25, %v1876_v7  ;;  %v10118_v62 = vsub.f32 %v1845_v15, %v1880_v29  ;;  %v1854_v15 = vld [vmem:[%s11501_s2 + $0xb0] sm:$0xff]  ;;  %v10193_v25 = vsub.f32 %v1861_v16, %v1896_v22  ;;  %v10197_v29 = vsub.f32 %v1859_v46, %v2539_v24 }
 0x13f   :  { %12160 = vst [vmem:[#allocation138_spill] sm:$0xff] %v10067_v34  ;;  %7550 = vmatprep.subr.bf16.mxu0 %v10067_v34  ;;  %v10083_v63 = vpack.c.bf16 %v2529_v54, %v2525_v50  ;;  %v10131_v39 = vsub.f32 %v1842_v23, %v2525_v50  ;;  %v10133_v38 = vsub.f32 %v1846_v2, %v2529_v54  ;;  %v2537_v27 = vand.u32 4294901760, %v1854_v15 }
 0x140   :  { %7552 = vmatpush1.bf16.msra.mxu0 %v10071_v10  ;;  %v10148_v23 = vsub.f32 %v1853_v6, %v1888_v58  ;;  %v10150_v2 = vpack.c.bf16 %v2535_v43, %v2531_v57  ;;  %v10165_v58 = vpack.c.bf16 %v1890_v33, %v1886_v13  ;;  %v10167_v6 = vsub.f32 %v1848_v45, %v1886_v13  ;;  %v1858_v45 = vld [vmem:[%s11501_s2 + $0xd0] sm:$0xff] }
 0x141   :  { %12163 = vst [vmem:[#allocation141_spill] sm:$0xff] %v10083_v63  ;;  %7648 = vmatpush1.bf16.msra.mxu1 %v10083_v63  ;;  %7554 = vmatprep.subr.bf16.mxu0 %v10144_v21  ;;  %v2543_v57 = vand.u32 4294901760, %v1863_v51  ;;  %v1894_v43 = vand.u32 4294901760, %v1856_v44  ;;  %v10180_v13 = vpack.c.bf16 %v2537_v27, %v2533_v48  ;;  %v10184_v33 = vsub.f32 %v1854_v15, %v2537_v27 }
 0x142   :  { %12165 = vst [vmem:[#allocation143_spill] sm:$0xff] %v10150_v2  ;;  %12166 = vst [vmem:[#allocation144_spill] sm:$0xff] %v10165_v58  ;;  %7650 = vmatprep.subr.bf16.mxu1 %v10150_v2  ;;  %v1898_v54 = vand.u32 4294901760, %v1860_v35  ;;  %v2541_v15 = vand.u32 4294901760, %v1858_v45  ;;  %v11742_v16 = vand.u32 4294901760, %v10097_v49  ;;  %v11741_v48 = vand.u32 4294901760, %v10100_v61 }
 0x143   :  { %12167 = vst [vmem:[#allocation145_spill] sm:$0xff] %v10180_v13  ;;  %v10195_v7 = vpack.c.bf16 %v2543_v57, %v2539_v24  ;;  %v10200_v50 = vsub.f32 %v1863_v51, %v2543_v57  ;;  %v10202_v8 = vsub.f32 %v1856_v44, %v1894_v43  ;;  %v11739_v51 = vmov 0.0  }
 0x144   :  { %7556 = vmatpush1.bf16.msra.mxu0 %v10165_v58  ;;  %v10208_v27 = vpack.c.bf16 %v1898_v54, %v1894_v43  ;;  %v10210_v46 = vsub.f32 %v1860_v35, %v1898_v54  ;;  %v10212_v52 = vsub.f32 %v1858_v45, %v2541_v15  ;;  %1948 = vmatprep.mubr.f32.mxu0 %v11739_v51  ;;  %v11744_v44 = vand.u32 4294901760, %v10103_v36 }
 0x145   :  { %12169 = vst [vmem:[#allocation147_spill] sm:$0xff] %v10195_v7  ;;  %7652 = vmatpush1.bf16.msra.mxu1 %v10180_v13  ;;  %12170 = vst [vmem:[#allocation148_spill] sm:$0xff] %v10202_v8  ;;  %7558 = vmatprep.subr.bf16.mxu0 %v10191_v30  ;;  %v10217_v22 = vpack.c.bf16 %v2545_v41, %v2541_v15  ;;  %v10219_v24 = vsub.f32 %v1862_v4, %v2545_v41  ;;  %v11751_v45 = vand.u32 4294901760, %v10105_v12 }
 0x146   :  { %7654 = vmatprep.subr.bf16.mxu1 %v10195_v7  ;;  %12171 = vst [vmem:[#allocation149_spill] sm:$0xff] %v10208_v27  ;;  %12172 = vst [vmem:[#allocation150_spill] sm:$0xff] %v10210_v46  ;;  %2595 = vmatprep.mubr.f32.mxu1 %v11739_v51  ;;  %v1963_v57 = vsub.f32 %v10097_v49, %v11742_v16  ;;  %v1975_v35 = vsub.f32 %v10100_v61, %v11741_v48  ;;  %v11758_v54 = vand.u32 4294901760, %v10108_v0 }
 0x147   :  { %12173 = vst [vmem:[#allocation151_spill] sm:$0xff] %v10212_v52  ;;  %12174 = vst [vmem:[#allocation152_spill] sm:$0xff] %v10217_v22  ;;  %v2610_v43 = vsub.f32 %v10103_v36, %v11744_v44  ;;  %v11764_v4 = vand.u32 4294901760, %v10110_v5  ;;  %v11763_v51 = vand.u32 4294901760, %v10112_v11  ;;  %v2622_v44 = vsub.f32 %v10105_v12, %v11751_v45 }
 0x148   :  { %12175 = vst [vmem:[#allocation153_spill] sm:$0xff] %v10219_v24  ;;  %7560 = vmatpush1.bf16.msra.mxu0 %v10208_v27  ;;  %v1964_v15 = vand.u32 4294901760, %v1963_v57  ;;  %v1976_v41 = vand.u32 4294901760, %v1975_v35  ;;  %v1969_v18 = vsub.f32 %v10108_v0, %v11758_v54  ;;  %v11770_v45 = vand.u32 4294901760, %v10116_v19 }
 0x149   :  { %7656 = vmatpush1.bf16.msra.mxu1 %v10217_v22  ;;  %v2611_v47 = vand.u32 4294901760, %v2610_v43  ;;  %v1981_v20 = vsub.f32 %v10110_v5, %v11764_v4  ;;  %v2616_v48 = vsub.f32 %v10112_v11, %v11763_v51  ;;  %v12176_v43 = vand.u32 4294901760, %v10114_v42 }
 0x14a   :  { %v7561_v35 = vpack.c.bf16 %v1976_v41, %v1964_v15  ;;  %v2623_v7 = vand.u32 4294901760, %v2622_v44  ;;  %v1970_v30 = vand.u32 4294901760, %v1969_v18  ;;  %v1987_v15 = vsub.f32 %v10116_v19, %v11770_v45 }
 0x14b   :  { %v2628_v22 = vsub.f32 %v10114_v42, %v12176_v43  ;;  %v1982_v54 = vand.u32 4294901760, %v1981_v20  ;;  %v2617_v13 = vand.u32 4294901760, %v2616_v48  ;;  %v11769_v41 = vand.u32 4294901760, %v10118_v62 }
 0x14c   :  { %7562 = vmatprep.subr.bf16.mxu0 %v7561_v35  ;;  %v7657_v4 = vpack.c.bf16 %v2623_v7, %v2611_v47  ;;  %v11768_v43 = vand.u32 4294901760, %v10120_v59  ;;  %v1988_v18 = vand.u32 4294901760, %v1987_v15  ;;  %v11767_v48 = vand.u32 4294901760, %v10122_v3 }
 0x14d   :  { %v2629_v58 = vand.u32 4294901760, %v2628_v22  ;;  %v10258_v2 = vpack.c.bf16 %v1982_v54, %v1970_v30  ;;  %v1999_v20 = vsub.f32 %v10118_v62, %v11769_v41  ;;  %v11771_v47 = vand.u32 4294901760, %v10127_v1 }
 0x14e   :  { %7658 = vmatprep.subr.bf16.mxu1 %v7657_v4  ;;  %v2634_v44 = vsub.f32 %v10120_v59, %v11768_v43  ;;  %v11777_v30 = vand.u32 4294901760, %v10131_v39  ;;  %v2646_v7 = vsub.f32 %v10122_v3, %v11767_v48  ;;  %v11791_v10 = vand.u32 4294901760, %v10193_v25 }
 0x14f   :  { %v2681_v34 = vand.u32 4294901760, %v10197_v29 }
 0x150   :  { %v2635_v4 = vand.u32 4294901760, %v2634_v44  ;;  %v2640_v15 = vsub.f32 %v10131_v39, %v11777_v30  ;;  %v2647_v43 = vand.u32 4294901760, %v2646_v7  ;;  %v11779_v7 = vand.u32 4294901760, %v10161_v40 }
 0x152   :  { %v6493_v16 = vpop.f32.mrb[4].mxu0  ;;  %v2641_v22 = vand.u32 4294901760, %v2640_v15  ;;  %v10297_v63 = vpack.c.bf16 %v2647_v43, %v2635_v4  ;;  %v11782_v43 = vand.u32 4294901760, %v10171_v14  ;;  %v11792_v15 = vand.u32 4294901760, %v10186_v37 }
 0x153   :  { %v6494_v57 = vpop.f32.mrb[5].mxu0 }
 0x154   :  { %v6495_v27 = vadd.f32 %v6494_v57, %v6493_v16  ;;  %v10261_v16 = vpack.c.bf16 %v2629_v58, %v2617_v13  ;;  %v2000_v13 = vand.u32 4294901760, %v1999_v20  ;;  %v1993_v57 = vsub.f32 %v10127_v1, %v11771_v47 }
 0x155   :  { %v12177_v47 = vand.u32 4294901760, %v10146_v56 }
 0x156   :  { %v862_v51 = vadd.f32 %v6495_v27, %v10056_v31  ;;  %v11774_v31 = vand.u32 4294901760, %v10129_v53  ;;  %v11783_v27 = vand.u32 4294901760, %v10133_v38  ;;  %v10287_v48 = vpack.c.bf16 %v2000_v13, %v1988_v18 }
 0x157   :  { %v1994_v41 = vand.u32 4294901760, %v1993_v57  ;;  %v2011_v21 = vsub.f32 %v10146_v56, %v12177_v47  ;;  %v11780_v18 = vand.u32 4294901760, %v10148_v23 }
 0x158   :  { %v2005_v35 = vsub.f32 %v10129_v53, %v11774_v31  ;;  %v2652_v44 = vsub.f32 %v10133_v38, %v11783_v27 }
 0x159   :  { %v6528_v58 = vpop.f32.mrb[4].mxu1  ;;  %v2012_v13 = vand.u32 4294901760, %v2011_v21  ;;  %v2023_v47 = vsub.f32 %v10148_v23, %v11780_v18 }
 0x15a   :  { %v6529_v54 = vpop.f32.mrb[5].mxu1  ;;  %v2006_v45 = vand.u32 4294901760, %v2005_v35  ;;  %v2653_v30 = vand.u32 4294901760, %v2652_v44  ;;  %v2029_v35 = vsub.f32 %v10171_v14, %v11782_v43  ;;  %v2035_v43 = vsub.f32 %v10186_v37, %v11792_v15 }
 0x15b   :  { %v6530_v20 = vadd.f32 %v6529_v54, %v6528_v58  ;;  %v11778_v54 = vand.u32 4294901760, %v10163_v55 }
 0x15c   :  { %v10300_v58 = vpack.c.bf16 %v2006_v45, %v1994_v41  ;;  %v10304_v57 = vpack.c.bf16 %v2653_v30, %v2641_v22  ;;  %v2658_v45 = vsub.f32 %v10161_v40, %v11779_v7  ;;  %v11788_v41 = vand.u32 4294901760, %v10182_v9 }
 0x15d   :  { %v10295_v31 = vadd.f32 %v6530_v20, %v862_v51  ;;  %v11781_v51 = vand.u32 4294901760, %v10167_v6  ;;  %v2670_v21 = vsub.f32 %v10163_v55, %v11778_v54  ;;  %v11793_v30 = vand.u32 4294901760, %v10184_v33 }
 0x15e   :  { %v2024_v22 = vand.u32 4294901760, %v2023_v47  ;;  %v2659_v20 = vand.u32 4294901760, %v2658_v45  ;;  %v2664_v54 = vsub.f32 %v10182_v9, %v11788_v41  ;;  %v2036_v41 = vand.u32 4294901760, %v2035_v43 }
 0x15f   :  { %v2017_v4 = vsub.f32 %v10167_v6, %v11781_v51  ;;  %v2671_v44 = vand.u32 4294901760, %v2670_v21  ;;  %v2676_v47 = vsub.f32 %v10184_v33, %v11793_v30  ;;  %v2030_v51 = vand.u32 4294901760, %v2029_v35 }
 0x160   :  { %v10332_v7 = vpack.c.bf16 %v2024_v22, %v2012_v13  ;;  %v2665_v45 = vand.u32 4294901760, %v2664_v54  ;;  %v2693_v13 = vand.u32 4294901760, %v10200_v50  ;;  %v2040_v35 = vand.u32 4294901760, %v10202_v8 }
 0x161   :  { %v2018_v18 = vand.u32 4294901760, %v2017_v4  ;;  %v10337_v27 = vpack.c.bf16 %v2671_v44, %v2659_v20  ;;  %v2677_v21 = vand.u32 4294901760, %v2676_v47  ;;  %v2047_v4 = vsub.f32 %v10193_v25, %v11791_v10 }
 0x162   :  { %v2052_v54 = vand.u32 4294901760, %v10210_v46  ;;  %v2682_v20 = vsub.f32 %v10197_v29, %v2681_v34  ;;  %v2699_v43 = vand.u32 4294901760, %v10219_v24  ;;  %v2041_v47 = vsub.f32 %v10202_v8, %v2040_v35 }
 0x163   :  { %12178 = vst [vmem:[#allocation154_spill] sm:$0xff] %v10337_v27  ;;  %v10340_v60 = vpack.c.bf16 %v2030_v51, %v2018_v18  ;;  %v10344_v22 = vpack.c.bf16 %v2677_v21, %v2665_v45  ;;  %v2694_v18 = vsub.f32 %v10200_v50, %v2693_v13  ;;  %v2687_v51 = vand.u32 4294901760, %v10212_v52 }
 0x164   :  { %v2048_v44 = vand.u32 4294901760, %v2047_v4  ;;  %v2053_v45 = vsub.f32 %v10210_v46, %v2052_v54  ;;  %v2683_v10 = vand.u32 4294901760, %v2682_v20  ;;  %v2700_v17 = vsub.f32 %v10219_v24, %v2699_v43 }
 0x165   :  { %12179 = vst [vmem:[#allocation155_spill] sm:$0xff] %v10340_v60  ;;  %12180 = vst [vmem:[#allocation156_spill] sm:$0xff] %v10344_v22  ;;  %v2695_v15 = vand.u32 4294901760, %v2694_v18  ;;  %v2688_v30 = vsub.f32 %v10212_v52, %v2687_v51  ;;  %v2042_v28 = vand.u32 4294901760, %v2041_v47  ;;  %v12187_v4 = vand.u32 4294901760, %v10108_v0 }
 0x166   :  { %v10361_v26 = vpack.c.bf16 %v2048_v44, %v2036_v41  ;;  %v2054_v32 = vand.u32 4294901760, %v2053_v45  ;;  %v2701_v27 = vand.u32 4294901760, %v2700_v17  ;;  %v12185_v45 = vand.u32 4294901760, %v10105_v12 }
 0x167   :  { %v10365_v22 = vpack.c.bf16 %v2695_v15, %v2683_v10  ;;  %v2689_v60 = vand.u32 4294901760, %v2688_v30  ;;  %v12181_v15 = vand.u32 4294901760, %v10097_v49 }
 0x168   :  { %v10369_v20 = vpack.c.bf16 %v2054_v32, %v2042_v28 }
 0x169   :  { %v10377_v47 = vpack.c.bf16 %v2701_v27, %v2689_v60  ;;  %v12182_v60 = vand.u32 4294901760, %v10100_v61  ;;  %v12184_v27 = vand.u32 4294901760, %v10103_v36 }
 0x16b   :  { %v10404_v18 = vpack.c.bf16 %v12182_v60, %v12181_v15  ;;  %v10410_v21 = vpack.c.bf16 %v12185_v45, %v12184_v27  ;;  %v12193_v60 = vand.u32 4294901760, %v10116_v19 }
 0x16d   :  { %12183 = vst [vmem:[#allocation157_spill] sm:$0xff] %v10404_v18  ;;  %12186 = vst [vmem:[#allocation158_spill] sm:$0xff] %v10410_v21  ;;  %v12194_v18 = vand.u32 4294901760, %v10118_v62 }
 0x16f   :  { %v10428_v27 = vpack.c.bf16 %v12194_v18, %v12193_v60  ;;  %v12205_v18 = vand.u32 4294901760, %v10146_v56 }
 0x171   :  { %12195 = vst [vmem:[#allocation161_spill] sm:$0xff] %v10428_v27 }
 0x172   :  { %v6563_v17 = vpop.f32.mrb[6].mxu0 }
 0x173   :  { %v6564_v28 = vpop.f32.mrb[7].mxu0 }
 0x174   :  { %v6565_v10 = vadd.f32 %v6564_v28, %v6563_v17  ;;  %v12188_v17 = vand.u32 4294901760, %v10110_v5  ;;  %v12191_v28 = vand.u32 4294901760, %v10114_v42 }
 0x176   :  { %v1078_v30 = vadd.f32 %v6565_v10, %v10295_v31  ;;  %v10416_v31 = vpack.c.bf16 %v12188_v17, %v12187_v4  ;;  %v12190_v10 = vand.u32 4294901760, %v10112_v11  ;;  %v12199_v4 = vand.u32 4294901760, %v10127_v1 }
 0x177   :  { %v12200_v17 = vand.u32 4294901760, %v10129_v53 }
 0x178   :  { %12189 = vst [vmem:[#allocation159_spill] sm:$0xff] %v10416_v31  ;;  %v10422_v52 = vpack.c.bf16 %v12191_v28, %v12190_v10  ;;  %v12206_v28 = vand.u32 4294901760, %v10148_v23 }
 0x179   :  { %v6598_v44 = vpop.f32.mrb[6].mxu1  ;;  %v10440_v31 = vpack.c.bf16 %v12200_v17, %v12199_v4  ;;  %v12211_v4 = vand.u32 4294901760, %v10167_v6  ;;  %v12212_v17 = vand.u32 4294901760, %v10171_v14 }
 0x17a   :  { %v6599_v41 = vpop.f32.mrb[7].mxu1  ;;  %12192 = vst [vmem:[#allocation160_spill] sm:$0xff] %v10422_v52  ;;  %v10452_v60 = vpack.c.bf16 %v12206_v28, %v12205_v18  ;;  %v12217_v18 = vand.u32 4294901760, %v10186_v37  ;;  %v12218_v28 = vand.u32 4294901760, %v10193_v25 }
 0x17b   :  { %v6600_v32 = vadd.f32 %v6599_v41, %v6598_v44  ;;  %v12196_v41 = vand.u32 4294901760, %v10120_v59  ;;  %v12197_v44 = vand.u32 4294901760, %v10122_v3  ;;  %12201 = vst [vmem:[#allocation163_spill] sm:$0xff] %v10440_v31  ;;  %v10464_v31 = vpack.c.bf16 %v12212_v17, %v12211_v4 }
 0x17c   :  { %12207 = vst [vmem:[#allocation165_spill] sm:$0xff] %v10452_v60  ;;  %v10476_v60 = vpack.c.bf16 %v12218_v28, %v12217_v18 }
 0x17d   :  { %v1310_v15 = vadd.f32 %v6600_v32, %v1078_v30  ;;  %v10434_v45 = vpack.c.bf16 %v12197_v44, %v12196_v41  ;;  %v12202_v32 = vand.u32 4294901760, %v10131_v39  ;;  %v12203_v30 = vand.u32 4294901760, %v10133_v38  ;;  %12213 = vst [vmem:[#allocation167_spill] sm:$0xff] %v10464_v31 }
 0x17e   :  { %v12208_v41 = vand.u32 4294901760, %v10161_v40  ;;  %v12209_v44 = vand.u32 4294901760, %v10163_v55 }
 0x17f   :  { %12198 = vst [vmem:[#allocation162_spill] sm:$0xff] %v10434_v45  ;;  %v10446_v10 = vpack.c.bf16 %v12203_v30, %v12202_v32  ;;  %v12214_v32 = vand.u32 4294901760, %v10182_v9  ;;  %v12215_v30 = vand.u32 4294901760, %v10184_v33 }
 0x180   :  { %v10458_v45 = vpack.c.bf16 %v12209_v44, %v12208_v41  ;;  %v10478_v41 = vpack.c.bf16 %v2693_v13, %v2681_v34  ;;  %v10480_v44 = vpack.c.bf16 %v2052_v54, %v2040_v35 }
 0x181   :  { %12204 = vst [vmem:[#allocation164_spill] sm:$0xff] %v10446_v10  ;;  %v10470_v10 = vpack.c.bf16 %v12215_v30, %v12214_v32 }
 0x182   :  { %12210 = vst [vmem:[#allocation166_spill] sm:$0xff] %v10458_v45  ;;  %v10482_v45 = vpack.c.bf16 %v2699_v43, %v2687_v51 }
 0x183   :  { %12216 = vst [vmem:[#allocation168_spill] sm:$0xff] %v10470_v10 }
 0x192   :  { %v6633_v4 = vpop.f32.mrb[8].mxu0 }
 0x193   :  { %v6634_v17 = vpop.f32.mrb[9].mxu0 }
 0x194   :  { %v6635_v31 = vadd.f32 %v6634_v17, %v6633_v4  ;;  %v12264_v4 = vld [vmem:[#allocation162_spill] sm:$0xff]  ;;  %v12265_v17 = vld [vmem:[#allocation163_spill] sm:$0xff] }
 0x196   :  { %v1448_v27 = vadd.f32 %v6635_v31, %v1310_v15  ;;  %v12261_v15 = vld [vmem:[#allocation159_spill] sm:$0xff] }
 0x199   :  { %v6668_v52 = vpop.f32.mrb[8].mxu1 }
 0x19a   :  { %v6669_v21 = vpop.f32.mrb[9].mxu1 }
 0x19b   :  { %v6670_v32 = vadd.f32 %v6669_v21, %v6668_v52 }
 0x19d   :  { %v1556_v30 = vadd.f32 %v6670_v32, %v1448_v27  ;;  %v12262_v27 = vld [vmem:[#allocation160_spill] sm:$0xff] }
 0x19e   :  { %v12266_v32 = vld [vmem:[#allocation164_spill] sm:$0xff] }
 0x1b2   :  { %v6703_v10 = vpop.f32.mrb[10].mxu0 }
 0x1b3   :  { %v6704_v24 = vpop.f32.mrb[11].mxu0 }
 0x1b4   :  { %v6705_v8 = vadd.f32 %v6704_v24, %v6703_v10  ;;  %v12221_v24 = vld [vmem:[#allocation155_spill] sm:$0xff]  ;;  %v12263_v10 = vld [vmem:[#allocation161_spill] sm:$0xff] }
 0x1b6   :  { %v1724_v46 = vadd.f32 %v6705_v8, %v1556_v30  ;;  %v12219_v8 = vmov 0.0   ;;  %v12267_v30 = vld [vmem:[#allocation165_spill] sm:$0xff] }
 0x1b9   :  { %v6738_v18 = vpop.f32.mrb[10].mxu1 }
 0x1ba   :  { %v6739_v28 = vpop.f32.mrb[11].mxu1 }
 0x1bb   :  { %v6740_v34 = vadd.f32 %v6739_v28, %v6738_v18  ;;  %v12268_v18 = vld [vmem:[#allocation166_spill] sm:$0xff]  ;;  %v12269_v28 = vld [vmem:[#allocation167_spill] sm:$0xff] }
 0x1bd   :  { %v1828_v13 = vadd.f32 %v6740_v34, %v1724_v46  ;;  %v12220_v46 = vld [vmem:[#allocation154_spill] sm:$0xff]  ;;  %v12270_v34 = vld [vmem:[#allocation168_spill] sm:$0xff] }
 0x1bf   :  { %v1831_v35 = vmul.f32 0.125, %v1828_v13  ;;  %v12275_v13 = vld [vmem:[#allocation15_spill] sm:$0xff] }
 0x1c1   :  { %v1866_v54 = vsel %vm1864_vm0, %v1831_v35, 0  ;;  %v12276_v35 = vld [vmem:[#allocation7_spill] sm:$0xff] }
 0x1c2   :  { %v10485_v51 = vand.u32 4294901760, %v1866_v54 }
 0x1c4   :  { %v1950_v43 = vsub.f32 %v1866_v54, %v10485_v51  ;;  %v12277_v54 = vld [vmem:[#allocation18_spill] sm:$0xff] }
 0x1c6   :  { %v10488_v31 = vand.u32 4294901760, %v1950_v43 }
 0x1c8   :  { %v1952_v52 = vsub.f32 %v1950_v43, %v10488_v31 }
 0x1ca   :  { %v1953_v21 = vand.u32 4294901760, %v1952_v52  ;;  %v12280_v52 = vld [vmem:[#allocation9_spill] sm:$0xff] }
 0x1cc   :  { %1954 = vmatmul.mubr.f32.vlgmr.msra.gmra.mrb[12].mxu0 %v1953_v21  ;;  %2601 = vmatmul.mubr.f32.vlgmr.msra.gmra.mrb[12].mxu1 %v1953_v21  ;;  %v12281_v21 = vld [vmem:[#allocation22_spill] sm:$0xff] }
 0x1cd   :  { %7564 = vmatpush1.bf16.msra.mxu0 %v10258_v2  ;;  %7660 = vmatpush1.bf16.msra.mxu1 %v10261_v16  ;;  %v12222_v2 = vld [vmem:[#allocation156_spill] sm:$0xff]  ;;  %v12224_v16 = vpack.c.bf16 %v10105_v12, %v10103_v36  ;;  %v12228_v36 = vpack.c.bf16 %v10122_v3, %v10120_v59  ;;  %v12234_v12 = vpack.c.bf16 %v10184_v33, %v10182_v9  ;;  %v12237_v59 = vld [vmem:[#allocation150_spill] sm:$0xff]  ;;  %v12250_v33 = vld [vmem:[#allocation141_spill] sm:$0xff] }
 0x1ce   :  { %7566 = vmatprep.subr.bf16.mxu0 %v10287_v48  ;;  %7662 = vmatprep.subr.bf16.mxu1 %v10297_v63  ;;  %v12223_v63 = vpack.c.bf16 %v10100_v61, %v10097_v49  ;;  %v12226_v48 = vpack.c.bf16 %v10114_v42, %v10112_v11  ;;  %v12227_v49 = vpack.c.bf16 %v10118_v62, %v10116_v19  ;;  %v12238_v3 = vld [vmem:[#allocation148_spill] sm:$0xff] }
 0x1cf   :  { %2104 = vmatprep.mubr.f32.mxu0 %v12219_v8  ;;  %2751 = vmatprep.mubr.f32.mxu1 %v12219_v8  ;;  %v12230_v42 = vpack.c.bf16 %v10133_v38, %v10131_v39  ;;  %v12231_v11 = vpack.c.bf16 %v10148_v23, %v10146_v56  ;;  %v12233_v61 = vpack.c.bf16 %v10171_v14, %v10167_v6  ;;  %v12241_v39 = vld [vmem:[#allocation151_spill] sm:$0xff]  ;;  %v12243_v56 = vld [vmem:[#allocation134_spill] sm:$0xff]  ;;  %v12249_v9 = vld [vmem:[#allocation140_spill] sm:$0xff] }
 0x1d0   :  { %v12235_v19 = vpack.c.bf16 %v10193_v25, %v10186_v37  ;;  %v12236_v62 = vpack.c.bf16 %v10200_v50, %v10197_v29  ;;  %v12244_v23 = vld [vmem:[#allocation135_spill] sm:$0xff]  ;;  %v12247_v6 = vld [vmem:[#allocation138_spill] sm:$0xff]  ;;  %v12253_v29 = vld [vmem:[#allocation144_spill] sm:$0xff] }
 0x1d1   :  { %7568 = vmatpush1.bf16.msra.mxu0 %v10300_v58  ;;  %7664 = vmatpush1.bf16.msra.mxu1 %v10304_v57  ;;  %v12248_v14 = vld [vmem:[#allocation139_spill] sm:$0xff]  ;;  %v12251_v37 = vld [vmem:[#allocation142_spill] sm:$0xff]  ;;  %v12254_v50 = vld [vmem:[#allocation145_spill] sm:$0xff] }
 0x1d2   :  { %7570 = vmatprep.subr.bf16.mxu0 %v10332_v7  ;;  %7666 = vmatprep.subr.bf16.mxu1 %v12220_v46  ;;  %v12252_v25 = vld [vmem:[#allocation143_spill] sm:$0xff]  ;;  %v12255_v58 = vld [vmem:[#allocation146_spill] sm:$0xff]  ;;  %v12257_v57 = vld [vmem:[#allocation149_spill] sm:$0xff] }
 0x1d3   :  { %v12256_v7 = vld [vmem:[#allocation147_spill] sm:$0xff]  ;;  %v12282_v46 = vld [vmem:[#allocation10_spill] sm:$0xff] }
 0x1d5   :  { %7572 = vmatpush1.bf16.msra.mxu0 %v12221_v24  ;;  %7668 = vmatpush1.bf16.msra.mxu1 %v12222_v2  ;;  %v12284_v24 = vld [vmem:[#allocation11_spill] sm:$0xff]  ;;  %v12285_v2 = vld [vmem:[#allocation26_spill] sm:$0xff] }
 0x1d6   :  { %7574 = vmatprep.subr.bf16.mxu0 %v10361_v26  ;;  %7670 = vmatprep.subr.bf16.mxu1 %v10365_v22  ;;  %v12225_v26 = vpack.c.bf16 %v10110_v5, %v10108_v0  ;;  %v12229_v5 = vpack.c.bf16 %v10129_v53, %v10127_v1  ;;  %v12232_v0 = vpack.c.bf16 %v10163_v55, %v10161_v40  ;;  %v12240_v53 = vld [vmem:[#allocation153_spill] sm:$0xff]  ;;  %v12245_v40 = vld [vmem:[#allocation136_spill] sm:$0xff] }
 0x1d7   :  { %v12239_v1 = vpack.c.bf16 %v12237_v59, %v12238_v3  ;;  %v12242_v38 = vpack.c.bf16 %v12240_v53, %v12241_v39  ;;  %v12246_v55 = vld [vmem:[#allocation137_spill] sm:$0xff]  ;;  %v12258_v22 = vld [vmem:[#allocation152_spill] sm:$0xff]  ;;  %v12300_v59 = vld [vmem:[#allocation27_spill] sm:$0xff]  ;;  %v8384_v39 = vmov 1966171168  }
 0x1d8   :  { %v12301_v3 = vld [vmem:[#allocation44_spill] sm:$0xff]  ;;  %v12303_v53 = vld [vmem:[#allocation33_spill] sm:$0xff] }
 0x1d9   :  { %7576 = vmatpush1.bf16.msra.mxu0 %v10369_v20  ;;  %7672 = vmatpush1.bf16.msra.mxu1 %v10377_v47  ;;  %v12259_v20 = vld [vmem:[#allocation157_spill] sm:$0xff]  ;;  %v12260_v47 = vld [vmem:[#allocation158_spill] sm:$0xff] }
 0x1da   :  { %7578 = vmatprep.subr.bf16.mxu0 %v12223_v63  ;;  %7674 = vmatprep.subr.bf16.mxu1 %v12224_v16  ;;  %v12286_v63 = vld [vmem:[#allocation13_spill] sm:$0xff]  ;;  %v12287_v16 = vld [vmem:[#allocation28_spill] sm:$0xff] }
 0x1dc   :  { %2106 = vmatmul.mubr.f32.vlgmr.msra.gmra.mrb[12].mxu0 %v10485_v51  ;;  %2753 = vmatmul.mubr.f32.vlgmr.msra.gmra.mrb[12].mxu1 %v10485_v51 }
 0x1dd   :  { %7580 = vmatpush1.bf16.msra.mxu0 %v12225_v26  ;;  %7676 = vmatpush1.bf16.msra.mxu1 %v12226_v48  ;;  %v12288_v26 = vld [vmem:[#allocation16_spill] sm:$0xff]  ;;  %v12289_v48 = vld [vmem:[#allocation30_spill] sm:$0xff] }
 0x1de   :  { %7582 = vmatprep.subr.bf16.mxu0 %v12227_v49  ;;  %7678 = vmatprep.subr.bf16.mxu1 %v12228_v36  ;;  %v12290_v49 = vld [vmem:[#allocation17_spill] sm:$0xff]  ;;  %v12291_v36 = vld [vmem:[#allocation34_spill] sm:$0xff] }
 0x1df   :  { %2208 = vmatprep.mubr.f32.mxu0 %v12219_v8  ;;  %2855 = vmatprep.mubr.f32.mxu1 %v12219_v8 }
 0x1e1   :  { %7584 = vmatpush1.bf16.msra.mxu0 %v12229_v5  ;;  %7680 = vmatpush1.bf16.msra.mxu1 %v12230_v42  ;;  %v12292_v5 = vld [vmem:[#allocation19_spill] sm:$0xff] }
 0x1e2   :  { %7586 = vmatprep.subr.bf16.mxu0 %v12231_v11  ;;  %7682 = vmatprep.subr.bf16.mxu1 %v12232_v0  ;;  %v12293_v42 = vld [vmem:[#allocation35_spill] sm:$0xff]  ;;  %v12294_v11 = vld [vmem:[#allocation21_spill] sm:$0xff] }
 0x1e3   :  { %v12295_v0 = vld [vmem:[#allocation37_spill] sm:$0xff] }
 0x1e5   :  { %7588 = vmatpush1.bf16.msra.mxu0 %v12233_v61  ;;  %7684 = vmatpush1.bf16.msra.mxu1 %v12234_v12  ;;  %v12296_v61 = vld [vmem:[#allocation23_spill] sm:$0xff]  ;;  %v12297_v12 = vld [vmem:[#allocation38_spill] sm:$0xff] }
 0x1e6   :  { %7590 = vmatprep.subr.bf16.mxu0 %v12235_v19  ;;  %7686 = vmatprep.subr.bf16.mxu1 %v12236_v62  ;;  %v12298_v19 = vld [vmem:[#allocation25_spill] sm:$0xff] }
 0x1e7   :  { %v12299_v62 = vld [vmem:[#allocation41_spill] sm:$0xff] }
 0x1e9   :  { %7592 = vmatpush1.bf16.msra.mxu0 %v12239_v1  ;;  %7688 = vmatpush1.bf16.msra.mxu1 %v12242_v38  ;;  %v12302_v1 = vld [vmem:[#allocation29_spill] sm:$0xff]  ;;  %v3169_v38 = vunpack.c.l.s4 %v8384_v39  ;;  %v12324_v39 = vld [vmem:[#allocation46_spill] sm:$0xff] }
 0x1ea   :  { %7594 = vmatprep.subr.bf16.mxu0 %v12243_v56  ;;  %7690 = vmatprep.subr.bf16.mxu1 %v12244_v23 }
 0x1ec   :  { %2211 = vmatmul.mubr.f32.vlgmr.msra.gmra.mrb[12].mxu0 %v1950_v43  ;;  %2858 = vmatmul.mubr.f32.vlgmr.msra.gmra.mrb[12].mxu1 %v1950_v43  ;;  %v12278_v43 = vld [vmem:[#allocation8_spill] sm:$0xff] }
 0x1ed   :  { %7596 = vmatpush1.bf16.msra.mxu0 %v12245_v40  ;;  %7692 = vmatpush1.bf16.msra.mxu1 %v12246_v55 }
 0x1ee   :  { %7598 = vmatprep.subr.bf16.mxu0 %v12247_v6  ;;  %7694 = vmatprep.subr.bf16.mxu1 %v12248_v14 }
 0x1ef   :  { %2297 = vmatprep.mubr.f32.mxu0 %v12219_v8  ;;  %2944 = vmatprep.mubr.f32.mxu1 %v12219_v8 }
 0x1f1   :  { %7600 = vmatpush1.bf16.msra.mxu0 %v12249_v9  ;;  %7696 = vmatpush1.bf16.msra.mxu1 %v12250_v33 }
 0x1f2   :  { %7602 = vmatprep.subr.bf16.mxu0 %v12251_v37  ;;  %7698 = vmatprep.subr.bf16.mxu1 %v12252_v25 }
 0x1f5   :  { %7604 = vmatpush1.bf16.msra.mxu0 %v12253_v29  ;;  %7700 = vmatpush1.bf16.msra.mxu1 %v12254_v50 }
 0x1f6   :  { %7606 = vmatprep.subr.bf16.mxu0 %v12255_v58  ;;  %7702 = vmatprep.subr.bf16.mxu1 %v12256_v7 }
 0x1f9   :  { %7608 = vmatpush1.bf16.msra.mxu0 %v12257_v57  ;;  %7704 = vmatpush1.bf16.msra.mxu1 %v12258_v22 }
 0x1fa   :  { %7610 = vmatprep.subr.bf16.mxu0 %v12259_v20  ;;  %7706 = vmatprep.subr.bf16.mxu1 %v12260_v47 }
 0x1fc   :  { %2301 = vmatmul.mubr.f32.vlgmr.msra.gmra.mrb[12].mxu0 %v10488_v31  ;;  %2948 = vmatmul.mubr.f32.vlgmr.msra.gmra.mrb[12].mxu1 %v10488_v31  ;;  %v12279_v31 = vld [vmem:[#allocation20_spill] sm:$0xff] }
 0x1fd   :  { %7612 = vmatpush1.bf16.msra.mxu0 %v12261_v15  ;;  %7708 = vmatpush1.bf16.msra.mxu1 %v12262_v27 }
 0x1fe   :  { %7614 = vmatprep.subr.bf16.mxu0 %v12263_v10  ;;  %7710 = vmatprep.subr.bf16.mxu1 %v12264_v4 }
 0x1ff   :  { %2419 = vmatprep.mubr.f32.mxu0 %v12219_v8  ;;  %3066 = vmatprep.mubr.f32.mxu1 %v12219_v8 }
 0x201   :  { %7616 = vmatpush1.bf16.msra.mxu0 %v12265_v17  ;;  %7712 = vmatpush1.bf16.msra.mxu1 %v12266_v32 }
 0x202   :  { %7618 = vmatprep.subr.bf16.mxu0 %v12267_v30  ;;  %7714 = vmatprep.subr.bf16.mxu1 %v12268_v18 }
 0x205   :  { %7620 = vmatpush1.bf16.msra.mxu0 %v12269_v28  ;;  %7716 = vmatpush1.bf16.msra.mxu1 %v12270_v34 }
 0x206   :  { %7622 = vmatprep.subr.bf16.mxu0 %v10476_v60  ;;  %7718 = vmatprep.subr.bf16.mxu1 %v10478_v41  ;;  %v12272_v60 = vld [vmem:[#allocation5_spill] sm:$0xff]  ;;  %v12273_v41 = vld [vmem:[#allocation14_spill] sm:$0xff] }
 0x209   :  { %7624 = vmatpush1.bf16.msra.mxu0 %v10480_v44  ;;  %7720 = vmatpush1.bf16.msra.mxu1 %v10482_v45  ;;  %v12271_v45 = vld [vmem:[#allocation12_spill] sm:$0xff]  ;;  %v12274_v44 = vld [vmem:[#allocation6_spill] sm:$0xff] }
 0x20a   :  { %7626 = vmatprep.subr.bf16.mxu0 %v12243_v56  ;;  %7722 = vmatprep.subr.bf16.mxu1 %v12244_v23  ;;  %v3170_v56 = vunpack.c.0.s8 %v3169_v38  ;;  %v12327_v38 = vld [vmem:[#allocation49_spill] sm:$0xff] }
 0x20c   :  { %2421 = vmatmul.mubr.f32.vlgmr.msra.gmra.mrb[12].mxu0 %v10485_v51  ;;  %3068 = vmatmul.mubr.f32.vlgmr.msra.gmra.mrb[12].mxu1 %v10485_v51 }
 0x20d   :  { %7628 = vmatpush1.bf16.msra.mxu0 %v12245_v40  ;;  %7724 = vmatpush1.bf16.msra.mxu1 %v12246_v55  ;;  %v12304_v55 = vld [vmem:[#allocation31_spill] sm:$0xff] }
 0x20e   :  { %7630 = vmatprep.subr.bf16.mxu0 %v12247_v6  ;;  %7726 = vmatprep.subr.bf16.mxu1 %v12248_v14  ;;  %v10654_v6 = vsub.s32 %v3170_v56, %v12304_v55  ;;  %v12307_v20 = vsub.s32 1, %v12304_v55  ;;  %v12308_v15 = vsub.s32 0, %v12304_v55  ;;  %v12332_v56 = vld [vmem:[#allocation53_spill] sm:$0xff] }
 0x20f   :  { %2507 = vmatprep.mubr.f32.mxu0 %v12219_v8  ;;  %3154 = vmatprep.mubr.f32.mxu1 %v12219_v8 }
 0x210   :  { %12305 = vst [vmem:[#allocation154_spill] sm:$0xff] %v10654_v6 }
 0x211   :  { %7632 = vmatpush1.bf16.msra.mxu0 %v12249_v9  ;;  %7728 = vmatpush1.bf16.msra.mxu1 %v12250_v33 }
 0x212   :  { %7634 = vmatprep.subr.bf16.mxu0 %v12251_v37  ;;  %7730 = vmatprep.subr.bf16.mxu1 %v12252_v25 }
 0x215   :  { %7636 = vmatpush1.bf16.msra.mxu0 %v12253_v29  ;;  %7732 = vmatpush1.bf16.msra.mxu1 %v12254_v50 }
 0x216   :  { %7638 = vmatprep.subr.bf16.mxu0 %v12255_v58  ;;  %7734 = vmatprep.subr.bf16.mxu1 %v12256_v7  ;;  %v8358_v7 = vld [vmem:[%s11499_s0] sm:$0xf] }
 0x219   :  { %7640 = vmatpush1.bf16.msra.mxu0 %v12257_v57  ;;  %7736 = vmatpush1.bf16.msra.mxu1 %v12258_v22 }
 0x21a   :  { %7770 = vmatprep.subr.bf16.mxu1 %v12271_v45  ;;  %7738 = vmatprep.subr.bf16.mxu0 %v12272_v60 }
 0x21c   :  { %2509 = vmatmul.mubr.f32.vlgmr.msra.gmra.mrb[12].mxu0 %v10485_v51  ;;  %3156 = vmatmul.mubr.f32.vlgmr.msra.gmra.mrb[12].mxu1 %v10485_v51  ;;  %v12283_v51 = vld [vmem:[#allocation24_spill] sm:$0xff] }
 0x21d   :  { %7772 = vmatpush3.bf16.msra.mxu1 %v12273_v41  ;;  %7740 = vmatpush3.bf16.msra.mxu0 %v12274_v44 }
 0x21e   :  { %7774 = vmatprep.subr.bf16.mxu1 %v12275_v13  ;;  %7742 = vmatprep.subr.bf16.mxu0 %v12276_v35  ;;  %v12309_v13 = vld [vmem:[#allocation39_spill] sm:$0xff] }
 0x221   :  { %7776 = vmatpush3.bf16.msra.mxu1 %v12277_v54  ;;  %7744 = vmatpush3.bf16.msra.mxu0 %v12278_v43  ;;  %v12310_v54 = vld [vmem:[#allocation40_spill] sm:$0xff] }
 0x222   :  { %7778 = vmatprep.subr.bf16.mxu1 %v12279_v31  ;;  %7746 = vmatprep.subr.bf16.mxu0 %v12280_v52  ;;  %v12311_v31 = vld [vmem:[#allocation42_spill] sm:$0xff] }
 0x225   :  { %7780 = vmatpush3.bf16.msra.mxu1 %v12281_v21  ;;  %7748 = vmatpush3.bf16.msra.mxu0 %v12282_v46  ;;  %v12312_v21 = vld [vmem:[#allocation43_spill] sm:$0xff] }
 0x226   :  { %7782 = vmatprep.subr.bf16.mxu1 %v12283_v51  ;;  %7750 = vmatprep.subr.bf16.mxu0 %v12284_v24  ;;  %v12313_v51 = vld [vmem:[#allocation45_spill] sm:$0xff] }
 0x229   :  { %7784 = vmatpush3.bf16.msra.mxu1 %v12285_v2  ;;  %7752 = vmatpush3.bf16.msra.mxu0 %v12286_v63  ;;  %v12314_v2 = vld [vmem:[#allocation58_spill] sm:$0xff] }
 0x22a   :  { %7786 = vmatprep.subr.bf16.mxu1 %v12287_v16  ;;  %7754 = vmatprep.subr.bf16.mxu0 %v12288_v26  ;;  %v12315_v16 = vld [vmem:[#allocation61_spill] sm:$0xff] }
 0x22d   :  { %7788 = vmatpush3.bf16.msra.mxu1 %v12289_v48  ;;  %7756 = vmatpush3.bf16.msra.mxu0 %v12290_v49  ;;  %v12316_v48 = vld [vmem:[#allocation62_spill] sm:$0xff] }
 0x22e   :  { %7790 = vmatprep.subr.bf16.mxu1 %v12291_v36  ;;  %7758 = vmatprep.subr.bf16.mxu0 %v12292_v5  ;;  %v12317_v36 = vld [vmem:[#allocation63_spill] sm:$0xff] }
 0x231   :  { %7792 = vmatpush3.bf16.msra.mxu1 %v12293_v42  ;;  %7760 = vmatpush3.bf16.msra.mxu0 %v12294_v11  ;;  %v12318_v42 = vld [vmem:[#allocation64_spill] sm:$0xff] }
 0x232   :  { %7794 = vmatprep.subr.bf16.mxu1 %v12295_v0  ;;  %7762 = vmatprep.subr.bf16.mxu0 %v12296_v61  ;;  %v12319_v0 = vld [vmem:[#allocation65_spill] sm:$0xff] }
 0x235   :  { %7796 = vmatpush3.bf16.msra.mxu1 %v12297_v12  ;;  %7764 = vmatpush3.bf16.msra.mxu0 %v12298_v19  ;;  %v12320_v12 = vld [vmem:[#allocation66_spill] sm:$0xff] }
 0x236   :  { %7798 = vmatprep.subr.bf16.mxu1 %v12299_v62  ;;  %7766 = vmatprep.subr.bf16.mxu0 %v12300_v59  ;;  %v12321_v62 = vld [vmem:[#allocation67_spill] sm:$0xff] }
 0x239   :  { %7800 = vmatpush3.bf16.msra.mxu1 %v12301_v3  ;;  %7768 = vmatpush3.bf16.msra.mxu0 %v12302_v1  ;;  %v12322_v3 = vld [vmem:[#allocation68_spill] sm:$0xff] }
 0x23a   :  { %7834 = vmatprep.subr.bf16.mxu1 %v12272_v60  ;;  %7802 = vmatprep.subr.bf16.mxu0 %v12303_v53  ;;  %v12323_v53 = vld [vmem:[#allocation69_spill] sm:$0xff] }
 0x2ef   :  { %v2510_v23 = vpop.f32.mrb[12].mxu0  ;;  %v3157_v40 = vpop.f32.mrb[12].mxu1 }
 0x2f0   :  { %v2512_v14 = vpop.f32.mrb[13].mxu0  ;;  %v3159_v9 = vpop.f32.mrb[13].mxu1 }
 0x2f1   :  { %v3166_v33 = vcombine.low %v2510_v23, %v2512_v14  ;;  %v3167_v37 = vcombine.low %v3157_v40, %v3159_v9  ;;  %v12334_v23 = vld [vmem:[#allocation55_spill] sm:$0xff]  ;;  %v12336_v40 = vld [vmem:[#allocation57_spill] sm:$0xff]  ;;  %v12339_v9 = vld [vmem:[#allocation60_spill] sm:$0xff] }
 0x2f2   :  { %v12338_v14 = vld [vmem:[#allocation79_spill] sm:$0xff] }
 0x2f3   :  { %v3174_v25 = vrot.slane %v3166_v33, %v10654_v6  ;;  %v3181_v29 = vrot.slane %v3167_v37, %v10654_v6  ;;  %v12342_v33 = vld [vmem:[#allocation84_spill] sm:$0xff] }
 0x2f5   :  { %v3182_v50 = vcombine.low %v3174_v25, %v3181_v29  ;;  %v12343_v25 = vld [vmem:[#allocation72_spill] sm:$0xff]  ;;  %v12345_v29 = vld [vmem:[#allocation73_spill] sm:$0xff] }
 0x2f7   :  { %v3189_v58 = vrot.slane %v3182_v50, %v10654_v6  ;;  %v12346_v50 = vld [vmem:[#allocation91_spill] sm:$0xff] }
 0x2f9   :  { %v10662_v57 = vsub.f32 %v8358_v7, %v3189_v58  ;;  %v12347_v7 = vld [vmem:[#allocation74_spill] sm:$0xff] }
 0x2fb   :  { %12306 = vst [vmem:[#allocation155_spill] sm:$0xff] %v10662_v57  ;;  %v10666_v22 = vmul.f32 %v10662_v57, %v10662_v57 }
 0x2fd   :  { %v3201_v47 = vrot.slane %v10666_v22, %v12307_v20  ;;  %v3197_v27 = vrot.slane %v10666_v22, %v12308_v15  ;;  %v12348_v20 = vld [vmem:[#allocation95_spill] sm:$0xff]  ;;  %v12350_v15 = vld [vmem:[#allocation96_spill] sm:$0xff] }
 0x2ff   :  { %v3310_v10 = vand.u32 4294901760, %v3201_v47  ;;  %v10674_v4 = vand.u32 4294901760, %v3197_v27 }
 0x301   :  { %3551 = vmatprep.mubr.f32.mxu1 %v3310_v10  ;;  %v3317_v17 = vsub.f32 %v3197_v27, %v10674_v4  ;;  %v3311_v32 = vsub.f32 %v3201_v47, %v3310_v10  ;;  %v12349_v47 = vld [vmem:[#allocation32_spill] sm:$0xff] }
 0x302   :  { %3553 = vmatmul.mubr.f32.vlgmr.msra.gmra.mrb[14].mxu1 %v10674_v4  ;;  %v12351_v27 = vld [vmem:[#allocation76_spill] sm:$0xff] }
 0x303   :  { %7836 = vmatpush3.bf16.msra.mxu1 %v12274_v44  ;;  %v3312_v30 = vand.u32 4294901760, %v3311_v32  ;;  %v3318_v18 = vand.u32 4294901760, %v3317_v17 }
 0x304   :  { %7838 = vmatprep.subr.bf16.mxu1 %v12276_v35 }
 0x305   :  { %3795 = vmatprep.mubr.f32.mxu1 %v3312_v30  ;;  %v3313_v28 = vsub.f32 %v3311_v32, %v3312_v30  ;;  %v3319_v34 = vsub.f32 %v3317_v17, %v3318_v18  ;;  %v12355_v30 = vld [vmem:[#allocation80_spill] sm:$0xff] }
 0x307   :  { %7840 = vmatpush3.bf16.msra.mxu1 %v12278_v43  ;;  %v3314_v45 = vand.u32 4294901760, %v3313_v28  ;;  %v3320_v41 = vand.u32 4294901760, %v3319_v34  ;;  %v12358_v28 = vsub.s32 2, %v12304_v55 }
 0x308   :  { %7842 = vmatprep.subr.bf16.mxu1 %v12280_v52 }
 0x309   :  { %3315 = vmatprep.mubr.f32.mxu0 %v3314_v45  ;;  %v3205_v34 = vrot.slane %v10666_v22, %v12358_v28  ;;  %v12359_v45 = vld [vmem:[#allocation102_spill] sm:$0xff] }
 0x30a   :  { %3321 = vmatmul.mubr.f32.vlgmr.msra.gmra.mrb[14].mxu0 %v3320_v41  ;;  %v12360_v41 = vld [vmem:[#allocation83_spill] sm:$0xff] }
 0x30b   :  { %7804 = vmatpush3.bf16.msra.mxu0 %v12309_v13  ;;  %7844 = vmatpush3.bf16.msra.mxu1 %v12282_v46  ;;  %v12361_v13 = vld [vmem:[#allocation104_spill] sm:$0xff] }
 0x30c   :  { %3688 = vmatprep.mubr.f32.mxu0 %v3311_v32  ;;  %7806 = vmatprep.subr.bf16.mxu0 %v12310_v54  ;;  %v12354_v32 = vld [vmem:[#allocation98_spill] sm:$0xff]  ;;  %v12362_v54 = vld [vmem:[#allocation87_spill] sm:$0xff] }
 0x30d   :  { %7846 = vmatprep.subr.bf16.mxu1 %v12284_v24 }
 0x30f   :  { %7808 = vmatpush3.bf16.msra.mxu0 %v12311_v31  ;;  %7848 = vmatpush3.bf16.msra.mxu1 %v12286_v63  ;;  %v10773_v31 = vand.u32 4294901760, %v3205_v34 }
 0x310   :  { %7810 = vmatprep.subr.bf16.mxu0 %v12312_v21  ;;  %7850 = vmatprep.subr.bf16.mxu1 %v12288_v26  ;;  %v12363_v21 = vld [vmem:[#allocation106_spill] sm:$0xff] }
 0x313   :  { %7812 = vmatpush3.bf16.msra.mxu0 %v12313_v51  ;;  %7852 = vmatpush3.bf16.msra.mxu1 %v12290_v49  ;;  %v12364_v51 = vld [vmem:[#allocation88_spill] sm:$0xff] }
 0x314   :  { %7814 = vmatprep.subr.bf16.mxu0 %v12314_v2  ;;  %7854 = vmatprep.subr.bf16.mxu1 %v12292_v5  ;;  %v12365_v2 = vld [vmem:[#allocation108_spill] sm:$0xff] }
 0x317   :  { %7816 = vmatpush3.bf16.msra.mxu0 %v12315_v16  ;;  %7856 = vmatpush3.bf16.msra.mxu1 %v12294_v11  ;;  %v12366_v16 = vld [vmem:[#allocation90_spill] sm:$0xff] }
 0x318   :  { %7818 = vmatprep.subr.bf16.mxu0 %v12316_v48  ;;  %7858 = vmatprep.subr.bf16.mxu1 %v12296_v61  ;;  %v12368_v48 = vld [vmem:[#allocation93_spill] sm:$0xff] }
 0x31b   :  { %7820 = vmatpush3.bf16.msra.mxu0 %v12317_v36  ;;  %7860 = vmatpush3.bf16.msra.mxu1 %v12298_v19  ;;  %v12369_v36 = vld [vmem:[#allocation70_spill] sm:$0xff] }
 0x31c   :  { %7822 = vmatprep.subr.bf16.mxu0 %v12318_v42  ;;  %7862 = vmatprep.subr.bf16.mxu1 %v12300_v59  ;;  %v12370_v42 = vld [vmem:[#allocation99_spill] sm:$0xff] }
 0x31f   :  { %7824 = vmatpush3.bf16.msra.mxu0 %v12319_v0  ;;  %7864 = vmatpush3.bf16.msra.mxu1 %v12302_v1 }
 0x320   :  { %7826 = vmatprep.subr.bf16.mxu0 %v12320_v12  ;;  %7898 = vmatprep.subr.bf16.mxu1 %v12272_v60  ;;  %v12325_v60 = vld [vmem:[#allocation47_spill] sm:$0xff]  ;;  %v12371_v12 = vld [vmem:[#allocation100_spill] sm:$0xff] }
 0x322   :  { %3799 = vmatmul.mubr.f32.vlgmr.msra.gmra.mrb[16].mxu1 %v3318_v18  ;;  %v12357_v18 = vld [vmem:[#allocation81_spill] sm:$0xff] }
 0x323   :  { %7828 = vmatpush3.bf16.msra.mxu0 %v12321_v62  ;;  %7900 = vmatpush3.bf16.msra.mxu1 %v12274_v44  ;;  %v12326_v44 = vld [vmem:[#allocation48_spill] sm:$0xff] }
 0x324   :  { %4069 = vmatprep.mubr.f32.mxu1 %v3310_v10  ;;  %7830 = vmatprep.subr.bf16.mxu0 %v12322_v3  ;;  %v12372_v3 = vld [vmem:[#allocation103_spill] sm:$0xff] }
 0x325   :  { %7902 = vmatprep.subr.bf16.mxu1 %v12276_v35  ;;  %v12328_v35 = vld [vmem:[#allocation50_spill] sm:$0xff] }
 0x327   :  { %7832 = vmatpush3.bf16.msra.mxu0 %v12323_v53  ;;  %7904 = vmatpush3.bf16.msra.mxu1 %v12278_v43  ;;  %v12329_v43 = vld [vmem:[#allocation51_spill] sm:$0xff]  ;;  %v12373_v53 = vld [vmem:[#allocation105_spill] sm:$0xff] }
 0x328   :  { %7866 = vmatprep.subr.bf16.mxu0 %v12324_v39  ;;  %7906 = vmatprep.subr.bf16.mxu1 %v12280_v52  ;;  %v12330_v52 = vld [vmem:[#allocation52_spill] sm:$0xff] }
 0x32a   :  { %3691 = vmatmul.mubr.f32.vlgmr.msra.gmra.mrb[16].mxu0 %v3317_v17  ;;  %v12353_v17 = vld [vmem:[#allocation77_spill] sm:$0xff] }
 0x32b   :  { %7868 = vmatpush3.bf16.msra.mxu0 %v12325_v60  ;;  %3965 = vmatprep.mubr.f32.mxu0 %v3310_v10  ;;  %v12352_v10 = vld [vmem:[#allocation97_spill] sm:$0xff]  ;;  %v12374_v60 = vld [vmem:[#allocation107_spill] sm:$0xff] }
 0x32c   :  { %7908 = vmatpush3.bf16.msra.mxu1 %v12282_v46  ;;  %7870 = vmatprep.subr.bf16.mxu0 %v12326_v44  ;;  %v12331_v46 = vsub.s32 3, %v12304_v55  ;;  %v4179_v55 = vsub.f32 %v3205_v34, %v10773_v31  ;;  %v12375_v44 = vld [vmem:[#allocation109_spill] sm:$0xff] }
 0x32d   :  { %7910 = vmatprep.subr.bf16.mxu1 %v12284_v24 }
 0x32e   :  { %v3209_v24 = vrot.slane %v10666_v22, %v12331_v46  ;;  %v12367_v22 = vld [vmem:[#allocation110_spill] sm:$0xff]  ;;  %v4180_v0 = vand.u32 4294901760, %v4179_v55  ;;  %v12380_v46 = vld [vmem:[#allocation113_spill] sm:$0xff] }
 0x32f   :  { %7872 = vmatpush3.bf16.msra.mxu0 %v12327_v38  ;;  %v12376_v38 = vld [vmem:[#allocation36_spill] sm:$0xff] }
 0x330   :  { %7912 = vmatpush3.bf16.msra.mxu1 %v12286_v63  ;;  %7874 = vmatprep.subr.bf16.mxu0 %v12328_v35  ;;  %v12333_v63 = vld [vmem:[#allocation54_spill] sm:$0xff]  ;;  %v4181_v62 = vsub.f32 %v4179_v55, %v4180_v0  ;;  %v12377_v35 = vld [vmem:[#allocation111_spill] sm:$0xff] }
 0x331   :  { %7914 = vmatprep.subr.bf16.mxu1 %v12288_v26  ;;  %v10733_v26 = vand.u32 4294901760, %v3209_v24 }
 0x332   :  { %v4182_v39 = vand.u32 4294901760, %v4181_v62 }
 0x333   :  { %7876 = vmatpush3.bf16.msra.mxu0 %v12329_v43  ;;  %v12378_v43 = vld [vmem:[#allocation112_spill] sm:$0xff] }
 0x334   :  { %7916 = vmatpush3.bf16.msra.mxu1 %v12290_v49  ;;  %7878 = vmatprep.subr.bf16.mxu0 %v12330_v52  ;;  %v12335_v49 = vld [vmem:[#allocation56_spill] sm:$0xff]  ;;  %v12379_v52 = vld [vmem:[#allocation78_spill] sm:$0xff] }
 0x335   :  { %7918 = vmatprep.subr.bf16.mxu1 %v12292_v5  ;;  %v4173_v5 = vsub.f32 %v3209_v24, %v10733_v26  ;;  %v12381_v24 = vld [vmem:[#allocation85_spill] sm:$0xff] }
 0x337   :  { %7880 = vmatpush3.bf16.msra.mxu0 %v12332_v56  ;;  %v12382_v56 = vld [vmem:[#allocation86_spill] sm:$0xff] }
 0x338   :  { %7920 = vmatpush3.bf16.msra.mxu1 %v12294_v11  ;;  %7882 = vmatprep.subr.bf16.mxu0 %v12333_v63  ;;  %v12337_v11 = vld [vmem:[#allocation59_spill] sm:$0xff]  ;;  %v12383_v63 = vld [vmem:[#allocation114_spill] sm:$0xff] }
 0x339   :  { %7922 = vmatprep.subr.bf16.mxu1 %v12296_v61  ;;  %v4174_v61 = vand.u32 4294901760, %v4173_v5 }
 0x33b   :  { %7884 = vmatpush3.bf16.msra.mxu0 %v12334_v23  ;;  %v4175_v37 = vsub.f32 %v4173_v5, %v4174_v61  ;;  %v12384_v23 = vld [vmem:[#allocation92_spill] sm:$0xff] }
 0x33c   :  { %7924 = vmatpush3.bf16.msra.mxu1 %v12298_v19  ;;  %7886 = vmatprep.subr.bf16.mxu0 %v12335_v49  ;;  %v12340_v19 = vld [vmem:[#allocation82_spill] sm:$0xff] }
 0x33d   :  { %7926 = vmatprep.subr.bf16.mxu1 %v12300_v59  ;;  %v12341_v59 = vld [vmem:[#allocation71_spill] sm:$0xff]  ;;  %v4176_v58 = vand.u32 4294901760, %v4175_v37  ;;  %v12385_v49 = vld [vmem:[#allocation94_spill] sm:$0xff] }
 0x33e   :  { %v12395_v37 = vld [vmem:[#allocation75_spill] sm:$0xff] }
 0x33f   :  { %7888 = vmatpush3.bf16.msra.mxu0 %v12336_v40  ;;  %v12387_v40 = vld [vmem:[#allocation116_spill] sm:$0xff] }
 0x340   :  { %7928 = vmatpush3.bf16.msra.mxu1 %v12302_v1  ;;  %7890 = vmatprep.subr.bf16.mxu0 %v12337_v11  ;;  %v12344_v1 = vld [vmem:[#allocation89_spill] sm:$0xff] }
 0x341   :  { %7962 = vmatprep.subr.bf16.mxu1 %v12338_v14  ;;  %v12388_v11 = vld [vmem:[#allocation117_spill] sm:$0xff]  ;;  %v12389_v14 = vld [vmem:[#allocation118_spill] sm:$0xff] }
 0x343   :  { %4071 = vmatmul.mubr.f32.vlgmr.msra.gmra.mrb[18].mxu1 %v10674_v4  ;;  %7892 = vmatpush3.bf16.msra.mxu0 %v12339_v9  ;;  %v12391_v9 = vld [vmem:[#allocation120_spill] sm:$0xff] }
 0x344   :  { %7964 = vmatpush3.bf16.msra.mxu1 %v12340_v19  ;;  %4413 = vmatprep.mubr.f32.mxu1 %v10733_v26  ;;  %v12392_v19 = vld [vmem:[#allocation121_spill] sm:$0xff] }
 0x345   :  { %7894 = vmatprep.subr.bf16.mxu0 %v12341_v59  ;;  %7966 = vmatprep.subr.bf16.mxu1 %v12342_v33  ;;  %v12393_v59 = vld [vmem:[#allocation122_spill] sm:$0xff]  ;;  %v12394_v33 = vld [vmem:[#allocation123_spill] sm:$0xff] }
 0x347   :  { %7896 = vmatpush3.bf16.msra.mxu0 %v12343_v25  ;;  %v12396_v25 = vld [vmem:[#allocation124_spill] sm:$0xff] }
 0x348   :  { %7968 = vmatpush3.bf16.msra.mxu1 %v12344_v1  ;;  %7930 = vmatprep.subr.bf16.mxu0 %v12345_v29  ;;  %v12398_v1 = vld [vmem:[#allocation126_spill] sm:$0xff] }
 0x349   :  { %7970 = vmatprep.subr.bf16.mxu1 %v12346_v50  ;;  %v12400_v50 = vld [vmem:[#allocation128_spill] sm:$0xff] }
 0x34a   :  { %3967 = vmatmul.mubr.f32.vlgmr.msra.gmra.mrb[18].mxu0 %v10674_v4  ;;  %v12356_v4 = vld [vmem:[#allocation101_spill] sm:$0xff] }
 0x34b   :  { %7932 = vmatpush3.bf16.msra.mxu0 %v12347_v7  ;;  %4177 = vmatprep.mubr.f32.mxu0 %v4176_v58  ;;  %v12401_v58 = vld [vmem:[#allocation129_spill] sm:$0xff] }
 0x34c   :  { %7972 = vmatpush3.bf16.msra.mxu1 %v12348_v20  ;;  %7934 = vmatprep.subr.bf16.mxu0 %v12349_v47  ;;  %v12403_v20 = vld [vmem:[#allocation131_spill] sm:$0xff] }
 0x34d   :  { %7974 = vmatprep.subr.bf16.mxu1 %v12350_v15  ;;  %v12405_v15 = vld [vmem:[#allocation133_spill] sm:$0xff] }
 0x34f   :  { %7936 = vmatpush3.bf16.msra.mxu0 %v12351_v27 }
 0x350   :  { %7976 = vmatpush3.bf16.msra.mxu1 %v12352_v10  ;;  %7938 = vmatprep.subr.bf16.mxu0 %v12353_v17 }
 0x351   :  { %7978 = vmatprep.subr.bf16.mxu1 %v12354_v32 }
 0x353   :  { %7940 = vmatpush3.bf16.msra.mxu0 %v12355_v30 }
 0x354   :  { %7980 = vmatpush3.bf16.msra.mxu1 %v12356_v4  ;;  %7942 = vmatprep.subr.bf16.mxu0 %v12357_v18 }
 0x355   :  { %7982 = vmatprep.subr.bf16.mxu1 %v12359_v45 }
 0x357   :  { %7944 = vmatpush3.bf16.msra.mxu0 %v12360_v41 }
 0x358   :  { %7984 = vmatpush3.bf16.msra.mxu1 %v12361_v13  ;;  %7946 = vmatprep.subr.bf16.mxu0 %v12362_v54 }
 0x359   :  { %7986 = vmatprep.subr.bf16.mxu1 %v12363_v21 }
 0x35b   :  { %7948 = vmatpush3.bf16.msra.mxu0 %v12364_v51 }
 0x35c   :  { %7988 = vmatpush3.bf16.msra.mxu1 %v12365_v2  ;;  %7950 = vmatprep.subr.bf16.mxu0 %v12366_v16  ;;  %v4946_v2 = vld [vmem:[%s11502_s3 + $0x28] sm:$0xff] }
 0x35d   :  { %7990 = vmatprep.subr.bf16.mxu1 %v12367_v22  ;;  %v4980_v22 = vand.u32 4294901760, %v4946_v2 }
 0x35f   :  { %7952 = vmatpush3.bf16.msra.mxu0 %v12368_v48 }
 0x360   :  { %7992 = vmatpush3.bf16.msra.mxu1 %v12369_v36  ;;  %7954 = vmatprep.subr.bf16.mxu0 %v12370_v42 }
 0x361   :  { %8026 = vmatprep.subr.bf16.mxu1 %v12345_v29 }
 0x363   :  { %4415 = vmatmul.mubr.f32.vlgmr.msra.gmra.mrb[20].mxu1 %v10773_v31  ;;  %7956 = vmatpush3.bf16.msra.mxu0 %v12371_v12 }
 0x364   :  { %8028 = vmatpush3.bf16.msra.mxu1 %v12347_v7  ;;  %4657 = vmatprep.mubr.f32.mxu1 %v4174_v61  ;;  %v12390_v61 = vld [vmem:[#allocation119_spill] sm:$0xff] }
 0x365   :  { %7958 = vmatprep.subr.bf16.mxu0 %v12372_v3  ;;  %8030 = vmatprep.subr.bf16.mxu1 %v12349_v47 }
 0x367   :  { %7960 = vmatpush3.bf16.msra.mxu0 %v12373_v53 }
 0x368   :  { %8032 = vmatpush3.bf16.msra.mxu1 %v12351_v27  ;;  %7994 = vmatprep.subr.bf16.mxu0 %v12374_v60  ;;  %v4950_v60 = vld [vmem:[%s11502_s3 + $0x48] sm:$0xff] }
 0x369   :  { %8034 = vmatprep.subr.bf16.mxu1 %v12353_v17 }
 0x36a   :  { %4183 = vmatmul.mubr.f32.vlgmr.msra.gmra.mrb[20].mxu0 %v4182_v39  ;;  %v4947_v39 = vld [vmem:[%s11502_s3 + $0x30] sm:$0xff] }
 0x36b   :  { %7996 = vmatpush3.bf16.msra.mxu0 %v12375_v44  ;;  %4550 = vmatprep.mubr.f32.mxu0 %v4173_v5  ;;  %v12386_v5 = vld [vmem:[#allocation115_spill] sm:$0xff] }
 0x36c   :  { %8036 = vmatpush3.bf16.msra.mxu1 %v12355_v30  ;;  %7998 = vmatprep.subr.bf16.mxu0 %v12376_v38 }
 0x36d   :  { %8038 = vmatprep.subr.bf16.mxu1 %v12357_v18 }
 0x36f   :  { %8000 = vmatpush3.bf16.msra.mxu0 %v12377_v35  ;;  %v10891_v35 = vsub.f32 %v4946_v2, %v4980_v22 }
 0x370   :  { %8040 = vmatpush3.bf16.msra.mxu1 %v12360_v41  ;;  %8002 = vmatprep.subr.bf16.mxu0 %v12378_v43 }
 0x371   :  { %8042 = vmatprep.subr.bf16.mxu1 %v12362_v54 }
 0x373   :  { %8004 = vmatpush3.bf16.msra.mxu0 %v12379_v52  ;;  %v4954_v52 = vld [vmem:[%s11502_s3 + $0x68] sm:$0xff] }
 0x374   :  { %8044 = vmatpush3.bf16.msra.mxu1 %v12364_v51  ;;  %8006 = vmatprep.subr.bf16.mxu0 %v12380_v46  ;;  %v4952_v46 = vld [vmem:[%s11502_s3 + $0x58] sm:$0xff] }
 0x375   :  { %8046 = vmatprep.subr.bf16.mxu1 %v12366_v16 }
 0x377   :  { %8008 = vmatpush3.bf16.msra.mxu0 %v12381_v24  ;;  %v4956_v24 = vld [vmem:[%s11502_s3 + $0x78] sm:$0xff] }
 0x378   :  { %8048 = vmatpush3.bf16.msra.mxu1 %v12368_v48  ;;  %8010 = vmatprep.subr.bf16.mxu0 %v12382_v56 }
 0x379   :  { %8050 = vmatprep.subr.bf16.mxu1 %v12370_v42 }
 0x37b   :  { %8012 = vmatpush3.bf16.msra.mxu0 %v12383_v63 }
 0x37c   :  { %8052 = vmatpush3.bf16.msra.mxu1 %v12371_v12  ;;  %8014 = vmatprep.subr.bf16.mxu0 %v12384_v23 }
 0x37d   :  { %8054 = vmatprep.subr.bf16.mxu1 %v12372_v3 }
 0x37f   :  { %8016 = vmatpush3.bf16.msra.mxu0 %v12385_v49 }
 0x380   :  { %8056 = vmatpush3.bf16.msra.mxu1 %v12373_v53  ;;  %8018 = vmatprep.subr.bf16.mxu0 %v12386_v5  ;;  %v4949_v5 = vld [vmem:[%s11502_s3 + $0x40] sm:$0xff] }
 0x381   :  { %8090 = vmatprep.subr.bf16.mxu1 %v12345_v29  ;;  %v12399_v29 = vld [vmem:[#allocation127_spill] sm:$0xff] }
 0x383   :  { %4661 = vmatmul.mubr.f32.vlgmr.msra.gmra.mrb[22].mxu1 %v4180_v0  ;;  %8020 = vmatpush3.bf16.msra.mxu0 %v12387_v40  ;;  %v4945_v0 = vld [vmem:[%s11502_s3 + $0x20] sm:$0xff] }
 0x384   :  { %8092 = vmatpush3.bf16.msra.mxu1 %v12347_v7  ;;  %4931 = vmatprep.mubr.f32.mxu1 %v10733_v26  ;;  %v12402_v7 = vld [vmem:[#allocation130_spill] sm:$0xff] }
 0x385   :  { %8022 = vmatprep.subr.bf16.mxu0 %v12388_v11  ;;  %8094 = vmatprep.subr.bf16.mxu1 %v12349_v47  ;;  %v12404_v47 = vld [vmem:[#allocation132_spill] sm:$0xff] }
 0x387   :  { %8024 = vmatpush3.bf16.msra.mxu0 %v12389_v14  ;;  %v5629_v14 = vand.u32 4294901760, %v4947_v39 }
 0x388   :  { %8096 = vmatpush3.bf16.msra.mxu1 %v12351_v27  ;;  %8058 = vmatprep.subr.bf16.mxu0 %v12390_v61  ;;  %v4984_v61 = vand.u32 4294901760, %v4950_v60 }
 0x389   :  { %8098 = vmatprep.subr.bf16.mxu1 %v12353_v17 }
 0x38a   :  { %4553 = vmatmul.mubr.f32.vlgmr.msra.gmra.mrb[22].mxu0 %v4179_v55 }
 0x38b   :  { %8060 = vmatpush3.bf16.msra.mxu0 %v12391_v9  ;;  %4827 = vmatprep.mubr.f32.mxu0 %v10733_v26  ;;  %v12397_v26 = vld [vmem:[#allocation125_spill] sm:$0xff] }
 0x38c   :  { %8100 = vmatpush3.bf16.msra.mxu1 %v12355_v30  ;;  %8062 = vmatprep.subr.bf16.mxu0 %v12392_v19  ;;  %v4953_v9 = vld [vmem:[%s11502_s3 + $0x60] sm:$0xff]  ;;  %v4988_v19 = vand.u32 4294901760, %v4954_v52 }
 0x38d   :  { %8102 = vmatprep.subr.bf16.mxu1 %v12357_v18 }
 0x38f   :  { %8064 = vmatpush3.bf16.msra.mxu0 %v12393_v59  ;;  %v5631_v59 = vand.u32 4294901760, %v4952_v46 }
 0x390   :  { %8104 = vmatpush3.bf16.msra.mxu1 %v12360_v41  ;;  %8066 = vmatprep.subr.bf16.mxu0 %v12394_v33  ;;  %v5635_v33 = vand.u32 4294901760, %v4956_v24 }
 0x391   :  { %8106 = vmatprep.subr.bf16.mxu1 %v12362_v54 }
 0x393   :  { %8068 = vmatpush3.bf16.msra.mxu0 %v12395_v37  ;;  %v4986_v37 = vand.u32 4294901760, %v4949_v5 }
 0x394   :  { %8108 = vmatpush3.bf16.msra.mxu1 %v12364_v51  ;;  %8070 = vmatprep.subr.bf16.mxu0 %v12396_v25  ;;  %v4951_v25 = vld [vmem:[%s11502_s3 + $0x50] sm:$0xff] }
 0x395   :  { %8110 = vmatprep.subr.bf16.mxu1 %v12366_v16  ;;  %v4944_v16 = vld [vmem:[%s11502_s3 + $0x18] sm:$0xff] }
 0x396   :  { %v5623_v36 = vand.u32 4294901760, %v4944_v16 }
 0x397   :  { %8072 = vmatpush3.bf16.msra.mxu0 %v12397_v26  ;;  %v4955_v26 = vld [vmem:[%s11502_s3 + $0x70] sm:$0xff] }
 0x398   :  { %8112 = vmatpush3.bf16.msra.mxu1 %v12368_v48  ;;  %8074 = vmatprep.subr.bf16.mxu0 %v12398_v1  ;;  %v4948_v48 = vld [vmem:[%s11502_s3 + $0x38] sm:$0xff]  ;;  %v10893_v43 = vsub.f32 %v4944_v16, %v5623_v36 }
 0x399   :  { %8114 = vmatprep.subr.bf16.mxu1 %v12370_v42  ;;  %v4941_v42 = vld [vmem:[%s11502_s3] sm:$0xff] }
 0x39a   :  { %v4978_v62 = vand.u32 4294901760, %v4941_v42 }
 0x39b   :  { %8076 = vmatpush3.bf16.msra.mxu0 %v12399_v29 }
 0x39c   :  { %8116 = vmatpush3.bf16.msra.mxu1 %v12371_v12  ;;  %8078 = vmatprep.subr.bf16.mxu0 %v12400_v50  ;;  %v5627_v12 = vand.u32 4294901760, %v4948_v48  ;;  %v10910_v49 = vsub.f32 %v4941_v42, %v4978_v62  ;;  %v10933_v50 = vsub.f32 %v4947_v39, %v5629_v14 }
 0x39d   :  { %8118 = vmatprep.subr.bf16.mxu1 %v12372_v3  ;;  %v4982_v3 = vand.u32 4294901760, %v4945_v0 }
 0x39e   :  { %v10904_v56 = vpack.c.bf16 %v5627_v12, %v5623_v36  ;;  %v10906_v63 = vsub.f32 %v4948_v48, %v5627_v12  ;;  %v4963_v48 = vld [vmem:[%s11502_s3 + $0xb0] sm:$0xff] }
 0x39f   :  { %8080 = vmatpush3.bf16.msra.mxu0 %v12401_v58  ;;  %v10908_v23 = vpack.c.bf16 %v4982_v3, %v4978_v62  ;;  %v10916_v40 = vsub.f32 %v4945_v0, %v4982_v3  ;;  %v10935_v58 = vsub.f32 %v4950_v60, %v4984_v61  ;;  %v4966_v62 = vld [vmem:[%s11502_s3 + $0xc8] sm:$0xff] }
 0x3a0   :  { %8120 = vmatpush3.bf16.msra.mxu1 %v12373_v53  ;;  %8082 = vmatprep.subr.bf16.mxu0 %v12402_v7  ;;  %v4943_v53 = vld [vmem:[%s11502_s3 + $0x10] sm:$0xff]  ;;  %12407 = vst [vmem:[#allocation150_spill] sm:$0xff] %v10904_v56  ;;  %v4958_v7 = vld [vmem:[%s11502_s3 + $0x88] sm:$0xff] }
 0x3a1   :  { %12408 = vst [vmem:[#allocation148_spill] sm:$0xff] %v10908_v23  ;;  %v5625_v11 = vand.u32 4294901760, %v4943_v53  ;;  %8218 = vmatprep.subr.bf16.mxu1 %v10904_v56  ;;  %v4970_v3 = vld [vmem:[%s11502_s3 + $0xe8] sm:$0xff] }
 0x3a3   :  { %4933 = vmatmul.mubr.f32.vlgmr.msra.gmra.mrb[24].mxu1 %v10773_v31  ;;  %8084 = vmatpush3.bf16.msra.mxu0 %v12403_v20  ;;  %v10929_v1 = vpack.c.bf16 %v5629_v14, %v5625_v11  ;;  %v10931_v29 = vsub.f32 %v4943_v53, %v5625_v11  ;;  %v4962_v20 = vld [vmem:[%s11502_s3 + $0xa8] sm:$0xff]  ;;  %v4968_v53 = vld [vmem:[%s11502_s3 + $0xd8] sm:$0xff] }
 0x3a4   :  { %8086 = vmatprep.subr.bf16.mxu0 %v12404_v47  ;;  %5703 = vmatprep.mubr.f32.mxu1 %v12219_v8  ;;  %v4960_v47 = vld [vmem:[%s11502_s3 + $0x98] sm:$0xff] }
 0x3a5   :  { %12409 = vst [vmem:[#allocation153_spill] sm:$0xff] %v10929_v1  ;;  %8220 = vmatpush1.bf16.msra.mxu1 %v10929_v1 }
 0x3a7   :  { %8088 = vmatpush3.bf16.msra.mxu0 %v12405_v15  ;;  %v10946_v15 = vpack.c.bf16 %v4988_v19, %v4984_v61 }
 0x3a9   :  { %12410 = vst [vmem:[#allocation151_spill] sm:$0xff] %v10946_v15 }
 0x3aa   :  { %4829 = vmatmul.mubr.f32.vlgmr.msra.gmra.mrb[24].mxu0 %v10773_v31  ;;  %v4942_v31 = vld [vmem:[%s11502_s3 + $0x8] sm:$0xff] }
 0x3ab   :  { %5056 = vmatprep.mubr.f32.mxu0 %v12219_v8  ;;  %v4976_v55 = vand.u32 4294901760, %v4942_v31 }
 0x3ad   :  { %v10887_v44 = vpack.c.bf16 %v4980_v22, %v4976_v55  ;;  %v10889_v38 = vsub.f32 %v4942_v31, %v4976_v55  ;;  %v4961_v55 = vld [vmem:[%s11502_s3 + $0xa0] sm:$0xff]  ;;  %v4959_v22 = vld [vmem:[%s11502_s3 + $0x90] sm:$0xff] }
 0x3ae   :  { %v4998_v14 = vand.u32 4294901760, %v4961_v55  ;;  %v5641_v61 = vand.u32 4294901760, %v4959_v22 }
 0x3af   :  { %12406 = vst [vmem:[#allocation156_spill] sm:$0xff] %v10887_v44  ;;  %8122 = vmatprep.subr.bf16.mxu0 %v10887_v44 }
 0x3b0   :  { %8124 = vmatpush1.bf16.msra.mxu0 %v10908_v23 }
 0x3b1   :  { %8126 = vmatprep.subr.bf16.mxu0 %v10946_v15 }
 0x3d5   :  { %v6808_v27 = vpop.f32.mrb[14].mxu1 }
 0x3d6   :  { %v6809_v10 = vpop.f32.mrb[15].mxu1 }
 0x3d7   :  { %v6810_v17 = vadd.f32 %v6809_v10, %v6808_v27  ;;  %v10948_v27 = vsub.f32 %v4954_v52, %v4988_v19  ;;  %v10950_v10 = vpack.c.bf16 %v5635_v33, %v5631_v59 }
 0x3d9   :  { %12411 = vst [vmem:[#allocation134_spill] sm:$0xff] %v10950_v10  ;;  %8222 = vmatprep.subr.bf16.mxu1 %v10950_v10 }
 0x3dd   :  { %v6773_v32 = vpop.f32.mrb[14].mxu0 }
 0x3de   :  { %v6774_v30 = vpop.f32.mrb[15].mxu0 }
 0x3df   :  { %v6775_v4 = vadd.f32 %v6774_v30, %v6773_v32  ;;  %v4964_v32 = vld [vmem:[%s11502_s3 + $0xb8] sm:$0xff]  ;;  %v10958_v30 = vsub.f32 %v4956_v24, %v5635_v33  ;;  %v5004_v33 = vand.u32 4294901760, %v4970_v3 }
 0x3e0   :  { %v5643_v16 = vand.u32 4294901760, %v4964_v32 }
 0x3e1   :  { %v3555_v18 = vadd.f32 %v6810_v17, %v6775_v4  ;;  %v10952_v17 = vsub.f32 %v4952_v46, %v5631_v59  ;;  %v4990_v4 = vand.u32 4294901760, %v4953_v9  ;;  %v5000_v59 = vand.u32 4294901760, %v4966_v62 }
 0x3e2   :  { %v11006_v24 = vsub.f32 %v4964_v32, %v5643_v16 }
 0x3e3   :  { %v10969_v31 = vsub.f32 %v4953_v9, %v4990_v4  ;;  %v5645_v9 = vand.u32 4294901760, %v4963_v48 }
 0x3e5   :  { %v11023_v32 = vpack.c.bf16 %v5645_v9, %v5641_v61 }
 0x3e7   :  { %12417 = vst [vmem:[#allocation140_spill] sm:$0xff] %v11023_v32 }
 0x3f5   :  { %v6878_v28 = vpop.f32.mrb[16].mxu1 }
 0x3f6   :  { %v6879_v34 = vpop.f32.mrb[17].mxu1 }
 0x3f7   :  { %v6880_v45 = vadd.f32 %v6879_v34, %v6878_v28  ;;  %v5633_v28 = vand.u32 4294901760, %v4951_v25  ;;  %v5637_v34 = vand.u32 4294901760, %v4955_v26 }
 0x3f9   :  { %v10971_v2 = vsub.f32 %v4951_v25, %v5633_v28  ;;  %v10982_v36 = vpack.c.bf16 %v5637_v34, %v5633_v28  ;;  %v10984_v42 = vsub.f32 %v4955_v26, %v5637_v34  ;;  %v5647_v25 = vand.u32 4294901760, %v4968_v53  ;;  %v4965_v26 = vld [vmem:[%s11502_s3 + $0xc0] sm:$0xff]  ;;  %v4967_v28 = vld [vmem:[%s11502_s3 + $0xd0] sm:$0xff] }
 0x3fa   :  { %v4971_v34 = vld [vmem:[%s11502_s3 + $0xf0] sm:$0xff] }
 0x3fb   :  { %12413 = vst [vmem:[#allocation136_spill] sm:$0xff] %v10982_v36  ;;  %8224 = vmatpush1.bf16.msra.mxu1 %v10982_v36 }
 0x3fd   :  { %v6843_v41 = vpop.f32.mrb[16].mxu0 }
 0x3fe   :  { %v6844_v13 = vpop.f32.mrb[17].mxu0 }
 0x3ff   :  { %v6845_v54 = vadd.f32 %v6844_v13, %v6843_v41  ;;  %v4996_v41 = vand.u32 4294901760, %v4962_v20  ;;  %v5639_v13 = vand.u32 4294901760, %v4960_v47 }
 0x401   :  { %v3693_v21 = vadd.f32 %v6845_v54, %v3555_v18  ;;  %v10960_v18 = vsub.f32 %v4949_v5, %v4986_v37  ;;  %v4957_v54 = vld [vmem:[%s11502_s3 + $0x80] sm:$0xff]  ;;  %v11000_v60 = vsub.f32 %v4962_v20, %v4996_v41  ;;  %v11002_v52 = vpack.c.bf16 %v5643_v16, %v5639_v13 }
 0x402   :  { %v11004_v46 = vsub.f32 %v4960_v47, %v5639_v13  ;;  %v4994_v11 = vand.u32 4294901760, %v4957_v54  ;;  %v11021_v47 = vsub.f32 %v4961_v55, %v4998_v14  ;;  %v11038_v13 = vpack.c.bf16 %v5004_v33, %v5000_v59 }
 0x403   :  { %v10858_v51 = vadd.f32 %v6880_v45, %v3693_v21  ;;  %v4992_v45 = vand.u32 4294901760, %v4958_v7  ;;  %v10967_v21 = vpack.c.bf16 %v4990_v4, %v4986_v37  ;;  %12415 = vst [vmem:[#allocation138_spill] sm:$0xff] %v11002_v52  ;;  %8226 = vmatprep.subr.bf16.mxu1 %v11002_v52  ;;  %v4972_v37 = vld [vmem:[%s11502_s3 + $0xf8] sm:$0xff]  ;;  %v4969_v4 = vld [vmem:[%s11502_s3 + $0xe0] sm:$0xff]  ;;  %v11044_v16 = vsub.f32 %v4970_v3, %v5004_v33 }
 0x404   :  { %v11019_v20 = vsub.f32 %v4957_v54, %v4994_v11  ;;  %12418 = vst [vmem:[#allocation141_spill] sm:$0xff] %v11038_v13  ;;  %v11040_v54 = vsub.f32 %v4966_v62, %v5000_v59  ;;  %8228 = vmatpush1.bf16.msra.mxu1 %v11023_v32  ;;  %v5651_v55 = vand.u32 4294901760, %v4972_v37  ;;  %v11813_v3 = vand.u32 4294901760, %v10891_v35 }
 0x405   :  { %12412 = vst [vmem:[#allocation135_spill] sm:$0xff] %v10967_v21  ;;  %v10986_v0 = vpack.c.bf16 %v4996_v41, %v4992_v45  ;;  %v10988_v12 = vsub.f32 %v4958_v7, %v4992_v45  ;;  %8128 = vmatpush1.bf16.msra.mxu0 %v10967_v21  ;;  %v11017_v7 = vpack.c.bf16 %v4998_v14, %v4994_v11  ;;  %v5649_v11 = vand.u32 4294901760, %v4967_v28 }
 0x406   :  { %v11034_v45 = vsub.f32 %v4959_v22, %v5641_v61  ;;  %v11036_v41 = vsub.f32 %v4963_v48, %v5645_v9  ;;  %v5006_v22 = vand.u32 4294901760, %v4969_v4  ;;  %v5653_v48 = vand.u32 4294901760, %v4971_v34 }
 0x407   :  { %12414 = vst [vmem:[#allocation137_spill] sm:$0xff] %v10986_v0  ;;  %8130 = vmatprep.subr.bf16.mxu0 %v10986_v0  ;;  %12416 = vst [vmem:[#allocation139_spill] sm:$0xff] %v11017_v7  ;;  %v11815_v14 = vand.u32 4294901760, %v10889_v38  ;;  %v11050_v62 = vpack.c.bf16 %v5651_v55, %v5647_v25  ;;  %v11052_v9 = vsub.f32 %v4972_v37, %v5651_v55  ;;  %v11823_v55 = vand.u32 4294901760, %v10910_v49 }
 0x408   :  { %v11059_v57 = vsub.f32 %v4969_v4, %v5006_v22  ;;  %v11061_v6 = vpack.c.bf16 %v5653_v48, %v5649_v11  ;;  %v11814_v4 = vand.u32 4294901760, %v10893_v43 }
 0x409   :  { %8132 = vmatpush1.bf16.msra.mxu0 %v11017_v7  ;;  %12420 = vst [vmem:[#allocation143_spill] sm:$0xff] %v11050_v62  ;;  %8230 = vmatprep.subr.bf16.mxu1 %v11050_v62  ;;  %v5071_v37 = vsub.f32 %v10889_v38, %v11815_v14 }
 0x40a   :  { %8134 = vmatprep.subr.bf16.mxu0 %v11038_v13  ;;  %12422 = vst [vmem:[#allocation145_spill] sm:$0xff] %v11059_v57  ;;  %12423 = vst [vmem:[#allocation146_spill] sm:$0xff] %v11061_v6  ;;  %v11063_v13 = vsub.f32 %v4967_v28, %v5649_v11  ;;  %8232 = vmatpush1.bf16.msra.mxu1 %v11061_v6  ;;  %v11818_v28 = vand.u32 4294901760, %v10906_v63 }
 0x40c   :  { %12424 = vst [vmem:[#allocation147_spill] sm:$0xff] %v11063_v13 }
 0x416   :  { %v6948_v39 = vpop.f32.mrb[18].mxu1 }
 0x417   :  { %v6949_v5 = vpop.f32.mrb[19].mxu1 }
 0x418   :  { %v6950_v19 = vadd.f32 %v6949_v5, %v6948_v39  ;;  %v11046_v39 = vsub.f32 %v4968_v53, %v5647_v25  ;;  %v5002_v5 = vand.u32 4294901760, %v4965_v26  ;;  %v11066_v25 = vsub.f32 %v4971_v34, %v5653_v48 }
 0x419   :  { %v11830_v34 = vand.u32 4294901760, %v10916_v40  ;;  %v11824_v48 = vand.u32 4294901760, %v10931_v29 }
 0x41a   :  { %12419 = vst [vmem:[#allocation142_spill] sm:$0xff] %v11046_v39  ;;  %v11054_v59 = vsub.f32 %v4965_v26, %v5002_v5  ;;  %v11057_v53 = vpack.c.bf16 %v5006_v22, %v5002_v5  ;;  %12425 = vst [vmem:[#allocation149_spill] sm:$0xff] %v11066_v25  ;;  %v5083_v26 = vsub.f32 %v10891_v35, %v11813_v3  ;;  %v5072_v22 = vand.u32 4294901760, %v5071_v37 }
 0x41b   :  { %v5077_v3 = vsub.f32 %v10910_v49, %v11823_v55 }
 0x41c   :  { %12421 = vst [vmem:[#allocation144_spill] sm:$0xff] %v11057_v53  ;;  %8136 = vmatpush1.bf16.msra.mxu0 %v11057_v53  ;;  %v5084_v11 = vand.u32 4294901760, %v5083_v26  ;;  %v5724_v26 = vsub.f32 %v10931_v29, %v11824_v48  ;;  %v11828_v48 = vand.u32 4294901760, %v10952_v17 }
 0x41d   :  { %v6913_v61 = vpop.f32.mrb[18].mxu0 }
 0x41e   :  { %v6914_v33 = vpop.f32.mrb[19].mxu0  ;;  %v8137_v37 = vpack.c.bf16 %v5084_v11, %v5072_v22  ;;  %v5725_v62 = vand.u32 4294901760, %v5724_v26 }
 0x41f   :  { %v6915_v32 = vadd.f32 %v6914_v33, %v6913_v61  ;;  %v5718_v61 = vsub.f32 %v10893_v43, %v11814_v4  ;;  %v5730_v33 = vsub.f32 %v10906_v63, %v11818_v28  ;;  %v11827_v4 = vand.u32 4294901760, %v10933_v50 }
 0x420   :  { %v5078_v28 = vand.u32 4294901760, %v5077_v3  ;;  %8138 = vmatprep.subr.bf16.mxu0 %v8137_v37  ;;  %v11831_v37 = vand.u32 4294901760, %v10960_v18 }
 0x421   :  { %v3969_v5 = vadd.f32 %v6915_v32, %v10858_v51  ;;  %v5089_v51 = vsub.f32 %v10916_v40, %v11830_v34  ;;  %v5719_v14 = vand.u32 4294901760, %v5718_v61  ;;  %v5731_v6 = vand.u32 4294901760, %v5730_v33 }
 0x422   :  { %v5736_v55 = vsub.f32 %v10933_v50, %v11827_v4  ;;  %v11829_v61 = vand.u32 4294901760, %v10958_v30 }
 0x423   :  { %v11094_v32 = vadd.f32 %v6950_v19, %v3969_v5  ;;  %v5090_v53 = vand.u32 4294901760, %v5089_v51  ;;  %v11825_v19 = vand.u32 4294901760, %v10935_v58  ;;  %v11826_v5 = vand.u32 4294901760, %v10948_v27 }
 0x424   :  { %v8233_v22 = vpack.c.bf16 %v5731_v6, %v5719_v14  ;;  %v5737_v33 = vand.u32 4294901760, %v5736_v55  ;;  %v5742_v6 = vsub.f32 %v10952_v17, %v11828_v48  ;;  %v5754_v14 = vsub.f32 %v10958_v30, %v11829_v61 }
 0x425   :  { %v11105_v11 = vpack.c.bf16 %v5090_v53, %v5078_v28  ;;  %v5095_v3 = vsub.f32 %v10935_v58, %v11825_v19  ;;  %v5107_v51 = vsub.f32 %v10948_v27, %v11826_v5  ;;  %v11832_v53 = vand.u32 4294901760, %v10969_v31 }
 0x426   :  { %8234 = vmatprep.subr.bf16.mxu1 %v8233_v22  ;;  %v11833_v28 = vand.u32 4294901760, %v10971_v2  ;;  %v11124_v55 = vpack.c.bf16 %v5737_v33, %v5725_v62  ;;  %v5101_v22 = vsub.f32 %v10960_v18, %v11831_v37  ;;  %v5743_v5 = vand.u32 4294901760, %v5742_v6 }
 0x427   :  { %v5096_v26 = vand.u32 4294901760, %v5095_v3  ;;  %v5108_v19 = vand.u32 4294901760, %v5107_v51  ;;  %v5755_v4 = vand.u32 4294901760, %v5754_v14  ;;  %v5113_v48 = vsub.f32 %v10969_v31, %v11832_v53 }
 0x428   :  { %v5748_v61 = vsub.f32 %v10971_v2, %v11833_v28  ;;  %v5102_v62 = vand.u32 4294901760, %v5101_v22  ;;  %v11834_v33 = vand.u32 4294901760, %v10984_v42  ;;  %v11835_v3 = vand.u32 4294901760, %v10988_v12 }
 0x429   :  { %v11135_v34 = vpack.c.bf16 %v5108_v19, %v5096_v26  ;;  %v11139_v51 = vpack.c.bf16 %v5755_v4, %v5743_v5  ;;  %v5114_v37 = vand.u32 4294901760, %v5113_v48  ;;  %v11838_v14 = vand.u32 4294901760, %v11000_v60 }
 0x42a   :  { %v5749_v6 = vand.u32 4294901760, %v5748_v61  ;;  %v5760_v53 = vsub.f32 %v10984_v42, %v11834_v33  ;;  %v5119_v19 = vsub.f32 %v10988_v12, %v11835_v3  ;;  %v11843_v26 = vand.u32 4294901760, %v11004_v46 }
 0x42b   :  { %v11846_v22 = vand.u32 4294901760, %v11006_v24  ;;  %v11150_v28 = vpack.c.bf16 %v5114_v37, %v5102_v62  ;;  %v5131_v4 = vsub.f32 %v11000_v60, %v11838_v14  ;;  %v11847_v48 = vand.u32 4294901760, %v11019_v20 }
 0x42c   :  { %v11850_v5 = vand.u32 4294901760, %v11021_v47  ;;  %v5761_v61 = vand.u32 4294901760, %v5760_v53  ;;  %v5120_v33 = vand.u32 4294901760, %v5119_v19  ;;  %v5766_v3 = vsub.f32 %v11004_v46, %v11843_v26 }
 0x42d   :  { %v5778_v7 = vsub.f32 %v11006_v24, %v11846_v22  ;;  %v5132_v37 = vand.u32 4294901760, %v5131_v4  ;;  %v5125_v62 = vsub.f32 %v11019_v20, %v11847_v48  ;;  %v11853_v53 = vand.u32 4294901760, %v11034_v45 }
 0x42e   :  { %v5137_v14 = vsub.f32 %v11021_v47, %v11850_v5  ;;  %v11170_v19 = vpack.c.bf16 %v5761_v61, %v5749_v6  ;;  %v5767_v52 = vand.u32 4294901760, %v5766_v3  ;;  %v11851_v26 = vand.u32 4294901760, %v11036_v41 }
 0x42f   :  { %v5779_v0 = vand.u32 4294901760, %v5778_v7  ;;  %v11173_v36 = vpack.c.bf16 %v5132_v37, %v5120_v33  ;;  %v5126_v22 = vand.u32 4294901760, %v5125_v62  ;;  %v5772_v48 = vsub.f32 %v11034_v45, %v11853_v53 }
 0x430   :  { %v5138_v4 = vand.u32 4294901760, %v5137_v14  ;;  %v5784_v5 = vsub.f32 %v11036_v41, %v11851_v26  ;;  %v11852_v6 = vand.u32 4294901760, %v11040_v54  ;;  %v11856_v7 = vand.u32 4294901760, %v11044_v16 }
 0x431   :  { %v11178_v21 = vpack.c.bf16 %v5779_v0, %v5767_v52  ;;  %v5773_v33 = vand.u32 4294901760, %v5772_v48  ;;  %v11863_v61 = vand.u32 4294901760, %v11046_v39  ;;  %v11868_v14 = vand.u32 4294901760, %v11052_v9 }
 0x432   :  { %v11185_v3 = vpack.c.bf16 %v5138_v4, %v5126_v22  ;;  %v5785_v37 = vand.u32 4294901760, %v5784_v5  ;;  %v5143_v0 = vsub.f32 %v11040_v54, %v11852_v6  ;;  %v5155_v52 = vsub.f32 %v11044_v16, %v11856_v7 }
 0x433   :  { %12426 = vst [vmem:[#allocation152_spill] sm:$0xff] %v11178_v21  ;;  %v11869_v62 = vand.u32 4294901760, %v11054_v59  ;;  %v5790_v22 = vsub.f32 %v11046_v39, %v11863_v61  ;;  %v5802_v48 = vsub.f32 %v11052_v9, %v11868_v14  ;;  %v5160_v5 = vand.u32 4294901760, %v11059_v57 }
 0x434   :  { %12427 = vst [vmem:[#allocation157_spill] sm:$0xff] %v11185_v3  ;;  %v5795_v4 = vand.u32 4294901760, %v11063_v13  ;;  %v11204_v53 = vpack.c.bf16 %v5785_v37, %v5773_v33  ;;  %v5144_v10 = vand.u32 4294901760, %v5143_v0  ;;  %v5156_v7 = vand.u32 4294901760, %v5155_v52 }
 0x435   :  { %v5149_v15 = vsub.f32 %v11054_v59, %v11869_v62  ;;  %v5791_v23 = vand.u32 4294901760, %v5790_v22  ;;  %v5803_v61 = vand.u32 4294901760, %v5802_v48  ;;  %v5161_v56 = vsub.f32 %v11059_v57, %v5160_v5 }
 0x436   :  { %v7018_v26 = vpop.f32.mrb[20].mxu1  ;;  %v11210_v44 = vpack.c.bf16 %v5156_v7, %v5144_v10  ;;  %v5796_v3 = vsub.f32 %v11063_v13, %v5795_v4  ;;  %v5807_v21 = vand.u32 4294901760, %v11066_v25  ;;  %v12429_v0 = vand.u32 4294901760, %v10891_v35 }
 0x437   :  { %v7019_v6 = vpop.f32.mrb[21].mxu1  ;;  %v5150_v14 = vand.u32 4294901760, %v5149_v15  ;;  %v11214_v33 = vpack.c.bf16 %v5803_v61, %v5791_v23  ;;  %v5162_v37 = vand.u32 4294901760, %v5161_v56  ;;  %v12428_v23 = vand.u32 4294901760, %v10889_v38 }
 0x438   :  { %v7020_v1 = vadd.f32 %v7019_v6, %v7018_v26  ;;  %v5797_v6 = vand.u32 4294901760, %v5796_v3  ;;  %v5808_v52 = vsub.f32 %v11066_v25, %v5807_v21 }
 0x439   :  { %v11225_v7 = vpack.c.bf16 %v5162_v37, %v5150_v14  ;;  %v11258_v61 = vpack.c.bf16 %v12429_v0, %v12428_v23  ;;  %v12440_v0 = vand.u32 4294901760, %v10935_v58  ;;  %v12441_v23 = vand.u32 4294901760, %v10948_v27 }
 0x43a   :  { %v5809_v22 = vand.u32 4294901760, %v5808_v52  ;;  %v12431_v52 = vand.u32 4294901760, %v10893_v43 }
 0x43b   :  { %12430 = vst [vmem:[#allocation158_spill] sm:$0xff] %v11258_v61 }
 0x43c   :  { %v11247_v15 = vpack.c.bf16 %v5809_v22, %v5797_v6  ;;  %v12432_v6 = vand.u32 4294901760, %v10906_v63  ;;  %v12434_v22 = vand.u32 4294901760, %v10910_v49 }
 0x43d   :  { %v6983_v3 = vpop.f32.mrb[20].mxu0 }
 0x43e   :  { %v6984_v37 = vpop.f32.mrb[21].mxu0 }
 0x43f   :  { %v6985_v48 = vadd.f32 %v6984_v37, %v6983_v3  ;;  %v11264_v3 = vpack.c.bf16 %v12432_v6, %v12431_v52  ;;  %v12435_v37 = vand.u32 4294901760, %v10916_v40  ;;  %v12443_v52 = vand.u32 4294901760, %v10952_v17 }
 0x440   :  { %v12444_v6 = vand.u32 4294901760, %v10958_v30 }
 0x441   :  { %v4185_v56 = vadd.f32 %v6985_v48, %v11094_v32  ;;  %12433 = vst [vmem:[#allocation159_spill] sm:$0xff] %v11264_v3  ;;  %v11270_v14 = vpack.c.bf16 %v12435_v37, %v12434_v22  ;;  %v12438_v32 = vand.u32 4294901760, %v10933_v50  ;;  %v11282_v48 = vpack.c.bf16 %v12441_v23, %v12440_v0 }
 0x442   :  { %v11288_v10 = vpack.c.bf16 %v12444_v6, %v12443_v52  ;;  %v12446_v22 = vand.u32 4294901760, %v10960_v18  ;;  %v12447_v37 = vand.u32 4294901760, %v10969_v31  ;;  %v12452_v0 = vand.u32 4294901760, %v10988_v12 }
 0x443   :  { %v4417_v26 = vadd.f32 %v7020_v1, %v4185_v56  ;;  %12436 = vst [vmem:[#allocation160_spill] sm:$0xff] %v11270_v14  ;;  %v12437_v1 = vand.u32 4294901760, %v10931_v29  ;;  %12442 = vst [vmem:[#allocation162_spill] sm:$0xff] %v11282_v48  ;;  %v12453_v23 = vand.u32 4294901760, %v11000_v60  ;;  %v12455_v52 = vand.u32 4294901760, %v11004_v46 }
 0x444   :  { %12445 = vst [vmem:[#allocation163_spill] sm:$0xff] %v11288_v10  ;;  %v11294_v62 = vpack.c.bf16 %v12447_v37, %v12446_v22  ;;  %v12456_v6 = vand.u32 4294901760, %v11006_v24  ;;  %v12458_v22 = vand.u32 4294901760, %v11019_v20  ;;  %v12459_v37 = vand.u32 4294901760, %v11021_v47 }
 0x445   :  { %v11276_v56 = vpack.c.bf16 %v12438_v32, %v12437_v1  ;;  %v12449_v1 = vand.u32 4294901760, %v10971_v2  ;;  %v12450_v32 = vand.u32 4294901760, %v10984_v42  ;;  %v11306_v48 = vpack.c.bf16 %v12453_v23, %v12452_v0 }
 0x446   :  { %12448 = vst [vmem:[#allocation164_spill] sm:$0xff] %v11294_v62  ;;  %v11312_v10 = vpack.c.bf16 %v12456_v6, %v12455_v52  ;;  %v11318_v62 = vpack.c.bf16 %v12459_v37, %v12458_v22  ;;  %v12465_v52 = vand.u32 4294901760, %v11044_v16  ;;  %v12468_v22 = vand.u32 4294901760, %v11052_v9 }
 0x447   :  { %12439 = vst [vmem:[#allocation161_spill] sm:$0xff] %v11276_v56  ;;  %v11300_v56 = vpack.c.bf16 %v12450_v32, %v12449_v1  ;;  %12454 = vst [vmem:[#allocation166_spill] sm:$0xff] %v11306_v48  ;;  %v12461_v32 = vand.u32 4294901760, %v11034_v45  ;;  %v12464_v48 = vand.u32 4294901760, %v11040_v54 }
 0x448   :  { %12457 = vst [vmem:[#allocation167_spill] sm:$0xff] %v11312_v10  ;;  %12460 = vst [vmem:[#allocation168_spill] sm:$0xff] %v11318_v62  ;;  %v12467_v10 = vand.u32 4294901760, %v11046_v39  ;;  %v12470_v62 = vand.u32 4294901760, %v11054_v59 }
 0x449   :  { %12451 = vst [vmem:[#allocation165_spill] sm:$0xff] %v11300_v56  ;;  %v12462_v56 = vand.u32 4294901760, %v11036_v41  ;;  %v11330_v6 = vpack.c.bf16 %v12465_v52, %v12464_v48 }
 0x44a   :  { %v11336_v37 = vpack.c.bf16 %v12468_v22, %v12467_v10  ;;  %v11340_v3 = vpack.c.bf16 %v5160_v5, %v12470_v62 }
 0x44b   :  { %v11324_v14 = vpack.c.bf16 %v12462_v56, %v12461_v32  ;;  %12466 = vst [vmem:[#allocation5_spill] sm:$0xff] %v11330_v6  ;;  %v11342_v56 = vpack.c.bf16 %v5807_v21, %v5795_v4 }
 0x44c   :  { %12469 = vst [vmem:[#allocation14_spill] sm:$0xff] %v11336_v37 }
 0x44d   :  { %12463 = vst [vmem:[#allocation12_spill] sm:$0xff] %v11324_v14 }
 0x456   :  { %v7088_v1 = vpop.f32.mrb[22].mxu1 }
 0x457   :  { %v7089_v0 = vpop.f32.mrb[23].mxu1 }
 0x458   :  { %v7090_v23 = vadd.f32 %v7089_v0, %v7088_v1 }
 0x45d   :  { %v7053_v32 = vpop.f32.mrb[22].mxu0 }
 0x45e   :  { %v7054_v1 = vpop.f32.mrb[23].mxu0 }
 0x45f   :  { %v7055_v0 = vadd.f32 %v7054_v1, %v7053_v32  ;;  %v12518_v32 = vld [vmem:[#allocation167_spill] sm:$0xff]  ;;  %v12519_v1 = vld [vmem:[#allocation168_spill] sm:$0xff] }
 0x461   :  { %v4555_v14 = vadd.f32 %v7055_v0, %v4417_v26  ;;  %v12520_v0 = vld [vmem:[#allocation12_spill] sm:$0xff] }
 0x463   :  { %v4663_v61 = vadd.f32 %v7090_v23, %v4555_v14  ;;  %v12515_v23 = vld [vmem:[#allocation164_spill] sm:$0xff] }
 0x476   :  { %v7158_v13 = vpop.f32.mrb[24].mxu1 }
 0x477   :  { %v7159_v48 = vpop.f32.mrb[25].mxu1 }
 0x478   :  { %v7160_v52 = vadd.f32 %v7159_v48, %v7158_v13  ;;  %v12521_v48 = vld [vmem:[#allocation5_spill] sm:$0xff] }
 0x47d   :  { %v7123_v6 = vpop.f32.mrb[24].mxu0 }
 0x47e   :  { %v7124_v25 = vpop.f32.mrb[25].mxu0 }
 0x47f   :  { %v7125_v57 = vadd.f32 %v7124_v25, %v7123_v6  ;;  %v12473_v25 = vpack.c.bf16 %v10891_v35, %v10889_v38  ;;  %v12477_v38 = vpack.c.bf16 %v10948_v27, %v10935_v58  ;;  %v12478_v35 = vpack.c.bf16 %v10958_v30, %v10952_v17  ;;  %v12486_v27 = vld [vmem:[#allocation142_spill] sm:$0xff]  ;;  %v12488_v30 = vld [vmem:[#allocation145_spill] sm:$0xff] }
 0x480   :  { %v12485_v58 = vpack.c.bf16 %v11044_v16, %v11040_v54  ;;  %v12487_v17 = vpack.c.bf16 %v11052_v9, %v12486_v27  ;;  %v12501_v54 = vld [vmem:[#allocation137_spill] sm:$0xff]  ;;  %v12502_v16 = vld [vmem:[#allocation138_spill] sm:$0xff]  ;;  %v12503_v9 = vld [vmem:[#allocation139_spill] sm:$0xff] }
 0x481   :  { %v4831_v39 = vadd.f32 %v7125_v57, %v4663_v61  ;;  %v12471_v57 = vld [vmem:[#allocation152_spill] sm:$0xff]  ;;  %v12514_v61 = vld [vmem:[#allocation163_spill] sm:$0xff]  ;;  %v12516_v6 = vld [vmem:[#allocation165_spill] sm:$0xff] }
 0x483   :  { %v4935_v10 = vadd.f32 %v7160_v52, %v4831_v39  ;;  %v12472_v39 = vld [vmem:[#allocation157_spill] sm:$0xff]  ;;  %v12522_v52 = vld [vmem:[#allocation14_spill] sm:$0xff] }
 0x485   :  { %v4938_v22 = vmul.f32 0.125, %v4935_v10 }
 0x487   :  { %v4939_v37 = vadd.f32 1e-05, %v4938_v22 }
 0x489   :  { %8356 = vrsqrt.f32 %v4939_v37  ;;  %v12517_v37 = vld [vmem:[#allocation166_spill] sm:$0xff] }
 0x493   :  { %v8357_v62 = vpop.eup %8356 }
 0x494   :  { %v4974_v21 = vsel %vm1864_vm0, %v8357_v62, 0 }
 0x495   :  { %v11345_v5 = vand.u32 4294901760, %v4974_v21 }
 0x497   :  { %v5058_v4 = vsub.f32 %v4974_v21, %v11345_v5  ;;  %v12523_v21 = vld [vmem:[#allocation154_spill] sm:$0xff] }
 0x499   :  { %v11348_v26 = vand.u32 4294901760, %v5058_v4 }
 0x49b   :  { %v5060_v14 = vsub.f32 %v5058_v4, %v11348_v26 }
 0x49d   :  { %v5061_v13 = vand.u32 4294901760, %v5060_v14 }
 0x49f   :  { %5062 = vmatmul.mubr.f32.vlgmr.msra.gmra.mrb[26].mxu0 %v5061_v13  ;;  %5709 = vmatmul.mubr.f32.vlgmr.msra.gmra.mrb[26].mxu1 %v5061_v13 }
 0x4a0   :  { %8140 = vmatpush1.bf16.msra.mxu0 %v11105_v11  ;;  %8236 = vmatpush1.bf16.msra.mxu1 %v11124_v55  ;;  %v12505_v11 = vld [vmem:[#allocation141_spill] sm:$0xff]  ;;  %v12507_v55 = vld [vmem:[#allocation144_spill] sm:$0xff] }
 0x4a1   :  { %8142 = vmatprep.subr.bf16.mxu0 %v11135_v34  ;;  %8238 = vmatprep.subr.bf16.mxu1 %v11139_v51  ;;  %v12476_v34 = vpack.c.bf16 %v10933_v50, %v10931_v29  ;;  %v12483_v29 = vpack.c.bf16 %v11021_v47, %v11019_v20  ;;  %v12484_v50 = vpack.c.bf16 %v11036_v41, %v11034_v45  ;;  %v12497_v20 = vld [vmem:[#allocation151_spill] sm:$0xff]  ;;  %v12498_v47 = vld [vmem:[#allocation134_spill] sm:$0xff]  ;;  %v12500_v41 = vld [vmem:[#allocation136_spill] sm:$0xff] }
 0x4a2   :  { %5212 = vmatprep.mubr.f32.mxu0 %v12219_v8  ;;  %5859 = vmatprep.mubr.f32.mxu1 %v12219_v8  ;;  %v12499_v45 = vld [vmem:[#allocation135_spill] sm:$0xff]  ;;  %v12508_v51 = vld [vmem:[#allocation146_spill] sm:$0xff] }
 0x4a4   :  { %8144 = vmatpush1.bf16.msra.mxu0 %v11150_v28  ;;  %8240 = vmatpush1.bf16.msra.mxu1 %v11170_v19  ;;  %v12506_v28 = vld [vmem:[#allocation143_spill] sm:$0xff] }
 0x4a5   :  { %8146 = vmatprep.subr.bf16.mxu0 %v11173_v36  ;;  %8242 = vmatprep.subr.bf16.mxu1 %v12471_v57  ;;  %v12474_v36 = vpack.c.bf16 %v10906_v63, %v10893_v43  ;;  %v12479_v43 = vpack.c.bf16 %v10969_v31, %v10960_v18  ;;  %v12480_v63 = vpack.c.bf16 %v10984_v42, %v10971_v2  ;;  %v12490_v31 = vld [vmem:[#allocation149_spill] sm:$0xff]  ;;  %v12491_v2 = vld [vmem:[#allocation147_spill] sm:$0xff]  ;;  %v6300_v57 = vld [vmem:[%s11503_s4] sm:$0xf] }
 0x4a6   :  { %v12489_v18 = vpack.c.bf16 %v12488_v30, %v11054_v59  ;;  %v12492_v42 = vpack.c.bf16 %v12490_v31, %v12491_v2  ;;  %v12504_v59 = vld [vmem:[#allocation140_spill] sm:$0xff]  ;;  %v12510_v19 = vld [vmem:[#allocation159_spill] sm:$0xff] }
 0x4a8   :  { %8148 = vmatpush1.bf16.msra.mxu0 %v12472_v39  ;;  %8244 = vmatpush1.bf16.msra.mxu1 %v11204_v53  ;;  %v12509_v53 = vld [vmem:[#allocation158_spill] sm:$0xff] }
 0x4a9   :  { %8150 = vmatprep.subr.bf16.mxu0 %v11210_v44  ;;  %8246 = vmatprep.subr.bf16.mxu1 %v11214_v33  ;;  %v12475_v44 = vpack.c.bf16 %v10916_v40, %v10910_v49  ;;  %v12481_v49 = vpack.c.bf16 %v11000_v60, %v10988_v12  ;;  %v12482_v40 = vpack.c.bf16 %v11006_v24, %v11004_v46  ;;  %v12493_v12 = vld [vmem:[#allocation156_spill] sm:$0xff]  ;;  %v12494_v60 = vld [vmem:[#allocation150_spill] sm:$0xff]  ;;  %v12496_v24 = vld [vmem:[#allocation153_spill] sm:$0xff] }
 0x4aa   :  { %v12495_v46 = vld [vmem:[#allocation148_spill] sm:$0xff] }
 0x4ab   :  { %v12511_v33 = vld [vmem:[#allocation160_spill] sm:$0xff] }
 0x4ac   :  { %8152 = vmatpush1.bf16.msra.mxu0 %v11225_v7  ;;  %8248 = vmatpush1.bf16.msra.mxu1 %v11247_v15  ;;  %v12512_v15 = vld [vmem:[#allocation161_spill] sm:$0xff]  ;;  %v12513_v7 = vld [vmem:[#allocation162_spill] sm:$0xff] }
 0x4ad   :  { %8154 = vmatprep.subr.bf16.mxu0 %v12473_v25  ;;  %8250 = vmatprep.subr.bf16.mxu1 %v12474_v36  ;;  %v12525_v25 = vlaneseq }
 0x4af   :  { %5214 = vmatmul.mubr.f32.vlgmr.msra.gmra.mrb[26].mxu0 %v11345_v5  ;;  %5861 = vmatmul.mubr.f32.vlgmr.msra.gmra.mrb[26].mxu1 %v11345_v5  ;;  %vm6304_vm1 = vcmp.lt.s32.totalorder %v12525_v25, 512 }
 0x4b0   :  { %8156 = vmatpush1.bf16.msra.mxu0 %v12475_v44  ;;  %8252 = vmatpush1.bf16.msra.mxu1 %v12476_v34 }
 0x4b1   :  { %8158 = vmatprep.subr.bf16.mxu0 %v12477_v38  ;;  %8254 = vmatprep.subr.bf16.mxu1 %v12478_v35 }
 0x4b2   :  { %5316 = vmatprep.mubr.f32.mxu0 %v12219_v8  ;;  %5963 = vmatprep.mubr.f32.mxu1 %v12219_v8 }
 0x4b4   :  { %8160 = vmatpush1.bf16.msra.mxu0 %v12479_v43  ;;  %8256 = vmatpush1.bf16.msra.mxu1 %v12480_v63 }
 0x4b5   :  { %8162 = vmatprep.subr.bf16.mxu0 %v12481_v49  ;;  %8258 = vmatprep.subr.bf16.mxu1 %v12482_v40 }
 0x4b8   :  { %8164 = vmatpush1.bf16.msra.mxu0 %v12483_v29  ;;  %8260 = vmatpush1.bf16.msra.mxu1 %v12484_v50 }
 0x4b9   :  { %8166 = vmatprep.subr.bf16.mxu0 %v12485_v58  ;;  %8262 = vmatprep.subr.bf16.mxu1 %v12487_v17 }
 0x4bc   :  { %8168 = vmatpush1.bf16.msra.mxu0 %v12489_v18  ;;  %8264 = vmatpush1.bf16.msra.mxu1 %v12492_v42 }
 0x4bd   :  { %8170 = vmatprep.subr.bf16.mxu0 %v12493_v12  ;;  %8266 = vmatprep.subr.bf16.mxu1 %v12494_v60 }
 0x4bf   :  { %5319 = vmatmul.mubr.f32.vlgmr.msra.gmra.mrb[26].mxu0 %v5058_v4  ;;  %5966 = vmatmul.mubr.f32.vlgmr.msra.gmra.mrb[26].mxu1 %v5058_v4 }
 0x4c0   :  { %8172 = vmatpush1.bf16.msra.mxu0 %v12495_v46  ;;  %8268 = vmatpush1.bf16.msra.mxu1 %v12496_v24 }
 0x4c1   :  { %8174 = vmatprep.subr.bf16.mxu0 %v12497_v20  ;;  %8270 = vmatprep.subr.bf16.mxu1 %v12498_v47 }
 0x4c2   :  { %5405 = vmatprep.mubr.f32.mxu0 %v12219_v8  ;;  %6052 = vmatprep.mubr.f32.mxu1 %v12219_v8 }
 0x4c4   :  { %8176 = vmatpush1.bf16.msra.mxu0 %v12499_v45  ;;  %8272 = vmatpush1.bf16.msra.mxu1 %v12500_v41 }
 0x4c5   :  { %8178 = vmatprep.subr.bf16.mxu0 %v12501_v54  ;;  %8274 = vmatprep.subr.bf16.mxu1 %v12502_v16 }
 0x4c8   :  { %8180 = vmatpush1.bf16.msra.mxu0 %v12503_v9  ;;  %8276 = vmatpush1.bf16.msra.mxu1 %v12504_v59 }
 0x4c9   :  { %8182 = vmatprep.subr.bf16.mxu0 %v12505_v11  ;;  %8278 = vmatprep.subr.bf16.mxu1 %v12506_v28 }
 0x4cc   :  { %8184 = vmatpush1.bf16.msra.mxu0 %v12507_v55  ;;  %8280 = vmatpush1.bf16.msra.mxu1 %v12508_v51 }
 0x4cd   :  { %8186 = vmatprep.subr.bf16.mxu0 %v12509_v53  ;;  %8282 = vmatprep.subr.bf16.mxu1 %v12510_v19 }
 0x4cf   :  { %5409 = vmatmul.mubr.f32.vlgmr.msra.gmra.mrb[26].mxu0 %v11348_v26  ;;  %6056 = vmatmul.mubr.f32.vlgmr.msra.gmra.mrb[26].mxu1 %v11348_v26 }
 0x4d0   :  { %8188 = vmatpush1.bf16.msra.mxu0 %v12511_v33  ;;  %8284 = vmatpush1.bf16.msra.mxu1 %v12512_v15 }
 0x4d1   :  { %8190 = vmatprep.subr.bf16.mxu0 %v12513_v7  ;;  %8286 = vmatprep.subr.bf16.mxu1 %v12514_v61 }
 0x4d2   :  { %5527 = vmatprep.mubr.f32.mxu0 %v12219_v8  ;;  %6174 = vmatprep.mubr.f32.mxu1 %v12219_v8 }
 0x4d4   :  { %8192 = vmatpush1.bf16.msra.mxu0 %v12515_v23  ;;  %8288 = vmatpush1.bf16.msra.mxu1 %v12516_v6 }
 0x4d5   :  { %8194 = vmatprep.subr.bf16.mxu0 %v12517_v37  ;;  %8290 = vmatprep.subr.bf16.mxu1 %v12518_v32 }
 0x4d8   :  { %8196 = vmatpush1.bf16.msra.mxu0 %v12519_v1  ;;  %8292 = vmatpush1.bf16.msra.mxu1 %v12520_v0 }
 0x4d9   :  { %8198 = vmatprep.subr.bf16.mxu0 %v12521_v48  ;;  %8294 = vmatprep.subr.bf16.mxu1 %v12522_v52 }
 0x4dc   :  { %8200 = vmatpush1.bf16.msra.mxu0 %v11340_v3  ;;  %8296 = vmatpush1.bf16.msra.mxu1 %v11342_v56 }
 0x4dd   :  { %8202 = vmatprep.subr.bf16.mxu0 %v12493_v12  ;;  %8298 = vmatprep.subr.bf16.mxu1 %v12494_v60 }
 0x4df   :  { %5529 = vmatmul.mubr.f32.vlgmr.msra.gmra.mrb[26].mxu0 %v11345_v5  ;;  %6176 = vmatmul.mubr.f32.vlgmr.msra.gmra.mrb[26].mxu1 %v11345_v5 }
 0x4e0   :  { %8204 = vmatpush1.bf16.msra.mxu0 %v12495_v46  ;;  %8300 = vmatpush1.bf16.msra.mxu1 %v12496_v24 }
 0x4e1   :  { %8206 = vmatprep.subr.bf16.mxu0 %v12497_v20  ;;  %8302 = vmatprep.subr.bf16.mxu1 %v12498_v47 }
 0x4e2   :  { %5615 = vmatprep.mubr.f32.mxu0 %v12219_v8  ;;  %6262 = vmatprep.mubr.f32.mxu1 %v12219_v8 }
 0x4e4   :  { %8208 = vmatpush1.bf16.msra.mxu0 %v12499_v45  ;;  %8304 = vmatpush1.bf16.msra.mxu1 %v12500_v41 }
 0x4e5   :  { %8210 = vmatprep.subr.bf16.mxu0 %v12501_v54  ;;  %8306 = vmatprep.subr.bf16.mxu1 %v12502_v16 }
 0x4e8   :  { %8212 = vmatpush1.bf16.msra.mxu0 %v12503_v9  ;;  %8308 = vmatpush1.bf16.msra.mxu1 %v12504_v59 }
 0x4e9   :  { %8214 = vmatprep.subr.bf16.mxu0 %v12505_v11  ;;  %8310 = vmatprep.subr.bf16.mxu1 %v12506_v28 }
 0x4ec   :  { %8216 = vmatpush1.bf16.msra.mxu0 %v12507_v55  ;;  %8312 = vmatpush1.bf16.msra.mxu1 %v12508_v51 }
 0x4ef   :  { %5617 = vmatmul.mubr.f32.vlgmr.msra.gmra.mrb[26].mxu0 %v11345_v5  ;;  %6264 = vmatmul.mubr.f32.vlgmr.msra.gmra.mrb[26].mxu1 %v11345_v5  ;;  %v12524_v5 = vld [vmem:[#allocation155_spill] sm:$0xff] }
 0x5c2   :  { %v5618_v8 = vpop.f32.mrb[26].mxu0  ;;  %v6265_v3 = vpop.f32.mrb[26].mxu1 }
 0x5c3   :  { %v5620_v56 = vpop.f32.mrb[27].mxu0  ;;  %v6267_v10 = vpop.f32.mrb[27].mxu1 }
 0x5c4   :  { %v6274_v22 = vcombine.low %v5618_v8, %v5620_v56  ;;  %v6275_v62 = vcombine.low %v6265_v3, %v6267_v10 }
 0x5c6   :  { %v6282_v4 = vrot.slane %v6274_v22, %v12523_v21  ;;  %v6289_v26 = vrot.slane %v6275_v62, %v12523_v21 }
 0x5c8   :  { %v6290_v14 = vcombine.low %v6282_v4, %v6289_v26 }
 0x5ca   :  { %v6297_v13 = vrot.slane %v6290_v14, %v12523_v21 }
 0x5cc   :  { %v6299_v39 = vmul.f32 %v6297_v13, %v12524_v5 }
 0x5ce   :  { %v6301_v36 = vadd.f32 %v6300_v57, %v6299_v39 }
 0x5d0   :  { %6306 = vst.msk [vmem:[#allocation2] sm:$0xf] %vm6304_vm1, %v6301_v36 }
 0x5d1   :  { %8370 = shalt.err (!%p8367_p4)
}
 0x5d2   :  { %s8371_s4 = scalar_lea.hbm %s11504_s5, 64 }
 0x5d3   :  { %p8372_p5 = scmp.ne.s32.totalorder %s11504_s5, %s8371_s4  ;;  %p8375_p6 = scmp.lt.u32.totalorder %s8371_s4, %s11504_s5 }
 0x5d5   :  { %p8377_p7 = pnand %p8375_p6, %p8372_p5 }
 0x5d7   :  { %8380 = shalt.err (!%p8377_p7)
}
 0x5d8   :  { %6316 = dma.vmem_to_hbm [thread:$0]  %s6314_s19, 64, %s11504_s5, [#allocation3]  }
 0x5d9   :  { %8381 = dma.done.wait [#allocation3], 64  }
 0x5da   :  { %8382 = vsyncadd [#allocation3], 4294967232 }
 0x5db   :  { %6320 = vsyncpa [#allocation3], 1 }

</bundles_post_ra>
